<compile_context>
chip_gen: v7x
topology: tpu7x:2x2x1
jax: 0.10.0
libtpu: 0.0.40
codegen_flags: <defaults>
</compile_context>

<pallas_src>
import jax
import jax.numpy as jnp
from jax.experimental import pallas as pl
from jax.experimental.pallas import tpu as pltpu

_LANE = 128          # lane width: pad channel dims to a multiple of this
_SUBLANE_BF16 = 16   # bf16 sublane tile (keeps the slab reshape layout-free)


def _round_up(x, m):
    return (x + m - 1) // m * m


def _conv3x3_bn_relu(xp_ref, w_ref, scale_ref, bias_ref, H):
    """One fused ConvBlock on a zero-haloed VMEM slab.

    xp_ref: (H+2, Wp, Cin) bf16 scratch.  Row r in [1, H] holds image row r-1;
            rows 0 and H+1 are zero.  Column c in [0, W) holds image column c;
            columns [W, Wp) are zero (right-pad zeros; the roll wrap-around
            below turns the last zero column into the left-pad zeros).
    w_ref:  (3, 3, Cin, Cout) bf16 HWIO weights.
    scale_ref / bias_ref: (1, Cout) f32 folded BN scale / bias (incl. conv bias).
    Returns (H, Wp, Cout) f32 post BN+ReLU; columns >= W are don't-care.
    """
    Wp, Cin = xp_ref.shape[1], xp_ref.shape[2]
    Cout = w_ref.shape[-1]
    rows = H * Wp

    acc_l = jnp.zeros((rows, Cout), jnp.float32)   # kw = 0 taps (dw = -1)
    acc_c = jnp.zeros((rows, Cout), jnp.float32)   # kw = 1 taps (dw =  0)
    acc_r = jnp.zeros((rows, Cout), jnp.float32)   # kw = 2 taps (dw = +1)
    for kh in range(3):
        # Leading-axis slice + tile-aligned reshape: contiguous slab, no
        # strided-window relayout copies.
        slab = xp_ref[kh:kh + H].reshape(rows, Cin)
        acc_l = acc_l + jnp.dot(slab, w_ref[kh, 0],
                                preferred_element_type=jnp.float32)
        acc_c = acc_c + jnp.dot(slab, w_ref[kh, 1],
                                preferred_element_type=jnp.float32)
        acc_r = acc_r + jnp.dot(slab, w_ref[kh, 2],
                                preferred_element_type=jnp.float32)

    # Align the kw = 0 / kw = 2 taps with sublane rolls (XLU, rides a free
    # VLIW slot).  The circular wrap reads the all-zero columns >= W, which is
    # exactly the zero border padding the convolution needs.
    acc = (acc_c
           + pltpu.roll(acc_l, shift=1, axis=0)
           + pltpu.roll(acc_r, shift=rows - 1, axis=0))

    y = acc * scale_ref[...] + bias_ref[...]        # folded BatchNorm (f32)
    y = jnp.maximum(y, 0.0)                         # ReLU
    return y.reshape(H, Wp, Cout)


def _bridge_kernel(x_ref, w1_ref, s1_ref, b1_ref, w2_ref, s2_ref, b2_ref,
                   o_ref, xp_scr):
    """Fused Bridge: ConvBlock(in,in) -> ConvBlock(in,out); one image per step.

    x_ref:  (1, H, W, C1p) bf16
    w*_ref: (3, 3, Cin_p, Cout_p) bf16      s*/b*_ref: (1, Cout_p) f32
    o_ref:  (1, H, W, C2p) f32
    xp_scr: (H+2, Wp, C1p) bf16 zero-haloed slab (shared by both blocks).
    """
    _, H, W, _ = x_ref.shape

    # Build the zero-haloed slab for block 1 (halo rows/cols zero, interior=x).
    xp_scr[...] = jnp.zeros_like(xp_scr)
    xp_scr[1:H + 1, 0:W, :] = x_ref[0]

    y1 = _conv3x3_bn_relu(xp_scr, w1_ref, s1_ref, b1_ref, H)

    # Intermediate activation stays in VMEM: rebuild the slab in place
    # (halo is still zero; only the interior is overwritten).
    xp_scr[1:H + 1, 0:W, :] = y1[:, :W, :].astype(xp_scr.dtype)

    y2 = _conv3x3_bn_relu(xp_scr, w2_ref, s2_ref, b2_ref, H)

    # Lane-dense (C2p multiple of 128) output store.
    o_ref[...] = y2[:, :W, :].astype(o_ref.dtype).reshape(o_ref.shape)


def _fold_bn_and_pad(w_hwio, conv_b, gamma, beta, mean, var, cin_p, cout_p,
                     eps=1e-5):
    """Fold conv bias + inference BatchNorm into per-channel scale/bias and
    zero-pad weights/params to lane-dense (multiple-of-128) channel counts."""
    cin, cout = w_hwio.shape[2], w_hwio.shape[3]
    scale = gamma / jnp.sqrt(var + eps)
    bias = scale * (conv_b - mean) + beta
    w_p = jnp.zeros((3, 3, cin_p, cout_p), jnp.float32)
    w_p = w_p.at[:, :, :cin, :cout].set(w_hwio)
    s_p = jnp.zeros((1, cout_p), jnp.float32).at[0, :cout].set(scale)
    b_p = jnp.zeros((1, cout_p), jnp.float32).at[0, :cout].set(bias)
    return w_p.astype(jnp.bfloat16), s_p, b_p


def bridge_forward_nhwc(x_nhwc, params):
    """Bridge forward, NHWC (channels-last) in/out — TPU-native layout."""
    block1, block2 = params
    N, H, W, Cin = x_nhwc.shape
    Cout = block2["w"].shape[-1]
    assert block1["w"].shape[2] == Cin and block1["w"].shape[3] == Cin
    assert block2["w"].shape[2] == Cin

    C1p = _round_up(Cin, _LANE)            # block-1 in/out channels (padded)
    C2p = _round_up(Cout, _LANE)           # block-2 out channels (padded)
    Wp = _round_up(W + 1, _SUBLANE_BF16)   # slab width: >= W+1, tile aligned

    w1, s1, b1 = _fold_bn_and_pad(block1["w"], block1["b"], block1["gamma"],
                                  block1["beta"], block1["mean"],
                                  block1["var"], C1p, C1p)
    w2, s2, b2 = _fold_bn_and_pad(block2["w"], block2["b"], block2["gamma"],
                                  block2["beta"], block2["mean"],
                                  block2["var"], C1p, C2p)

    # bf16 activations for the MXU; channel pad is a no-op at realistic bridge
    # widths (Cin multiple of 128) and tiny here.
    x_p = x_nhwc.astype(jnp.bfloat16)
    if C1p != Cin:
        x_p = jnp.pad(x_p, ((0, 0), (0, 0), (0, 0), (0, C1p - Cin)))

    # NOTE: at realistic bridge widths (Cin = Cout = 2048) the HWIO weights
    # (~75 MiB bf16 each) exceed VMEM: add a Cout tile axis to the grid
    # (block the weight/output last dim; 128-aligned tiles on v5e, 256 on
    # v6e/v7x) and set pltpu.CompilerParams(vmem_limit_bytes=...) explicitly
    # for v7x's 64 MiB VMEM.  Not needed at these channel counts.
    out_p = pl.pallas_call(
        _bridge_kernel,
        out_shape=jax.ShapeDtypeStruct((N, H, W, C2p), jnp.float32),
        grid_spec=pltpu.PrefetchScalarGridSpec(
            num_scalar_prefetch=0,
            grid=(N,),
            in_specs=[
                pl.BlockSpec((1, H, W, C1p), lambda n: (n, 0, 0, 0)),
                pl.BlockSpec((3, 3, C1p, C1p), lambda n: (0, 0, 0, 0)),
                pl.BlockSpec((1, C1p), lambda n: (0, 0)),
                pl.BlockSpec((1, C1p), lambda n: (0, 0)),
                pl.BlockSpec((3, 3, C1p, C2p), lambda n: (0, 0, 0, 0)),
                pl.BlockSpec((1, C2p), lambda n: (0, 0)),
                pl.BlockSpec((1, C2p), lambda n: (0, 0)),
            ],
            out_specs=pl.BlockSpec((1, H, W, C2p), lambda n: (n, 0, 0, 0)),
            scratch_shapes=[pltpu.VMEM((H + 2, Wp, C1p), jnp.bfloat16)],
        ),
        compiler_params=pltpu.CompilerParams(
            dimension_semantics=("parallel",)),   # one image per TC on v7x
    )(x_p, w1, s1, b1, w2, s2, b2)

    if C2p != Cout:
        out_p = out_p[..., :Cout]
    return out_p


def bridge_forward(x_nchw, params):
    """PyTorch-layout entry point (NCHW in/out).  Prefer bridge_forward_nhwc
    on TPU: it keeps the data channels-last end-to-end (no HBM transposes)."""
    x = jnp.transpose(x_nchw, (0, 2, 3, 1))
    y = bridge_forward_nhwc(x, params)
    return jnp.transpose(y, (0, 3, 1, 2))


def make_bridge_params(key, in_channels, out_channels):
    """Deterministic synthetic parameters for Bridge(in_channels, out_channels)."""
    def conv_bn(k, cin, cout):
        kw, kb, kg, kbe, km, kv = jax.random.split(k, 6)
        return dict(
            w=0.1 * jax.random.normal(kw, (3, 3, cin, cout), jnp.float32),  # HWIO
            b=0.05 * jax.random.normal(kb, (cout,), jnp.float32),
            gamma=1.0 + 0.1 * jax.random.normal(kg, (cout,), jnp.float32),
            beta=0.1 * jax.random.normal(kbe, (cout,), jnp.float32),
            mean=0.1 * jax.random.normal(km, (cout,), jnp.float32),
            var=jax.random.uniform(kv, (cout,), jnp.float32, 0.5, 1.5),
        )

    k1, k2 = jax.random.split(key)
    return (conv_bn(k1, in_channels, in_channels),
            conv_bn(k2, in_channels, out_channels))


def bridge_reference_nhwc(x, params, eps=1e-5):
    """Pure-JAX (XLA) reference: Conv3x3(pad=1) -> BN(inference) -> ReLU, twice."""
    def block(x, p):
        y = jax.lax.conv_general_dilated(
            x, p["w"], window_strides=(1, 1), padding="SAME",
            dimension_numbers=("NHWC", "HWIO", "NHWC"),
            precision=jax.lax.Precision.HIGHEST)
        y = y + p["b"]
        y = (y - p["mean"]) * (p["gamma"] / jnp.sqrt(p["var"] + eps)) + p["beta"]
        return jnp.maximum(y, 0.0)

    b1, b2 = params
    return block(block(x, b1), b2)


if __name__ == "__main__":
    key = jax.random.PRNGKey(0)
    k_x, k_p = jax.random.split(key)

    N, C_IN, C_OUT, HW = 2, 8, 16, 16
    # Channels-last (NHWC) input — TPU-native; semantically the same Bridge as
    # the PyTorch NCHW module (bridge_forward provides exact NCHW parity).
    x = jax.random.normal(k_x, (N, HW, HW, C_IN), jnp.float32)

    params = make_bridge_params(k_p, C_IN, C_OUT)

    out = jax.jit(bridge_forward_nhwc)(x, params)
    out = jax.block_until_ready(out)

    assert out.shape == (N, HW, HW, C_OUT), out.shape
    assert bool(jnp.all(out >= 0.0))                    # ReLU output

    ref = bridge_reference_nhwc(x, params)
    max_err = float(jnp.max(jnp.abs(out - ref)))
    assert max_err < 1e-1, f"max |pallas - reference| = {max_err}"  # bf16 MXU tol

    print("KERNEL_OK")
</pallas_src>

<mosaic_0001>
module attributes {stable_mosaic.version = 11 : i64} {
  func.func @_bridge_kernel(%arg0: i32, %arg1: memref<1x16x16x128xbf16, #tpu.memory_space<vmem>>, %arg2: memref<3x3x128x128xbf16, #tpu.memory_space<vmem>>, %arg3: memref<1x128xf32, #tpu.memory_space<vmem>>, %arg4: memref<1x128xf32, #tpu.memory_space<vmem>>, %arg5: memref<3x3x128x128xbf16, #tpu.memory_space<vmem>>, %arg6: memref<1x128xf32, #tpu.memory_space<vmem>>, %arg7: memref<1x128xf32, #tpu.memory_space<vmem>>, %arg8: memref<1x16x16x128xf32, #tpu.memory_space<vmem>>, %arg9: memref<18x32x128xbf16, #tpu.memory_space<vmem>>) attributes {dimension_semantics = [#tpu.dimension_semantics<parallel>], iteration_bounds = array<i64: 2>, scalar_prefetch = 0 : i64, scratch_operands = 1 : i64, tpu.core_type = #tpu.core_type<tc>, window_params = [{transform_indices = @transform_0, window_bounds = array<i64: 1, 16, 16, 128>}, {pipeline_mode = #tpu.pipeline_mode<synchronous>, transform_indices = @transform_1, window_bounds = array<i64: 3, 3, 128, 128>}, {pipeline_mode = #tpu.pipeline_mode<synchronous>, transform_indices = @transform_2, window_bounds = array<i64: 1, 128>}, {pipeline_mode = #tpu.pipeline_mode<synchronous>, transform_indices = @transform_3, window_bounds = array<i64: 1, 128>}, {pipeline_mode = #tpu.pipeline_mode<synchronous>, transform_indices = @transform_4, window_bounds = array<i64: 3, 3, 128, 128>}, {pipeline_mode = #tpu.pipeline_mode<synchronous>, transform_indices = @transform_5, window_bounds = array<i64: 1, 128>}, {pipeline_mode = #tpu.pipeline_mode<synchronous>, transform_indices = @transform_6, window_bounds = array<i64: 1, 128>}, {transform_indices = @transform_7, window_bounds = array<i64: 1, 16, 16, 128>}]} {
    %cst = arith.constant 0.000000e+00 : bf16
    %0 = vector.broadcast %cst : bf16 to vector<18x32x128xbf16>
    %c0 = arith.constant 0 : index
    %c0_0 = arith.constant 0 : index
    %c0_1 = arith.constant 0 : index
    %1 = vector.load %arg9[%c0, %c0_0, %c0_1] : memref<18x32x128xbf16, #tpu.memory_space<vmem>>, vector<18x32x128xbf16>
    tpu.vector_store %arg9[%c0, %c0_0, %c0_1], %0 {strides = array<i32>} : memref<18x32x128xbf16, #tpu.memory_space<vmem>>, vector<18x32x128xbf16>,
    %c0_2 = arith.constant 0 : index
    %c0_3 = arith.constant 0 : index
    %c0_4 = arith.constant 0 : index
    %c0_5 = arith.constant 0 : index
    %2 = vector.load %arg1[%c0_2, %c0_3, %c0_4, %c0_5] : memref<1x16x16x128xbf16, #tpu.memory_space<vmem>>, vector<1x16x16x128xbf16>
    %3 = vector.shape_cast %2 : vector<1x16x16x128xbf16> to vector<16x16x128xbf16>
    %c1 = arith.constant 1 : index
    %c0_6 = arith.constant 0 : index
    %c0_7 = arith.constant 0 : index
    %4 = vector.load %arg9[%c1, %c0_6, %c0_7] : memref<18x32x128xbf16, #tpu.memory_space<vmem>>, vector<16x16x128xbf16>
    tpu.vector_store %arg9[%c1, %c0_6, %c0_7], %3 {strides = array<i32>} : memref<18x32x128xbf16, #tpu.memory_space<vmem>>, vector<16x16x128xbf16>,
    %cst_8 = arith.constant 0.000000e+00 : f32
    %5 = vector.broadcast %cst_8 : f32 to vector<512x128xf32>
    %cst_9 = arith.constant 0.000000e+00 : f32
    %6 = vector.broadcast %cst_9 : f32 to vector<512x128xf32>
    %cst_10 = arith.constant 0.000000e+00 : f32
    %7 = vector.broadcast %cst_10 : f32 to vector<512x128xf32>
    %c0_11 = arith.constant 0 : index
    %c0_12 = arith.constant 0 : index
    %c0_13 = arith.constant 0 : index
    %8 = vector.load %arg9[%c0_11, %c0_12, %c0_13] : memref<18x32x128xbf16, #tpu.memory_space<vmem>>, vector<16x32x128xbf16>
    %9 = vector.shape_cast %8 : vector<16x32x128xbf16> to vector<512x128xbf16>
    %c0_14 = arith.constant 0 : index
    %c0_15 = arith.constant 0 : index
    %c0_16 = arith.constant 0 : index
    %c0_17 = arith.constant 0 : index
    %10 = vector.load %arg2[%c0_14, %c0_15, %c0_16, %c0_17] : memref<3x3x128x128xbf16, #tpu.memory_space<vmem>>, vector<1x1x128x128xbf16>
    %11 = vector.shape_cast %10 : vector<1x1x128x128xbf16> to vector<128x128xbf16>
    %cst_18 = arith.constant dense<0.000000e+00> : vector<512x128xf32>
    %12 = tpu.matmul %9, %11, %cst_18 {dimension_numbers = #tpu.dot_dimension_numbers<[1], [0], [0], [1], [0, 0, 1, 1], [], []>} : vector<512x128xbf16>, vector<128x128xbf16>, vector<512x128xf32> -> vector<512x128xf32>
    %13 = arith.addf %5, %12 : vector<512x128xf32>
    %c0_19 = arith.constant 0 : index
    %c1_20 = arith.constant 1 : index
    %c0_21 = arith.constant 0 : index
    %c0_22 = arith.constant 0 : index
    %14 = vector.load %arg2[%c0_19, %c1_20, %c0_21, %c0_22] : memref<3x3x128x128xbf16, #tpu.memory_space<vmem>>, vector<1x1x128x128xbf16>
    %15 = vector.shape_cast %14 : vector<1x1x128x128xbf16> to vector<128x128xbf16>
    %cst_23 = arith.constant dense<0.000000e+00> : vector<512x128xf32>
    %16 = tpu.matmul %9, %15, %cst_23 {dimension_numbers = #tpu.dot_dimension_numbers<[1], [0], [0], [1], [0, 0, 1, 1], [], []>} : vector<512x128xbf16>, vector<128x128xbf16>, vector<512x128xf32> -> vector<512x128xf32>
    %17 = arith.addf %6, %16 : vector<512x128xf32>
    %c0_24 = arith.constant 0 : index
    %c2 = arith.constant 2 : index
    %c0_25 = arith.constant 0 : index
    %c0_26 = arith.constant 0 : index
    %18 = vector.load %arg2[%c0_24, %c2, %c0_25, %c0_26] : memref<3x3x128x128xbf16, #tpu.memory_space<vmem>>, vector<1x1x128x128xbf16>
    %19 = vector.shape_cast %18 : vector<1x1x128x128xbf16> to vector<128x128xbf16>
    %cst_27 = arith.constant dense<0.000000e+00> : vector<512x128xf32>
    %20 = tpu.matmul %9, %19, %cst_27 {dimension_numbers = #tpu.dot_dimension_numbers<[1], [0], [0], [1], [0, 0, 1, 1], [], []>} : vector<512x128xbf16>, vector<128x128xbf16>, vector<512x128xf32> -> vector<512x128xf32>
    %21 = arith.addf %7, %20 : vector<512x128xf32>
    %c1_28 = arith.constant 1 : index
    %c0_29 = arith.constant 0 : index
    %c0_30 = arith.constant 0 : index
    %22 = vector.load %arg9[%c1_28, %c0_29, %c0_30] : memref<18x32x128xbf16, #tpu.memory_space<vmem>>, vector<16x32x128xbf16>
    %23 = vector.shape_cast %22 : vector<16x32x128xbf16> to vector<512x128xbf16>
    %c1_31 = arith.constant 1 : index
    %c0_32 = arith.constant 0 : index
    %c0_33 = arith.constant 0 : index
    %c0_34 = arith.constant 0 : index
    %24 = vector.load %arg2[%c1_31, %c0_32, %c0_33, %c0_34] : memref<3x3x128x128xbf16, #tpu.memory_space<vmem>>, vector<1x1x128x128xbf16>
    %25 = vector.shape_cast %24 : vector<1x1x128x128xbf16> to vector<128x128xbf16>
    %cst_35 = arith.constant dense<0.000000e+00> : vector<512x128xf32>
    %26 = tpu.matmul %23, %25, %cst_35 {dimension_numbers = #tpu.dot_dimension_numbers<[1], [0], [0], [1], [0, 0, 1, 1], [], []>} : vector<512x128xbf16>, vector<128x128xbf16>, vector<512x128xf32> -> vector<512x128xf32>
    %27 = arith.addf %13, %26 : vector<512x128xf32>
    %c1_36 = arith.constant 1 : index
    %c1_37 = arith.constant 1 : index
    %c0_38 = arith.constant 0 : index
    %c0_39 = arith.constant 0 : index
    %28 = vector.load %arg2[%c1_36, %c1_37, %c0_38, %c0_39] : memref<3x3x128x128xbf16, #tpu.memory_space<vmem>>, vector<1x1x128x128xbf16>
    %29 = vector.shape_cast %28 : vector<1x1x128x128xbf16> to vector<128x128xbf16>
    %cst_40 = arith.constant dense<0.000000e+00> : vector<512x128xf32>
    %30 = tpu.matmul %23, %29, %cst_40 {dimension_numbers = #tpu.dot_dimension_numbers<[1], [0], [0], [1], [0, 0, 1, 1], [], []>} : vector<512x128xbf16>, vector<128x128xbf16>, vector<512x128xf32> -> vector<512x128xf32>
    %31 = arith.addf %17, %30 : vector<512x128xf32>
    %c1_41 = arith.constant 1 : index
    %c2_42 = arith.constant 2 : index
    %c0_43 = arith.constant 0 : index
    %c0_44 = arith.constant 0 : index
    %32 = vector.load %arg2[%c1_41, %c2_42, %c0_43, %c0_44] : memref<3x3x128x128xbf16, #tpu.memory_space<vmem>>, vector<1x1x128x128xbf16>
    %33 = vector.shape_cast %32 : vector<1x1x128x128xbf16> to vector<128x128xbf16>
    %cst_45 = arith.constant dense<0.000000e+00> : vector<512x128xf32>
    %34 = tpu.matmul %23, %33, %cst_45 {dimension_numbers = #tpu.dot_dimension_numbers<[1], [0], [0], [1], [0, 0, 1, 1], [], []>} : vector<512x128xbf16>, vector<128x128xbf16>, vector<512x128xf32> -> vector<512x128xf32>
    %35 = arith.addf %21, %34 : vector<512x128xf32>
    %c2_46 = arith.constant 2 : index
    %c0_47 = arith.constant 0 : index
    %c0_48 = arith.constant 0 : index
    %36 = vector.load %arg9[%c2_46, %c0_47, %c0_48] : memref<18x32x128xbf16, #tpu.memory_space<vmem>>, vector<16x32x128xbf16>
    %37 = vector.shape_cast %36 : vector<16x32x128xbf16> to vector<512x128xbf16>
    %c2_49 = arith.constant 2 : index
    %c0_50 = arith.constant 0 : index
    %c0_51 = arith.constant 0 : index
    %c0_52 = arith.constant 0 : index
    %38 = vector.load %arg2[%c2_49, %c0_50, %c0_51, %c0_52] : memref<3x3x128x128xbf16, #tpu.memory_space<vmem>>, vector<1x1x128x128xbf16>
    %39 = vector.shape_cast %38 : vector<1x1x128x128xbf16> to vector<128x128xbf16>
    %cst_53 = arith.constant dense<0.000000e+00> : vector<512x128xf32>
    %40 = tpu.matmul %37, %39, %cst_53 {dimension_numbers = #tpu.dot_dimension_numbers<[1], [0], [0], [1], [0, 0, 1, 1], [], []>} : vector<512x128xbf16>, vector<128x128xbf16>, vector<512x128xf32> -> vector<512x128xf32>
    %41 = arith.addf %27, %40 : vector<512x128xf32>
    %c2_54 = arith.constant 2 : index
    %c1_55 = arith.constant 1 : index
    %c0_56 = arith.constant 0 : index
    %c0_57 = arith.constant 0 : index
    %42 = vector.load %arg2[%c2_54, %c1_55, %c0_56, %c0_57] : memref<3x3x128x128xbf16, #tpu.memory_space<vmem>>, vector<1x1x128x128xbf16>
    %43 = vector.shape_cast %42 : vector<1x1x128x128xbf16> to vector<128x128xbf16>
    %cst_58 = arith.constant dense<0.000000e+00> : vector<512x128xf32>
    %44 = tpu.matmul %37, %43, %cst_58 {dimension_numbers = #tpu.dot_dimension_numbers<[1], [0], [0], [1], [0, 0, 1, 1], [], []>} : vector<512x128xbf16>, vector<128x128xbf16>, vector<512x128xf32> -> vector<512x128xf32>
    %45 = arith.addf %31, %44 : vector<512x128xf32>
    %c2_59 = arith.constant 2 : index
    %c2_60 = arith.constant 2 : index
    %c0_61 = arith.constant 0 : index
    %c0_62 = arith.constant 0 : index
    %46 = vector.load %arg2[%c2_59, %c2_60, %c0_61, %c0_62] : memref<3x3x128x128xbf16, #tpu.memory_space<vmem>>, vector<1x1x128x128xbf16>
    %47 = vector.shape_cast %46 : vector<1x1x128x128xbf16> to vector<128x128xbf16>
    %cst_63 = arith.constant dense<0.000000e+00> : vector<512x128xf32>
    %48 = tpu.matmul %37, %47, %cst_63 {dimension_numbers = #tpu.dot_dimension_numbers<[1], [0], [0], [1], [0, 0, 1, 1], [], []>} : vector<512x128xbf16>, vector<128x128xbf16>, vector<512x128xf32> -> vector<512x128xf32>
    %49 = arith.addf %35, %48 : vector<512x128xf32>
    %c1_i32 = arith.constant 1 : i32
    %50 = tpu.dynamic_rotate %41 by %c1_i32 dim 0 : vector<512x128xf32>, i32 -> vector<512x128xf32>
    %51 = arith.addf %45, %50 : vector<512x128xf32>
    %c511_i32 = arith.constant 511 : i32
    %52 = tpu.dynamic_rotate %49 by %c511_i32 dim 0 : vector<512x128xf32>, i32 -> vector<512x128xf32>
    %53 = arith.addf %51, %52 : vector<512x128xf32>
    %c0_64 = arith.constant 0 : index
    %c0_65 = arith.constant 0 : index
    %54 = vector.load %arg3[%c0_64, %c0_65] : memref<1x128xf32, #tpu.memory_space<vmem>>, vector<1x128xf32>
    %55 = vector.broadcast %54 : vector<1x128xf32> to vector<512x128xf32>
    %56 = arith.mulf %53, %55 : vector<512x128xf32>
    %c0_66 = arith.constant 0 : index
    %c0_67 = arith.constant 0 : index
    %57 = vector.load %arg4[%c0_66, %c0_67] : memref<1x128xf32, #tpu.memory_space<vmem>>, vector<1x128xf32>
    %58 = vector.broadcast %57 : vector<1x128xf32> to vector<512x128xf32>
    %59 = arith.addf %56, %58 : vector<512x128xf32>
    %cst_68 = arith.constant 0.000000e+00 : f32
    %60 = vector.broadcast %cst_68 : f32 to vector<512x128xf32>
    %61 = arith.maximumf %59, %60 : vector<512x128xf32>
    %62 = vector.shape_cast %61 : vector<512x128xf32> to vector<16x32x128xf32>
    %63 = vector.extract_strided_slice %62 {offsets = [0, 0, 0], sizes = [16, 16, 128], strides = [1, 1, 1]} : vector<16x32x128xf32> to vector<16x16x128xf32>
    %64 = arith.truncf %63 : vector<16x16x128xf32> to vector<16x16x128xbf16>
    %c1_69 = arith.constant 1 : index
    %c0_70 = arith.constant 0 : index
    %c0_71 = arith.constant 0 : index
    %65 = vector.load %arg9[%c1_69, %c0_70, %c0_71] : memref<18x32x128xbf16, #tpu.memory_space<vmem>>, vector<16x16x128xbf16>
    tpu.vector_store %arg9[%c1_69, %c0_70, %c0_71], %64 {strides = array<i32>} : memref<18x32x128xbf16, #tpu.memory_space<vmem>>, vector<16x16x128xbf16>,
    %cst_72 = arith.constant 0.000000e+00 : f32
    %66 = vector.broadcast %cst_72 : f32 to vector<512x128xf32>
    %cst_73 = arith.constant 0.000000e+00 : f32
    %67 = vector.broadcast %cst_73 : f32 to vector<512x128xf32>
    %cst_74 = arith.constant 0.000000e+00 : f32
    %68 = vector.broadcast %cst_74 : f32 to vector<512x128xf32>
    %c0_75 = arith.constant 0 : index
    %c0_76 = arith.constant 0 : index
    %c0_77 = arith.constant 0 : index
    %69 = vector.load %arg9[%c0_75, %c0_76, %c0_77] : memref<18x32x128xbf16, #tpu.memory_space<vmem>>, vector<16x32x128xbf16>
    %70 = vector.shape_cast %69 : vector<16x32x128xbf16> to vector<512x128xbf16>
    %c0_78 = arith.constant 0 : index
    %c0_79 = arith.constant 0 : index
    %c0_80 = arith.constant 0 : index
    %c0_81 = arith.constant 0 : index
    %71 = vector.load %arg5[%c0_78, %c0_79, %c0_80, %c0_81] : memref<3x3x128x128xbf16, #tpu.memory_space<vmem>>, vector<1x1x128x128xbf16>
    %72 = vector.shape_cast %71 : vector<1x1x128x128xbf16> to vector<128x128xbf16>
    %cst_82 = arith.constant dense<0.000000e+00> : vector<512x128xf32>
    %73 = tpu.matmul %70, %72, %cst_82 {dimension_numbers = #tpu.dot_dimension_numbers<[1], [0], [0], [1], [0, 0, 1, 1], [], []>} : vector<512x128xbf16>, vector<128x128xbf16>, vector<512x128xf32> -> vector<512x128xf32>
    %74 = arith.addf %66, %73 : vector<512x128xf32>
    %c0_83 = arith.constant 0 : index
    %c1_84 = arith.constant 1 : index
    %c0_85 = arith.constant 0 : index
    %c0_86 = arith.constant 0 : index
    %75 = vector.load %arg5[%c0_83, %c1_84, %c0_85, %c0_86] : memref<3x3x128x128xbf16, #tpu.memory_space<vmem>>, vector<1x1x128x128xbf16>
    %76 = vector.shape_cast %75 : vector<1x1x128x128xbf16> to vector<128x128xbf16>
    %cst_87 = arith.constant dense<0.000000e+00> : vector<512x128xf32>
    %77 = tpu.matmul %70, %76, %cst_87 {dimension_numbers = #tpu.dot_dimension_numbers<[1], [0], [0], [1], [0, 0, 1, 1], [], []>} : vector<512x128xbf16>, vector<128x128xbf16>, vector<512x128xf32> -> vector<512x128xf32>
    %78 = arith.addf %67, %77 : vector<512x128xf32>
    %c0_88 = arith.constant 0 : index
    %c2_89 = arith.constant 2 : index
    %c0_90 = arith.constant 0 : index
    %c0_91 = arith.constant 0 : index
    %79 = vector.load %arg5[%c0_88, %c2_89, %c0_90, %c0_91] : memref<3x3x128x128xbf16, #tpu.memory_space<vmem>>, vector<1x1x128x128xbf16>
    %80 = vector.shape_cast %79 : vector<1x1x128x128xbf16> to vector<128x128xbf16>
    %cst_92 = arith.constant dense<0.000000e+00> : vector<512x128xf32>
    %81 = tpu.matmul %70, %80, %cst_92 {dimension_numbers = #tpu.dot_dimension_numbers<[1], [0], [0], [1], [0, 0, 1, 1], [], []>} : vector<512x128xbf16>, vector<128x128xbf16>, vector<512x128xf32> -> vector<512x128xf32>
    %82 = arith.addf %68, %81 : vector<512x128xf32>
    %c1_93 = arith.constant 1 : index
    %c0_94 = arith.constant 0 : index
    %c0_95 = arith.constant 0 : index
    %83 = vector.load %arg9[%c1_93, %c0_94, %c0_95] : memref<18x32x128xbf16, #tpu.memory_space<vmem>>, vector<16x32x128xbf16>
    %84 = vector.shape_cast %83 : vector<16x32x128xbf16> to vector<512x128xbf16>
    %c1_96 = arith.constant 1 : index
    %c0_97 = arith.constant 0 : index
    %c0_98 = arith.constant 0 : index
    %c0_99 = arith.constant 0 : index
    %85 = vector.load %arg5[%c1_96, %c0_97, %c0_98, %c0_99] : memref<3x3x128x128xbf16, #tpu.memory_space<vmem>>, vector<1x1x128x128xbf16>
    %86 = vector.shape_cast %85 : vector<1x1x128x128xbf16> to vector<128x128xbf16>
    %cst_100 = arith.constant dense<0.000000e+00> : vector<512x128xf32>
    %87 = tpu.matmul %84, %86, %cst_100 {dimension_numbers = #tpu.dot_dimension_numbers<[1], [0], [0], [1], [0, 0, 1, 1], [], []>} : vector<512x128xbf16>, vector<128x128xbf16>, vector<512x128xf32> -> vector<512x128xf32>
    %88 = arith.addf %74, %87 : vector<512x128xf32>
    %c1_101 = arith.constant 1 : index
    %c1_102 = arith.constant 1 : index
    %c0_103 = arith.constant 0 : index
    %c0_104 = arith.constant 0 : index
    %89 = vector.load %arg5[%c1_101, %c1_102, %c0_103, %c0_104] : memref<3x3x128x128xbf16, #tpu.memory_space<vmem>>, vector<1x1x128x128xbf16>
    %90 = vector.shape_cast %89 : vector<1x1x128x128xbf16> to vector<128x128xbf16>
    %cst_105 = arith.constant dense<0.000000e+00> : vector<512x128xf32>
    %91 = tpu.matmul %84, %90, %cst_105 {dimension_numbers = #tpu.dot_dimension_numbers<[1], [0], [0], [1], [0, 0, 1, 1], [], []>} : vector<512x128xbf16>, vector<128x128xbf16>, vector<512x128xf32> -> vector<512x128xf32>
    %92 = arith.addf %78, %91 : vector<512x128xf32>
    %c1_106 = arith.constant 1 : index
    %c2_107 = arith.constant 2 : index
    %c0_108 = arith.constant 0 : index
    %c0_109 = arith.constant 0 : index
    %93 = vector.load %arg5[%c1_106, %c2_107, %c0_108, %c0_109] : memref<3x3x128x128xbf16, #tpu.memory_space<vmem>>, vector<1x1x128x128xbf16>
    %94 = vector.shape_cast %93 : vector<1x1x128x128xbf16> to vector<128x128xbf16>
    %cst_110 = arith.constant dense<0.000000e+00> : vector<512x128xf32>
    %95 = tpu.matmul %84, %94, %cst_110 {dimension_numbers = #tpu.dot_dimension_numbers<[1], [0], [0], [1], [0, 0, 1, 1], [], []>} : vector<512x128xbf16>, vector<128x128xbf16>, vector<512x128xf32> -> vector<512x128xf32>
    %96 = arith.addf %82, %95 : vector<512x128xf32>
    %c2_111 = arith.constant 2 : index
    %c0_112 = arith.constant 0 : index
    %c0_113 = arith.constant 0 : index
    %97 = vector.load %arg9[%c2_111, %c0_112, %c0_113] : memref<18x32x128xbf16, #tpu.memory_space<vmem>>, vector<16x32x128xbf16>
    %98 = vector.shape_cast %97 : vector<16x32x128xbf16> to vector<512x128xbf16>
    %c2_114 = arith.constant 2 : index
    %c0_115 = arith.constant 0 : index
    %c0_116 = arith.constant 0 : index
    %c0_117 = arith.constant 0 : index
    %99 = vector.load %arg5[%c2_114, %c0_115, %c0_116, %c0_117] : memref<3x3x128x128xbf16, #tpu.memory_space<vmem>>, vector<1x1x128x128xbf16>
    %100 = vector.shape_cast %99 : vector<1x1x128x128xbf16> to vector<128x128xbf16>
    %cst_118 = arith.constant dense<0.000000e+00> : vector<512x128xf32>
    %101 = tpu.matmul %98, %100, %cst_118 {dimension_numbers = #tpu.dot_dimension_numbers<[1], [0], [0], [1], [0, 0, 1, 1], [], []>} : vector<512x128xbf16>, vector<128x128xbf16>, vector<512x128xf32> -> vector<512x128xf32>
    %102 = arith.addf %88, %101 : vector<512x128xf32>
    %c2_119 = arith.constant 2 : index
    %c1_120 = arith.constant 1 : index
    %c0_121 = arith.constant 0 : index
    %c0_122 = arith.constant 0 : index
    %103 = vector.load %arg5[%c2_119, %c1_120, %c0_121, %c0_122] : memref<3x3x128x128xbf16, #tpu.memory_space<vmem>>, vector<1x1x128x128xbf16>
    %104 = vector.shape_cast %103 : vector<1x1x128x128xbf16> to vector<128x128xbf16>
    %cst_123 = arith.constant dense<0.000000e+00> : vector<512x128xf32>
    %105 = tpu.matmul %98, %104, %cst_123 {dimension_numbers = #tpu.dot_dimension_numbers<[1], [0], [0], [1], [0, 0, 1, 1], [], []>} : vector<512x128xbf16>, vector<128x128xbf16>, vector<512x128xf32> -> vector<512x128xf32>
    %106 = arith.addf %92, %105 : vector<512x128xf32>
    %c2_124 = arith.constant 2 : index
    %c2_125 = arith.constant 2 : index
    %c0_126 = arith.constant 0 : index
    %c0_127 = arith.constant 0 : index
    %107 = vector.load %arg5[%c2_124, %c2_125, %c0_126, %c0_127] : memref<3x3x128x128xbf16, #tpu.memory_space<vmem>>, vector<1x1x128x128xbf16>
    %108 = vector.shape_cast %107 : vector<1x1x128x128xbf16> to vector<128x128xbf16>
    %cst_128 = arith.constant dense<0.000000e+00> : vector<512x128xf32>
    %109 = tpu.matmul %98, %108, %cst_128 {dimension_numbers = #tpu.dot_dimension_numbers<[1], [0], [0], [1], [0, 0, 1, 1], [], []>} : vector<512x128xbf16>, vector<128x128xbf16>, vector<512x128xf32> -> vector<512x128xf32>
    %110 = arith.addf %96, %109 : vector<512x128xf32>
    %c1_i32_129 = arith.constant 1 : i32
    %111 = tpu.dynamic_rotate %102 by %c1_i32_129 dim 0 : vector<512x128xf32>, i32 -> vector<512x128xf32>
    %112 = arith.addf %106, %111 : vector<512x128xf32>
    %c511_i32_130 = arith.constant 511 : i32
    %113 = tpu.dynamic_rotate %110 by %c511_i32_130 dim 0 : vector<512x128xf32>, i32 -> vector<512x128xf32>
    %114 = arith.addf %112, %113 : vector<512x128xf32>
    %c0_131 = arith.constant 0 : index
    %c0_132 = arith.constant 0 : index
    %115 = vector.load %arg6[%c0_131, %c0_132] : memref<1x128xf32, #tpu.memory_space<vmem>>, vector<1x128xf32>
    %116 = vector.broadcast %115 : vector<1x128xf32> to vector<512x128xf32>
    %117 = arith.mulf %114, %116 : vector<512x128xf32>
    %c0_133 = arith.constant 0 : index
    %c0_134 = arith.constant 0 : index
    %118 = vector.load %arg7[%c0_133, %c0_134] : memref<1x128xf32, #tpu.memory_space<vmem>>, vector<1x128xf32>
    %119 = vector.broadcast %118 : vector<1x128xf32> to vector<512x128xf32>
    %120 = arith.addf %117, %119 : vector<512x128xf32>
    %cst_135 = arith.constant 0.000000e+00 : f32
    %121 = vector.broadcast %cst_135 : f32 to vector<512x128xf32>
    %122 = arith.maximumf %120, %121 : vector<512x128xf32>
    %123 = vector.shape_cast %122 : vector<512x128xf32> to vector<16x32x128xf32>
    %124 = vector.extract_strided_slice %123 {offsets = [0, 0, 0], sizes = [16, 16, 128], strides = [1, 1, 1]} : vector<16x32x128xf32> to vector<16x16x128xf32>
    %125 = vector.shape_cast %124 : vector<16x16x128xf32> to vector<1x16x16x128xf32>
    %c0_136 = arith.constant 0 : index
    %c0_137 = arith.constant 0 : index
    %c0_138 = arith.constant 0 : index
    %c0_139 = arith.constant 0 : index
    %126 = vector.load %arg8[%c0_136, %c0_137, %c0_138, %c0_139] : memref<1x16x16x128xf32, #tpu.memory_space<vmem>>, vector<1x16x16x128xf32>
    tpu.vector_store %arg8[%c0_136, %c0_137, %c0_138, %c0_139], %125 {strides = array<i32>} : memref<1x16x16x128xf32, #tpu.memory_space<vmem>>, vector<1x16x16x128xf32>,
    return
  }
  func.func @transform_0(%arg0: i32) -> (i32, i32, i32, i32) {
    %c0_i32 = arith.constant 0 : i32
    %c0_i32_0 = arith.constant 0 : i32
    %c0_i32_1 = arith.constant 0 : i32
    %c0_i32_2 = arith.constant 0 : i32
    return %arg0, %c0_i32, %c0_i32_0, %c0_i32_1 : i32, i32, i32, i32
  }
  func.func @transform_1(%arg0: i32) -> (i32, i32, i32, i32) {
    %c0_i32 = arith.constant 0 : i32
    %c0_i32_0 = arith.constant 0 : i32
    %c0_i32_1 = arith.constant 0 : i32
    %c0_i32_2 = arith.constant 0 : i32
    %c0_i32_3 = arith.constant 0 : i32
    return %c0_i32, %c0_i32_0, %c0_i32_1, %c0_i32_2 : i32, i32, i32, i32
  }
  func.func @transform_2(%arg0: i32) -> (i32, i32) {
    %c0_i32 = arith.constant 0 : i32
    %c0_i32_0 = arith.constant 0 : i32
    %c0_i32_1 = arith.constant 0 : i32
    return %c0_i32, %c0_i32_0 : i32, i32
  }
  func.func @transform_3(%arg0: i32) -> (i32, i32) {
    %c0_i32 = arith.constant 0 : i32
    %c0_i32_0 = arith.constant 0 : i32
    %c0_i32_1 = arith.constant 0 : i32
    return %c0_i32, %c0_i32_0 : i32, i32
  }
  func.func @transform_4(%arg0: i32) -> (i32, i32, i32, i32) {
    %c0_i32 = arith.constant 0 : i32
    %c0_i32_0 = arith.constant 0 : i32
    %c0_i32_1 = arith.constant 0 : i32
    %c0_i32_2 = arith.constant 0 : i32
    %c0_i32_3 = arith.constant 0 : i32
    return %c0_i32, %c0_i32_0, %c0_i32_1, %c0_i32_2 : i32, i32, i32, i32
  }
  func.func @transform_5(%arg0: i32) -> (i32, i32) {
    %c0_i32 = arith.constant 0 : i32
    %c0_i32_0 = arith.constant 0 : i32
    %c0_i32_1 = arith.constant 0 : i32
    return %c0_i32, %c0_i32_0 : i32, i32
  }
  func.func @transform_6(%arg0: i32) -> (i32, i32) {
    %c0_i32 = arith.constant 0 : i32
    %c0_i32_0 = arith.constant 0 : i32
    %c0_i32_1 = arith.constant 0 : i32
    return %c0_i32, %c0_i32_0 : i32, i32
  }
  func.func @transform_7(%arg0: i32) -> (i32, i32, i32, i32) {
    %c0_i32 = arith.constant 0 : i32
    %c0_i32_0 = arith.constant 0 : i32
    %c0_i32_1 = arith.constant 0 : i32
    %c0_i32_2 = arith.constant 0 : i32
    return %arg0, %c0_i32, %c0_i32_0, %c0_i32_1 : i32, i32, i32, i32
  }
}

</mosaic_0001>

<bundles_post_ra>
// kernel: bridge_forward_nhwc.1
= control target key start
LH: loop header
LB: loop body
LE: loop exit
PB: predicated region body
PF: predicated region fallthrough
CT: control target
= control target key end

     0   :  { %12 = vsyncpa [#allocation4], 0  ;;  %s13638_s0 = inlined_call_operand.vmem [shape: bf16[2,16,16,128], index: 0, kind: input, shape index: {}]   ;;  %s13639_s1 = inlined_call_operand.vmem [shape: bf16[3,3,128,128], index: 1, kind: input, shape index: {}]   ;;  %s13640_s2 = inlined_call_operand.vmem [shape: f32[1,128], index: 2, kind: input, shape index: {}]   ;;  %s13641_s3 = inlined_call_operand.vmem [shape: f32[1,128], index: 3, kind: input, shape index: {}]   ;;  %s13642_s4 = inlined_call_operand.vmem [shape: bf16[3,3,128,128], index: 4, kind: input, shape index: {}]   ;;  %s13643_s5 = inlined_call_operand.vmem [shape: f32[1,128], index: 5, kind: input, shape index: {}]   ;;  %s13644_s6 = inlined_call_operand.vmem [shape: f32[1,128], index: 6, kind: input, shape index: {}]   ;;  %s13645_s7 = inlined_call_operand.hbm [shape: f32[2,16,16,128], index: 7, kind: output, shape index: {}]  }
   0x1   :  { %14 = vsyncpa [#allocation4 + $0x1], 0  ;;  %s11138_s24 = smov 0   ;;  %s11140_s25 = smov 0  }
   0x2   :  { %s11142_s26 = smov 0   ;;  %s11144_s27 = smov 0  }
   0x3 LB: > { %s11159_s28 = sadd.s32 4294967295, %s11092_s27   ;;  %s7706_s29 = sadd.s32 4294967294, %s11092_s27   ;;  %s11092_s27 = sphi %s11144_s27, %s13772_s27   ;;  %s11088_s26 = sphi %s11142_s26, %s13771_s26   ;;  %s11084_s25 = sphi %s11140_s25, %s13770_s25   ;;  %s11080_s24 = sphi %s11138_s24, %s13769_s24  }
   0x4   : > { %s11163_s30 = sadd.s32 1, %s11092_s27   ;;  %s179_s8 = sadd.s32 1, %s11088_s26 }
   0x5   : > { %s176_s9 = ssub.s32 %s11092_s27, %s11163_s30  ;;  %p189_p0 = scmp.ne.s32.totalorder %s11088_s26, %s11084_s25 }
   0x6   : > { %p177_p1 = scmp.eq.s32.totalorder %s176_s9, 0  ;;  %p190_p2 = scmp.eq.s32.totalorder %s11159_s28, 1 }
   0x7   : > { %p195_p3 = scmp.ne.s32.totalorder %s11084_s25, %s11080_s24  ;;  %p196_p4 = scmp.eq.s32.totalorder %s7706_s29, 1 }
   0x8   : > { %s11174_s10 = scalar_select %p177_p1, %s11088_s26, %s179_s8  }
   0x9   : > { %p11176_p5 = por %p190_p2, %p189_p0  ;;  %p11180_p6 = por %p196_p4, %p195_p3 }
   0xa   : > { %p7709_p7 = scmp.ge.s32.totalorder %s11092_s27, 1  ;;  %p240_p8 = scmp.lt.s32.totalorder %s11092_s27, 3 }
   0xc   : > { %p241_p9 = pnand %p7709_p7, %p240_p8 }
   0xe   : > { %244 = sbr.rel (%p241_p9) target bundleno = 2180 (0x884), region = 48 }
  0x15   : > { %v10854_v0 = vld [vmem:[%s13639_s1 + $0xc0] sm:$0xff]   ;;  %p272_p10 = scmp.lt.s32.totalorder %s11159_s28, 1  ;;  %v10855_v1 = vld [vmem:[%s13639_s1 + $0xc8] sm:$0xff]   ;;  %v13652_v2 = vmov 0   ;;  %v10856_v3 = vld [vmem:[%s13639_s1 + $0xd0] sm:$0xff]   ;;  %s269_s9 = sand.u32 1, %s11084_s25  }
  0x16   : > { %8860 = vmatprep.subr.bf16.mxu0 %v10854_v0  ;;  %9116 = vmatprep.mubr.bf16.mxu1 %v13652_v2  ;;  %v10857_v4 = vld [vmem:[%s13639_s1 + $0xd8] sm:$0xff]   ;;  %v10858_v6 = vld [vmem:[%s13639_s1 + $0xe0] sm:$0xff]   ;;  %v10859_v7 = vld [vmem:[%s13639_s1 + $0xe8] sm:$0xff]   ;;  %s8139_s19 = sshll.u32 %s11159_s28, 12  ;;  %s11095_s8 = smov [#allocation3]  }
  0x17   : > { %s273_s17 = scalar_select %p272_p10, %s11159_s28, 1  ;;  %8861 = vmatpush3.bf16.msra.mxu0 %v10854_v0  ;;  %v10860_v8 = vld [vmem:[%s13639_s1 + $0xf0] sm:$0xff]   ;;  %v10861_v9 = vld [vmem:[%s13639_s1 + $0xf8] sm:$0xff]   ;;  %v10863_v10 = vld [vmem:[%s13639_s1] sm:$0xff]  }
  0x18   : > { %8862 = vmatprep.subr.bf16.mxu0 %v10855_v1  ;;  %v10882_v11 = vld [vmem:[%s13639_s1 + $0x40] sm:$0xff]   ;;  %v10883_v12 = vld [vmem:[%s13639_s1 + $0x48] sm:$0xff]   ;;  %v10885_v15 = vld [vmem:[%s13639_s1 + $0x50] sm:$0xff]   ;;  %s13589_s22 = scalar_lea.hbm %s13645_s7, %s8139_s19  ;;  %s13597_s28 = scalar_lea.sflag [#allocation4], %s269_s9 }
  0x19   : > { %s8138_s20 = sshll.u32 %s273_s17, 7  ;;  %9100 = vmatprep.subr.bf16.mxu1 %v10882_v11  ;;  %v10866_v14 = vld [vmem:[%s13639_s1 + $0x8] sm:$0xff]   ;;  %v10869_v16 = vld [vmem:[%s13639_s1 + $0x10] sm:$0xff]   ;;  %v10886_v17 = vld [vmem:[%s13639_s1 + $0x58] sm:$0xff]   ;;  %s7710_s17 = sshll.u32 %s269_s9, 8 }
  0x1a   : > { %s11201_s23 = scalar_lea.vmem %s13638_s0, %s8138_s20  ;;  %9101 = vmatpush3.bf16.msra.mxu1 %v10882_v11  ;;  %v10872_v19 = vld [vmem:[%s13639_s1 + $0x18] sm:$0xff]   ;;  %v10889_v20 = vld [vmem:[%s13639_s1 + $0x60] sm:$0xff]   ;;  %v10890_v22 = vld [vmem:[%s13639_s1 + $0x68] sm:$0xff]   ;;  %s13406_s18 = scalar_lea.vmem [#allocation3], %s7710_s17 }
  0x1b   : > { %8863 = vmatpush3.bf16.msra.mxu0 %v10855_v1  ;;  %v11207_v5 = vld [vmem:[%s11201_s23] sm:$0xff]   ;;  %v11232_v13 = vld [vmem:[%s11201_s23 + $0x8] sm:$0xff]   ;;  %9102 = vmatprep.subr.bf16.mxu1 %v10883_v12  ;;  %v11249_v18 = vld [vmem:[%s11201_s23 + $0x10] sm:$0xff]   ;;  %s7644_s20 = sshll.u32 %s13406_s18, 4  ;;  %s11034_s13 = sshll.u32 %s11095_s8, 4  ;;  %s13591_s20 = int_to_ptr.vmem [resolvable:$true] %s7644_s20  ;;  %s11035_s13 = int_to_ptr.vmem [resolvable:$false] %s11034_s13 }
  0x1c   : > { %8864 = vmatprep.subr.bf16.mxu0 %v10856_v3  ;;  %8876 = vmatprep.mubr.bf16.mxu0 %v11207_v5  ;;  %v10875_v21 = vld [vmem:[%s13639_s1 + $0x20] sm:$0xff]   ;;  %v11266_v23 = vld [vmem:[%s11201_s23 + $0x18] sm:$0xff]   ;;  %v10878_v24 = vld [vmem:[%s13639_s1 + $0x28] sm:$0xff]   ;;  %s11030_s29 = scalar_lea.vmem %s13591_s20, 4096  ;;  %s11036_s14 = scalar_lea.vmem %s11035_s13, 8192 }
  0x1d   : > { %v10892_v25 = vld [vmem:[%s13639_s1 + $0x70] sm:$0xff]   ;;  %v10893_v27 = vld [vmem:[%s13639_s1 + $0x78] sm:$0xff]   ;;  %v11283_v28 = vld [vmem:[%s11201_s23 + $0x20] sm:$0xff]   ;;  %p11031_p11 = scmp.ne.s32.totalorder %s13591_s20, %s11030_s29  ;;  %p11037_p0 = scmp.lt.s32.totalorder %s13591_s20, %s11035_s13 }
  0x1e   : > { %9103 = vmatpush3.bf16.msra.mxu1 %v10883_v12  ;;  %v10881_v26 = vld [vmem:[%s13639_s1 + $0x30] sm:$0xff]   ;;  %v10888_v29 = vld [vmem:[%s13639_s1 + $0x38] sm:$0xff]   ;;  %v11292_v30 = vld [vmem:[%s13639_s1 + $0x100] sm:$0xff]   ;;  %p11038_p1 = scmp.lt.s32.totalorder %s11036_s14, %s11030_s29 }
  0x1f   : > { %8865 = vmatpush3.bf16.msra.mxu0 %v10856_v3  ;;  %9104 = vmatprep.subr.bf16.mxu1 %v10885_v15  ;;  %v11296_v31 = vld [vmem:[%s11201_s23 + $0x28] sm:$0xff]   ;;  %v11304_v32 = vld [vmem:[%s11201_s23 + $0x30] sm:$0xff]   ;;  %v11311_v33 = vld [vmem:[%s11201_s23 + $0x38] sm:$0xff]   ;;  %p11032_p12 = pnand %p11031_p11, %p11176_p5 }
  0x20   : > { %8866 = vmatprep.subr.bf16.mxu0 %v10857_v4  ;;  %v11318_v34 = vld [vmem:[%s11201_s23 + $0x40] sm:$0xff]   ;;  %v11325_v35 = vld [vmem:[%s11201_s23 + $0x48] sm:$0xff]   ;;  %v11332_v36 = vld [vmem:[%s11201_s23 + $0x50] sm:$0xff]   ;;  %p11039_p2 = por %p11038_p1, %p11037_p0 }
  0x21   : > { %v11339_v37 = vld [vmem:[%s11201_s23 + $0x58] sm:$0xff]   ;;  %v11346_v38 = vld [vmem:[%s11201_s23 + $0x60] sm:$0xff]   ;;  %v11353_v39 = vld [vmem:[%s11201_s23 + $0x68] sm:$0xff]   ;;  %p11033_p13 = pneg %p11032_p12 }
  0x22   : > { %9105 = vmatpush3.bf16.msra.mxu1 %v10885_v15  ;;  %v10901_v40 = vld [vmem:[%s13639_s1 + $0x1c0] sm:$0xff]   ;;  %v10902_v41 = vld [vmem:[%s13639_s1 + $0x1c8] sm:$0xff]   ;;  %v11366_v42 = vld [vmem:[%s11201_s23 + $0x70] sm:$0xff]  }
  0x23   : > { %8867 = vmatpush3.bf16.msra.mxu0 %v10857_v4  ;;  %9106 = vmatprep.subr.bf16.mxu1 %v10886_v17  ;;  %v10903_v43 = vld [vmem:[%s13639_s1 + $0x1d0] sm:$0xff]   ;;  %v10904_v44 = vld [vmem:[%s13639_s1 + $0x1d8] sm:$0xff]   ;;  %v10906_v46 = vld [vmem:[%s13639_s1 + $0x1e0] sm:$0xff]   ;;  %p11040_p3 = pnand %p11039_p2, %p11033_p13 }
  0x24   : > { %8868 = vmatprep.subr.bf16.mxu0 %v10858_v6  ;;  %v11379_v45 = vld [vmem:[%s11201_s23 + $0x78] sm:$0xff]   ;;  %v10907_v47 = vld [vmem:[%s13639_s1 + $0x1e8] sm:$0xff]   ;;  %v10908_v48 = vld [vmem:[%s13639_s1 + $0x1f0] sm:$0xff]  }
  0x25   : > { %v10909_v49 = vld [vmem:[%s13639_s1 + $0x1f8] sm:$0xff]   ;;  %v10895_v50 = vld [vmem:[%s13639_s1 + $0x108] sm:$0xff]   ;;  %v10896_v51 = vld [vmem:[%s13639_s1 + $0x110] sm:$0xff]  }
  0x26   : > { %9107 = vmatpush3.bf16.msra.mxu1 %v10886_v17  ;;  %v10897_v52 = vld [vmem:[%s13639_s1 + $0x118] sm:$0xff]   ;;  %v10898_v53 = vld [vmem:[%s13639_s1 + $0x120] sm:$0xff]   ;;  %v10899_v54 = vld [vmem:[%s13639_s1 + $0x128] sm:$0xff]  }
  0x27   : > { %8869 = vmatpush3.bf16.msra.mxu0 %v10858_v6  ;;  %9108 = vmatprep.subr.bf16.mxu1 %v10889_v20  ;;  %v10900_v55 = vld [vmem:[%s13639_s1 + $0x130] sm:$0xff]   ;;  %v10905_v56 = vld [vmem:[%s13639_s1 + $0x138] sm:$0xff]   ;;  %v10910_v57 = vld [vmem:[%s13639_s1 + $0x140] sm:$0xff]  }
  0x28   : > { %8870 = vmatprep.subr.bf16.mxu0 %v10859_v7  ;;  %v11490_v59 = vld [vmem:[%s11201_s23] sm:$0xff]   ;;  %v10911_v60 = vld [vmem:[%s13639_s1 + $0x148] sm:$0xff]   ;;  %v10912_v61 = vld [vmem:[%s13639_s1 + $0x150] sm:$0xff]  }
  0x29   : > { %v10913_v62 = vld [vmem:[%s13639_s1 + $0x158] sm:$0xff]   ;;  %v10914_v63 = vld [vmem:[%s13639_s1 + $0x160] sm:$0xff]   ;;  %v10915_v0 = vld [vmem:[%s13639_s1 + $0x168] sm:$0xff]  }
  0x2a   : > { %9109 = vmatpush3.bf16.msra.mxu1 %v10889_v20  ;;  %v10916_v4 = vld [vmem:[%s13639_s1 + $0x170] sm:$0xff]  }
  0x2b   : > { %8871 = vmatpush3.bf16.msra.mxu0 %v10859_v7  ;;  %9110 = vmatprep.subr.bf16.mxu1 %v10890_v22  ;;  %v10917_v7 = vld [vmem:[%s13639_s1 + $0x178] sm:$0xff]  }
  0x2c   : > { %8872 = vmatprep.subr.bf16.mxu0 %v10860_v8 }
  0x2e   : > { %9111 = vmatpush3.bf16.msra.mxu1 %v10890_v22 }
  0x2f   : > { %8873 = vmatpush3.bf16.msra.mxu0 %v10860_v8  ;;  %9112 = vmatprep.subr.bf16.mxu1 %v10892_v25 }
  0x30   : > { %8874 = vmatprep.subr.bf16.mxu0 %v10861_v9 }
  0x32   : > { %9113 = vmatpush3.bf16.msra.mxu1 %v10892_v25 }
  0x33   : > { %8875 = vmatpush3.bf16.msra.mxu0 %v10861_v9  ;;  %9114 = vmatprep.subr.bf16.mxu1 %v10893_v27 }
  0x34   : > { %8940 = vmatprep.subr.bf16.mxu0 %v10863_v10 }
  0x36   : > { %8877 = vmatmul.mubr.bf16.vlgmr.msra.gmra.mrb[0].mxu0 %v13652_v2  ;;  %9115 = vmatpush3.bf16.msra.mxu1 %v10893_v27 }
  0x37   : > { %8941 = vmatpush3.bf16.msra.mxu0 %v10863_v10  ;;  %8880 = vmatprep.mubr.bf16.mxu0 %v11232_v13  ;;  %v11538_v10 = vld [vmem:[%s13639_s1 + $0x80] sm:$0xff]  }
  0x38   : > { %8942 = vmatprep.subr.bf16.mxu0 %v10866_v14  ;;  %9420 = vmatprep.subr.bf16.mxu1 %v10901_v40 }
  0x39   : > { %9117 = vmatmul.mubr.bf16.vlgmr.msra.gmra.mrb[0].mxu1 %v13652_v2 }
  0x3a   : > { %9120 = vmatprep.mubr.bf16.mxu1 %v11207_v5  ;;  %9421 = vmatpush3.bf16.msra.mxu1 %v10901_v40 }
  0x3b   : > { %8943 = vmatpush3.bf16.msra.mxu0 %v10866_v14  ;;  %9422 = vmatprep.subr.bf16.mxu1 %v10902_v41 }
  0x3c   : > { %8944 = vmatprep.subr.bf16.mxu0 %v10869_v16 }
  0x3e   : > { %8881 = vmatmul.mubr.bf16.gmra.mrb[4].mxu0 %v13652_v2  ;;  %9423 = vmatpush3.bf16.msra.mxu1 %v10902_v41 }
  0x3f   : > { %8884 = vmatprep.mubr.bf16.mxu0 %v11249_v18  ;;  %8945 = vmatpush3.bf16.msra.mxu0 %v10869_v16 }
  0x40   : > { %8946 = vmatprep.subr.bf16.mxu0 %v10872_v19  ;;  %9424 = vmatprep.subr.bf16.mxu1 %v10903_v43 }
  0x41   : > { %9121 = vmatmul.mubr.bf16.gmra.mrb[4].mxu1 %v13652_v2 }
  0x42   : > { %9124 = vmatprep.mubr.bf16.mxu1 %v11232_v13  ;;  %9425 = vmatpush3.bf16.msra.mxu1 %v10903_v43 }
  0x43   : > { %8947 = vmatpush3.bf16.msra.mxu0 %v10872_v19  ;;  %9426 = vmatprep.subr.bf16.mxu1 %v10904_v44 }
  0x44   : > { %8948 = vmatprep.subr.bf16.mxu0 %v10875_v21 }
  0x46   : > { %8885 = vmatmul.mubr.bf16.gmra.mrb[8].mxu0 %v13652_v2  ;;  %9427 = vmatpush3.bf16.msra.mxu1 %v10904_v44 }
  0x47   : > { %8888 = vmatprep.mubr.bf16.mxu0 %v11266_v23  ;;  %8949 = vmatpush3.bf16.msra.mxu0 %v10875_v21 }
  0x48   : > { %8950 = vmatprep.subr.bf16.mxu0 %v10878_v24  ;;  %9428 = vmatprep.subr.bf16.mxu1 %v10906_v46 }
  0x49   : > { %9125 = vmatmul.mubr.bf16.gmra.mrb[8].mxu1 %v13652_v2 }
  0x4a   : > { %9128 = vmatprep.mubr.bf16.mxu1 %v11249_v18  ;;  %9429 = vmatpush3.bf16.msra.mxu1 %v10906_v46 }
  0x4b   : > { %8951 = vmatpush3.bf16.msra.mxu0 %v10878_v24  ;;  %9430 = vmatprep.subr.bf16.mxu1 %v10907_v47 }
  0x4c   : > { %8952 = vmatprep.subr.bf16.mxu0 %v10881_v26 }
  0x4e   : > { %8889 = vmatmul.mubr.bf16.gmra.mrb[12].mxu0 %v13652_v2  ;;  %9431 = vmatpush3.bf16.msra.mxu1 %v10907_v47 }
  0x4f   : > { %8892 = vmatprep.mubr.bf16.mxu0 %v11283_v28  ;;  %8953 = vmatpush3.bf16.msra.mxu0 %v10881_v26 }
  0x50   : > { %8954 = vmatprep.subr.bf16.mxu0 %v10888_v29  ;;  %9432 = vmatprep.subr.bf16.mxu1 %v10908_v48 }
  0x51   : > { %9129 = vmatmul.mubr.bf16.gmra.mrb[12].mxu1 %v13652_v2 }
  0x52   : > { %9132 = vmatprep.mubr.bf16.mxu1 %v11266_v23  ;;  %9433 = vmatpush3.bf16.msra.mxu1 %v10908_v48 }
  0x53   : > { %8955 = vmatpush3.bf16.msra.mxu0 %v10888_v29  ;;  %9434 = vmatprep.subr.bf16.mxu1 %v10909_v49 }
  0x54   : > { %9020 = vmatprep.subr.bf16.mxu0 %v11292_v30 }
  0x56   : > { %8893 = vmatmul.mubr.bf16.gmra.mrb[16].mxu0 %v13652_v2  ;;  %9435 = vmatpush3.bf16.msra.mxu1 %v10909_v49 }
  0x57   : > { %8896 = vmatprep.mubr.bf16.mxu0 %v11296_v31 }
  0x59   : > { %9133 = vmatmul.mubr.bf16.gmra.mrb[16].mxu1 %v13652_v2 }
  0x5a   : > { %9136 = vmatprep.mubr.bf16.mxu1 %v11283_v28 }
  0x5e   : > { %8897 = vmatmul.mubr.bf16.gmra.mrb[20].mxu0 %v13652_v2 }
  0x5f   : > { %8900 = vmatprep.mubr.bf16.mxu0 %v11304_v32 }
  0x61   : > { %9137 = vmatmul.mubr.bf16.gmra.mrb[20].mxu1 %v13652_v2 }
  0x62   : > { %9140 = vmatprep.mubr.bf16.mxu1 %v11296_v31 }
  0x66   : > { %8901 = vmatmul.mubr.bf16.gmra.mrb[24].mxu0 %v13652_v2 }
  0x67   : > { %8904 = vmatprep.mubr.bf16.mxu0 %v11311_v33 }
  0x69   : > { %9141 = vmatmul.mubr.bf16.gmra.mrb[24].mxu1 %v13652_v2 }
  0x6a   : > { %9144 = vmatprep.mubr.bf16.mxu1 %v11304_v32 }
  0x6e   : > { %8905 = vmatmul.mubr.bf16.gmra.mrb[28].mxu0 %v13652_v2 }
  0x6f   : > { %8908 = vmatprep.mubr.bf16.mxu0 %v11318_v34 }
  0x71   : > { %9145 = vmatmul.mubr.bf16.gmra.mrb[28].mxu1 %v13652_v2 }
  0x72   : > { %9148 = vmatprep.mubr.bf16.mxu1 %v11311_v33 }
  0x76   : > { %8909 = vmatmul.mubr.bf16.gmra.mrb[32].mxu0 %v13652_v2 }
  0x77   : > { %8912 = vmatprep.mubr.bf16.mxu0 %v11325_v35 }
  0x79   : > { %9149 = vmatmul.mubr.bf16.gmra.mrb[32].mxu1 %v13652_v2 }
  0x7a   : > { %9152 = vmatprep.mubr.bf16.mxu1 %v11318_v34 }
  0x7e   : > { %8913 = vmatmul.mubr.bf16.gmra.mrb[36].mxu0 %v13652_v2 }
  0x7f   : > { %8916 = vmatprep.mubr.bf16.mxu0 %v11332_v36 }
  0x81   : > { %9153 = vmatmul.mubr.bf16.gmra.mrb[36].mxu1 %v13652_v2 }
  0x82   : > { %9156 = vmatprep.mubr.bf16.mxu1 %v11325_v35 }
  0x86   : > { %8917 = vmatmul.mubr.bf16.gmra.mrb[40].mxu0 %v13652_v2 }
  0x87   : > { %8920 = vmatprep.mubr.bf16.mxu0 %v11339_v37 }
  0x89   : > { %9157 = vmatmul.mubr.bf16.gmra.mrb[40].mxu1 %v13652_v2 }
  0x8a   : > { %9160 = vmatprep.mubr.bf16.mxu1 %v11332_v36 }
  0x8e   : > { %8921 = vmatmul.mubr.bf16.gmra.mrb[44].mxu0 %v13652_v2 }
  0x8f   : > { %8924 = vmatprep.mubr.bf16.mxu0 %v11346_v38 }
  0x91   : > { %9161 = vmatmul.mubr.bf16.gmra.mrb[44].mxu1 %v13652_v2 }
  0x92   : > { %9164 = vmatprep.mubr.bf16.mxu1 %v11339_v37 }
  0x96   : > { %8925 = vmatmul.mubr.bf16.gmra.mrb[48].mxu0 %v13652_v2 }
  0x97   : > { %8928 = vmatprep.mubr.bf16.mxu0 %v11353_v39 }
  0x99   : > { %9165 = vmatmul.mubr.bf16.gmra.mrb[48].mxu1 %v13652_v2 }
  0x9a   : > { %9168 = vmatprep.mubr.bf16.mxu1 %v11346_v38 }
  0x9e   : > { %8929 = vmatmul.mubr.bf16.gmra.mrb[52].mxu0 %v13652_v2 }
  0x9f   : > { %8932 = vmatprep.mubr.bf16.mxu0 %v11366_v42 }
  0xa1   : > { %9169 = vmatmul.mubr.bf16.gmra.mrb[52].mxu1 %v13652_v2 }
  0xa2   : > { %9172 = vmatprep.mubr.bf16.mxu1 %v11353_v39 }
  0xa6   : > { %8933 = vmatmul.mubr.bf16.gmra.mrb[56].mxu0 %v13652_v2 }
  0xa7   : > { %8936 = vmatprep.mubr.bf16.mxu0 %v11379_v45 }
  0xa9   : > { %9173 = vmatmul.mubr.bf16.gmra.mrb[56].mxu1 %v13652_v2 }
  0xaa   : > { %9176 = vmatprep.mubr.bf16.mxu1 %v11366_v42 }
  0xae   : > { %8937 = vmatmul.mubr.bf16.gmra.mrb[60].mxu0 %v13652_v2 }
  0xaf   : > { %8956 = vmatprep.mubr.bf16.mxu0 %v13652_v2 }
  0xb1   : > { %9177 = vmatmul.mubr.bf16.gmra.mrb[60].mxu1 %v13652_v2 }
  0xb2   : > { %9436 = vmatprep.mubr.bf16.mxu1 %v11232_v13 }
  0xb6   : > { %8957 = vmatmul.mubr.bf16.vlgmr.msra.gmra.mrb[0].mxu0 %v13652_v2 }
  0xb7   : > { %9021 = vmatpush3.bf16.msra.mxu0 %v11292_v30  ;;  %8960 = vmatprep.mubr.bf16.mxu0 %v11207_v5 }
  0xb8   : > { %9022 = vmatprep.subr.bf16.mxu0 %v10895_v50 }
  0xb9   : > { %9437 = vmatmul.mubr.bf16.vlgmr.msra.gmra.mrb[64].mxu1 %v13652_v2 }
  0xba   : > { %9440 = vmatprep.mubr.bf16.mxu1 %v11249_v18 }
  0xbb   : > { %9023 = vmatpush3.bf16.msra.mxu0 %v10895_v50 }
  0xbc   : > { %9024 = vmatprep.subr.bf16.mxu0 %v10896_v51 }
  0xbe   : > { %8961 = vmatmul.mubr.bf16.gmra.mrb[4].mxu0 %v13652_v2 }
  0xbf   : > { %8964 = vmatprep.mubr.bf16.mxu0 %v11232_v13  ;;  %9025 = vmatpush3.bf16.msra.mxu0 %v10896_v51 }
  0xc0   : > { %9026 = vmatprep.subr.bf16.mxu0 %v10897_v52 }
  0xc1   : > { %9441 = vmatmul.mubr.bf16.gmra.mrb[68].mxu1 %v13652_v2 }
  0xc2   : > { %9444 = vmatprep.mubr.bf16.mxu1 %v11266_v23 }
  0xc3   : > { %9027 = vmatpush3.bf16.msra.mxu0 %v10897_v52 }
  0xc4   : > { %9028 = vmatprep.subr.bf16.mxu0 %v10898_v53 }
  0xc6   : > { %8965 = vmatmul.mubr.bf16.gmra.mrb[8].mxu0 %v13652_v2 }
  0xc7   : > { %8968 = vmatprep.mubr.bf16.mxu0 %v11249_v18  ;;  %9029 = vmatpush3.bf16.msra.mxu0 %v10898_v53 }
  0xc8   : > { %9030 = vmatprep.subr.bf16.mxu0 %v10899_v54 }
  0xc9   : > { %9445 = vmatmul.mubr.bf16.gmra.mrb[72].mxu1 %v13652_v2 }
  0xca   : > { %9448 = vmatprep.mubr.bf16.mxu1 %v11283_v28 }
  0xcb   : > { %9031 = vmatpush3.bf16.msra.mxu0 %v10899_v54 }
  0xcc   : > { %9032 = vmatprep.subr.bf16.mxu0 %v10900_v55 }
  0xce   : > { %8969 = vmatmul.mubr.bf16.gmra.mrb[12].mxu0 %v13652_v2 }
  0xcf   : > { %8972 = vmatprep.mubr.bf16.mxu0 %v11266_v23  ;;  %9033 = vmatpush3.bf16.msra.mxu0 %v10900_v55 }
  0xd0   : > { %9034 = vmatprep.subr.bf16.mxu0 %v10905_v56 }
  0xd1   : > { %9449 = vmatmul.mubr.bf16.gmra.mrb[76].mxu1 %v13652_v2 }
  0xd2   : > { %9452 = vmatprep.mubr.bf16.mxu1 %v11296_v31 }
  0xd3   : > { %9035 = vmatpush3.bf16.msra.mxu0 %v10905_v56 }
  0xd4   : > { %9180 = vmatprep.subr.bf16.mxu0 %v10910_v57 }
  0xd6   : > { %8973 = vmatmul.mubr.bf16.gmra.mrb[16].mxu0 %v13652_v2 }
  0xd7   : > { %8976 = vmatprep.mubr.bf16.mxu0 %v11283_v28 }
  0xd9   : > { %9453 = vmatmul.mubr.bf16.gmra.mrb[80].mxu1 %v13652_v2 }
  0xda   : > { %9456 = vmatprep.mubr.bf16.mxu1 %v11304_v32 }
  0xde   : > { %8977 = vmatmul.mubr.bf16.gmra.mrb[20].mxu0 %v13652_v2 }
  0xdf   : > { %8980 = vmatprep.mubr.bf16.mxu0 %v11296_v31 }
  0xe1   : > { %9457 = vmatmul.mubr.bf16.gmra.mrb[84].mxu1 %v13652_v2 }
  0xe2   : > { %9460 = vmatprep.mubr.bf16.mxu1 %v11311_v33 }
  0xe6   : > { %8981 = vmatmul.mubr.bf16.gmra.mrb[24].mxu0 %v13652_v2 }
  0xe7   : > { %8984 = vmatprep.mubr.bf16.mxu0 %v11304_v32 }
  0xe9   : > { %9461 = vmatmul.mubr.bf16.gmra.mrb[88].mxu1 %v13652_v2 }
  0xea   : > { %9464 = vmatprep.mubr.bf16.mxu1 %v11318_v34 }
  0xee   : > { %8985 = vmatmul.mubr.bf16.gmra.mrb[28].mxu0 %v13652_v2 }
  0xef   : > { %8988 = vmatprep.mubr.bf16.mxu0 %v11311_v33 }
  0xf1   : > { %9465 = vmatmul.mubr.bf16.gmra.mrb[92].mxu1 %v13652_v2 }
  0xf2   : > { %9468 = vmatprep.mubr.bf16.mxu1 %v11325_v35 }
  0xf6   : > { %8989 = vmatmul.mubr.bf16.gmra.mrb[32].mxu0 %v13652_v2 }
  0xf7   : > { %8992 = vmatprep.mubr.bf16.mxu0 %v11318_v34 }
  0xf9   : > { %9469 = vmatmul.mubr.bf16.gmra.mrb[96].mxu1 %v13652_v2 }
  0xfa   : > { %9472 = vmatprep.mubr.bf16.mxu1 %v11332_v36 }
  0xfe   : > { %8993 = vmatmul.mubr.bf16.gmra.mrb[36].mxu0 %v13652_v2 }
  0xff   : > { %8996 = vmatprep.mubr.bf16.mxu0 %v11325_v35 }
 0x101   : > { %9473 = vmatmul.mubr.bf16.gmra.mrb[100].mxu1 %v13652_v2 }
 0x102   : > { %9476 = vmatprep.mubr.bf16.mxu1 %v11339_v37 }
 0x106   : > { %8997 = vmatmul.mubr.bf16.gmra.mrb[40].mxu0 %v13652_v2 }
 0x107   : > { %9000 = vmatprep.mubr.bf16.mxu0 %v11332_v36 }
 0x109   : > { %9477 = vmatmul.mubr.bf16.gmra.mrb[104].mxu1 %v13652_v2 }
 0x10a   : > { %9480 = vmatprep.mubr.bf16.mxu1 %v11346_v38 }
 0x10c   : > { %v9118_v58 = vpop.f32.mrb[0].mxu1 }
 0x10d   : > { %v11519_v1 = vpop.f32.mrb[1].mxu1 }
 0x10e   : > { %9001 = vmatmul.mubr.bf16.gmra.mrb[44].mxu0 %v13652_v2  ;;  %v9119_v3 = vpop.f32.mrb[2].mxu1 }
 0x10f   : > { %9004 = vmatprep.mubr.bf16.mxu0 %v11339_v37  ;;  %v11525_v5 = vpop.f32.mrb[3].mxu1 }
 0x111   : > { %9481 = vmatmul.mubr.bf16.gmra.mrb[108].mxu1 %v13652_v2 }
 0x112   : > { %9484 = vmatprep.mubr.bf16.mxu1 %v11353_v39 }
 0x114   : > { %v9122_v6 = vpop.f32.mrb[4].mxu1 }
 0x115   : > { %v11532_v8 = vpop.f32.mrb[5].mxu1 }
 0x116   : > { %9005 = vmatmul.mubr.bf16.gmra.mrb[48].mxu0 %v13652_v2  ;;  %v9123_v9 = vpop.f32.mrb[6].mxu1 }
 0x117   : > { %9008 = vmatprep.mubr.bf16.mxu0 %v11346_v38  ;;  %v11540_v11 = vpop.f32.mrb[7].mxu1 }
 0x119   : > { %9485 = vmatmul.mubr.bf16.gmra.mrb[112].mxu1 %v13652_v2 }
 0x11a   : > { %9488 = vmatprep.mubr.bf16.mxu1 %v11366_v42 }
 0x11c   : > { %v9126_v12 = vpop.f32.mrb[8].mxu1 }
 0x11e   : > { %9009 = vmatmul.mubr.bf16.gmra.mrb[52].mxu0 %v13652_v2 }
 0x11f   : > { %9012 = vmatprep.mubr.bf16.mxu0 %v11353_v39 }
 0x121   : > { %9489 = vmatmul.mubr.bf16.gmra.mrb[116].mxu1 %v13652_v2 }
 0x122   : > { %9492 = vmatprep.mubr.bf16.mxu1 %v11379_v45 }
 0x126   : > { %9013 = vmatmul.mubr.bf16.gmra.mrb[56].mxu0 %v13652_v2 }
 0x127   : > { %9016 = vmatprep.mubr.bf16.mxu0 %v11366_v42 }
 0x129   : > { %9493 = vmatmul.mubr.bf16.gmra.mrb[120].mxu1 %v13652_v2 }
 0x12a   : > { %9496 = vmatprep.mubr.bf16.mxu1 %v13652_v2 }
 0x12e   : > { %9017 = vmatmul.mubr.bf16.gmra.mrb[60].mxu0 %v13652_v2 }
 0x12f   : > { %9036 = vmatprep.mubr.bf16.mxu0 %v11490_v59 }
 0x131   : > { %9497 = vmatmul.mubr.bf16.gmra.mrb[124].mxu1 %v13652_v2 }
 0x136   : > { %9037 = vmatmul.mubr.bf16.vlgmr.msra.gmra.mrb[64].mxu0 %v13652_v2 }
 0x137   : > { %9181 = vmatpush3.bf16.msra.mxu0 %v10910_v57  ;;  %9040 = vmatprep.mubr.bf16.mxu0 %v11232_v13  ;;  %v11542_v13 = vpop.f32.mrb[9].mxu1 }
 0x138   : > { %9182 = vmatprep.subr.bf16.mxu0 %v10911_v60  ;;  %v9127_v14 = vpop.f32.mrb[10].mxu1 }
 0x139   : > { %v11545_v15 = vpop.f32.mrb[11].mxu1 }
 0x13a   : > { %v9130_v16 = vpop.f32.mrb[12].mxu1 }
 0x13b   : > { %9183 = vmatpush3.bf16.msra.mxu0 %v10911_v60  ;;  %v11548_v17 = vpop.f32.mrb[13].mxu1 }
 0x13c   : > { %9184 = vmatprep.subr.bf16.mxu0 %v10912_v61 }
 0x13e   : > { %9041 = vmatmul.mubr.bf16.gmra.mrb[68].mxu0 %v13652_v2 }
 0x13f   : > { %9044 = vmatprep.mubr.bf16.mxu0 %v11249_v18  ;;  %9185 = vmatpush3.bf16.msra.mxu0 %v10912_v61  ;;  %v9131_v18 = vpop.f32.mrb[14].mxu1 }
 0x140   : > { %9186 = vmatprep.subr.bf16.mxu0 %v10913_v62  ;;  %v11551_v19 = vpop.f32.mrb[15].mxu1 }
 0x141   : > { %v9134_v20 = vpop.f32.mrb[16].mxu1 }
 0x142   : > { %v11553_v21 = vpop.f32.mrb[17].mxu1 }
 0x143   : > { %9187 = vmatpush3.bf16.msra.mxu0 %v10913_v62  ;;  %v9135_v22 = vpop.f32.mrb[18].mxu1 }
 0x144   : > { %9188 = vmatprep.subr.bf16.mxu0 %v10914_v63 }
 0x146   : > { %9045 = vmatmul.mubr.bf16.gmra.mrb[72].mxu0 %v13652_v2 }
 0x147   : > { %9048 = vmatprep.mubr.bf16.mxu0 %v11266_v23  ;;  %9189 = vmatpush3.bf16.msra.mxu0 %v10914_v63  ;;  %v11555_v23 = vpop.f32.mrb[19].mxu1 }
 0x148   : > { %9190 = vmatprep.subr.bf16.mxu0 %v10915_v0  ;;  %v9138_v24 = vpop.f32.mrb[20].mxu1 }
 0x149   : > { %v11558_v25 = vpop.f32.mrb[21].mxu1 }
 0x14a   : > { %v9139_v26 = vpop.f32.mrb[22].mxu1 }
 0x14b   : > { %9191 = vmatpush3.bf16.msra.mxu0 %v10915_v0  ;;  %v11561_v27 = vpop.f32.mrb[23].mxu1 }
 0x14c   : > { %9192 = vmatprep.subr.bf16.mxu0 %v10916_v4 }
 0x14e   : > { %9049 = vmatmul.mubr.bf16.gmra.mrb[76].mxu0 %v13652_v2 }
 0x14f   : > { %9052 = vmatprep.mubr.bf16.mxu0 %v11283_v28  ;;  %9193 = vmatpush3.bf16.msra.mxu0 %v10916_v4  ;;  %v9142_v28 = vpop.f32.mrb[24].mxu1 }
 0x150   : > { %9194 = vmatprep.subr.bf16.mxu0 %v10917_v7  ;;  %v11563_v29 = vpop.f32.mrb[25].mxu1 }
 0x151   : > { %v9143_v30 = vpop.f32.mrb[26].mxu1 }
 0x153   : > { %9195 = vmatpush3.bf16.msra.mxu0 %v10917_v7 }
 0x154   : > { %9260 = vmatprep.subr.bf16.mxu0 %v11538_v10 }
 0x156   : > { %9053 = vmatmul.mubr.bf16.gmra.mrb[80].mxu0 %v13652_v2 }
 0x157   : > { %9056 = vmatprep.mubr.bf16.mxu0 %v11296_v31  ;;  %v11565_v31 = vpop.f32.mrb[27].mxu1 }
 0x158   : > { %v9146_v40 = vpop.f32.mrb[28].mxu1 }
 0x159   : > { %v11568_v41 = vpop.f32.mrb[29].mxu1 }
 0x15a   : > { %v9147_v43 = vpop.f32.mrb[30].mxu1 }
 0x15b   : > { %v11571_v44 = vpop.f32.mrb[31].mxu1 }
 0x15e   : > { %9057 = vmatmul.mubr.bf16.gmra.mrb[84].mxu0 %v13652_v2 }
 0x15f   : > { %9060 = vmatprep.mubr.bf16.mxu0 %v11304_v32  ;;  %v9150_v32 = vpop.f32.mrb[32].mxu1 }
 0x160   : > { %v11573_v46 = vpop.f32.mrb[33].mxu1 }
 0x161   : > { %v9151_v47 = vpop.f32.mrb[34].mxu1 }
 0x162   : > { %v11575_v48 = vpop.f32.mrb[35].mxu1 }
 0x163   : > { %v9154_v49 = vpop.f32.mrb[36].mxu1 }
 0x164   : > { %v11579_v50 = vpop.f32.mrb[37].mxu1 }
 0x165   : > { %v9155_v51 = vpop.f32.mrb[38].mxu1 }
 0x166   : > { %9061 = vmatmul.mubr.bf16.gmra.mrb[88].mxu0 %v13652_v2  ;;  %v11581_v52 = vpop.f32.mrb[39].mxu1 }
 0x167   : > { %9064 = vmatprep.mubr.bf16.mxu0 %v11311_v33  ;;  %v9158_v53 = vpop.f32.mrb[40].mxu1 }
 0x168   : > { %v11585_v54 = vpop.f32.mrb[41].mxu1  ;;  %v10919_v53 = vld [vmem:[%s13639_s1 + $0x88] sm:$0xff]  }
 0x169   : > { %13672 = vst [vmem:[#allocation6_spill] sm:$0xff] %v11585_v54  ;;  %v9159_v55 = vpop.f32.mrb[42].mxu1 }
 0x16a   : > { %v11587_v56 = vpop.f32.mrb[43].mxu1 }
 0x16b   : > { %13673 = vst [vmem:[#allocation7_spill] sm:$0xff] %v11587_v56  ;;  %v9162_v57 = vpop.f32.mrb[44].mxu1 }
 0x16c   : > { %v11591_v58 = vpop.f32.mrb[45].mxu1  ;;  %v11637_v57 = vld [vmem:[%s11201_s23 + $0x8] sm:$0xff]  }
 0x16d   : > { %13674 = vst [vmem:[#allocation8_spill] sm:$0xff] %v11591_v58  ;;  %v9163_v60 = vpop.f32.mrb[46].mxu1 }
 0x16e   : > { %9065 = vmatmul.mubr.bf16.gmra.mrb[92].mxu0 %v13652_v2  ;;  %v11593_v61 = vpop.f32.mrb[47].mxu1 }
 0x16f   : > { %9068 = vmatprep.mubr.bf16.mxu0 %v11318_v34  ;;  %13675 = vst [vmem:[#allocation9_spill] sm:$0xff] %v11593_v61  ;;  %v9166_v62 = vpop.f32.mrb[48].mxu1 }
 0x170   : > { %v11597_v63 = vpop.f32.mrb[49].mxu1  ;;  %v10920_v62 = vld [vmem:[%s13639_s1 + $0x90] sm:$0xff]  }
 0x171   : > { %13676 = vst [vmem:[#allocation10_spill] sm:$0xff] %v11597_v63  ;;  %v9167_v0 = vpop.f32.mrb[50].mxu1 }
 0x172   : > { %v11599_v3 = vpop.f32.mrb[51].mxu1 }
 0x173   : > { %13677 = vst [vmem:[#allocation11_spill] sm:$0xff] %v11599_v3 }
 0x174   : > { %v9170_v4 = vpop.f32.mrb[52].mxu1 }
 0x175   : > { %v11603_v6 = vpop.f32.mrb[53].mxu1 }
 0x176   : > { %9069 = vmatmul.mubr.bf16.gmra.mrb[96].mxu0 %v13652_v2  ;;  %13678 = vst [vmem:[#allocation12_spill] sm:$0xff] %v11603_v6  ;;  %v9171_v7 = vpop.f32.mrb[54].mxu1 }
 0x177   : > { %9072 = vmatprep.mubr.bf16.mxu0 %v11325_v35  ;;  %v11605_v9 = vpop.f32.mrb[55].mxu1 }
 0x178   : > { %13679 = vst [vmem:[#allocation13_spill] sm:$0xff] %v11605_v9 }
 0x17c   : > { %v9174_v12 = vpop.f32.mrb[56].mxu1 }
 0x17d   : > { %v11609_v14 = vpop.f32.mrb[57].mxu1  ;;  %v11652_v12 = vld [vmem:[%s11201_s23 + $0x10] sm:$0xff]  }
 0x17e   : > { %9073 = vmatmul.mubr.bf16.gmra.mrb[100].mxu0 %v13652_v2  ;;  %13680 = vst [vmem:[#allocation14_spill] sm:$0xff] %v11609_v14  ;;  %v9175_v16 = vpop.f32.mrb[58].mxu1  ;;  %v11706_v14 = vld [vmem:[%s11201_s23 + $0x30] sm:$0xff]  }
 0x17f   : > { %9076 = vmatprep.mubr.bf16.mxu0 %v11332_v36  ;;  %v11611_v18 = vpop.f32.mrb[59].mxu1  ;;  %13685 = vst [vmem:[#allocation19_spill] sm:$0xff] %v11706_v14 }
 0x180   : > { %13681 = vst [vmem:[#allocation15_spill] sm:$0xff] %v11611_v18 }
 0x184   : > { %v9178_v20 = vpop.f32.mrb[60].mxu1 }
 0x185   : > { %v11615_v22 = vpop.f32.mrb[61].mxu1  ;;  %v10922_v20 = vld [vmem:[%s13639_s1 + $0xa0] sm:$0xff]  }
 0x186   : > { %9077 = vmatmul.mubr.bf16.gmra.mrb[104].mxu0 %v13652_v2  ;;  %13682 = vst [vmem:[#allocation16_spill] sm:$0xff] %v11615_v22  ;;  %v9179_v24 = vpop.f32.mrb[62].mxu1 }
 0x187   : > { %9080 = vmatprep.mubr.bf16.mxu0 %v11339_v37  ;;  %v11617_v26 = vpop.f32.mrb[63].mxu1 }
 0x188   : > { %13683 = vst [vmem:[#allocation17_spill] sm:$0xff] %v11617_v26  ;;  %v11697_v26 = vld [vmem:[%s11201_s23 + $0x28] sm:$0xff]  }
 0x189   : > { %13684 = vst [vmem:[#allocation18_spill] sm:$0xff] %v11697_v26 }
 0x18c   : > { %v9438_v28 = vpop.f32.mrb[64].mxu1 }
 0x18d   : > { %v11621_v30 = vpop.f32.mrb[65].mxu1 }
 0x18e   : > { %9081 = vmatmul.mubr.bf16.gmra.mrb[108].mxu0 %v13652_v2  ;;  %v9439_v40 = vpop.f32.mrb[66].mxu1 }
 0x18f   : > { %9084 = vmatprep.mubr.bf16.mxu0 %v11346_v38  ;;  %v11623_v43 = vpop.f32.mrb[67].mxu1  ;;  %v10923_v40 = vld [vmem:[%s13639_s1 + $0xa8] sm:$0xff]  }
 0x194   : > { %v9442_v32 = vpop.f32.mrb[68].mxu1 }
 0x195   : > { %v11627_v47 = vpop.f32.mrb[69].mxu1 }
 0x196   : > { %9085 = vmatmul.mubr.bf16.gmra.mrb[112].mxu0 %v13652_v2  ;;  %v9443_v49 = vpop.f32.mrb[70].mxu1 }
 0x197   : > { %9088 = vmatprep.mubr.bf16.mxu0 %v11353_v39  ;;  %v11629_v51 = vpop.f32.mrb[71].mxu1  ;;  %v11667_v49 = vld [vmem:[%s11201_s23 + $0x18] sm:$0xff]  }
 0x19c   : > { %v9446_v55 = vpop.f32.mrb[72].mxu1 }
 0x19d   : > { %v11640_v60 = vpop.f32.mrb[73].mxu1  ;;  %v10924_v55 = vld [vmem:[%s13639_s1 + $0xb0] sm:$0xff]  }
 0x19e   : > { %9089 = vmatmul.mubr.bf16.gmra.mrb[116].mxu0 %v13652_v2  ;;  %v9447_v0 = vpop.f32.mrb[74].mxu1 }
 0x19f   : > { %9092 = vmatprep.mubr.bf16.mxu0 %v11366_v42  ;;  %v11645_v4 = vpop.f32.mrb[75].mxu1 }
 0x1a4   : > { %v9450_v7 = vpop.f32.mrb[76].mxu1 }
 0x1a5   : > { %v11655_v16 = vpop.f32.mrb[77].mxu1 }
 0x1a6   : > { %9093 = vmatmul.mubr.bf16.gmra.mrb[120].mxu0 %v13652_v2  ;;  %v9451_v24 = vpop.f32.mrb[78].mxu1 }
 0x1a7   : > { %9096 = vmatprep.mubr.bf16.mxu0 %v11379_v45  ;;  %v11660_v28 = vpop.f32.mrb[79].mxu1 }
 0x1ac   : > { %v9454_v32 = vpop.f32.mrb[80].mxu1 }
 0x1ae   : > { %9097 = vmatmul.mubr.bf16.gmra.mrb[124].mxu0 %v13652_v2 }
 0x1af   : > { %9196 = vmatprep.mubr.bf16.mxu0 %v11490_v59 }
 0x1b6   : > { %9197 = vmatmul.mubr.bf16.vlgmr.msra.gmra.mrb[128].mxu0 %v13652_v2 }
 0x1b7   : > { %9261 = vmatpush3.bf16.msra.mxu0 %v11538_v10  ;;  %9200 = vmatprep.mubr.bf16.mxu0 %v11637_v57  ;;  %v10921_v10 = vld [vmem:[%s13639_s1 + $0x98] sm:$0xff]  }
 0x1b8   : > { %9262 = vmatprep.subr.bf16.mxu0 %v10919_v53 }
 0x1bb   : > { %9263 = vmatpush3.bf16.msra.mxu0 %v10919_v53  ;;  %v11670_v53 = vpop.f32.mrb[81].mxu1 }
 0x1bc   : > { %9264 = vmatprep.subr.bf16.mxu0 %v10920_v62 }
 0x1be   : > { %9201 = vmatmul.mubr.bf16.gmra.mrb[132].mxu0 %v13652_v2 }
 0x1bf   : > { %9204 = vmatprep.mubr.bf16.mxu0 %v11652_v12  ;;  %9265 = vmatpush3.bf16.msra.mxu0 %v10920_v62  ;;  %v9455_v62 = vpop.f32.mrb[82].mxu1 }
 0x1c0   : > { %9266 = vmatprep.subr.bf16.mxu0 %v10921_v10  ;;  %v11675_v0 = vpop.f32.mrb[83].mxu1 }
 0x1c1   : > { %v9458_v7 = vpop.f32.mrb[84].mxu1 }
 0x1c2   : > { %v11685_v24 = vpop.f32.mrb[85].mxu1 }
 0x1c3   : > { %9267 = vmatpush3.bf16.msra.mxu0 %v10921_v10  ;;  %v10925_v10 = vld [vmem:[%s13639_s1 + $0xb8] sm:$0xff]   ;;  %v9459_v32 = vpop.f32.mrb[86].mxu1 }
 0x1c4   : > { %9268 = vmatprep.subr.bf16.mxu0 %v10922_v20  ;;  %v11692_v62 = vpop.f32.mrb[87].mxu1 }
 0x1c5   : > { %v9462_v7 = vpop.f32.mrb[88].mxu1 }
 0x1c6   : > { %9205 = vmatmul.mubr.bf16.gmra.mrb[136].mxu0 %v13652_v2 }
 0x1c7   : > { %9208 = vmatprep.mubr.bf16.mxu0 %v11667_v49  ;;  %9269 = vmatpush3.bf16.msra.mxu0 %v10922_v20  ;;  %v11682_v20 = vld [vmem:[%s11201_s23 + $0x20] sm:$0xff]  }
 0x1c8   : > { %9270 = vmatprep.subr.bf16.mxu0 %v10923_v40 }
 0x1cb   : > { %9271 = vmatpush3.bf16.msra.mxu0 %v10923_v40  ;;  %v11690_v40 = vld [vmem:[%s13639_s1 + $0x180] sm:$0xff]  }
 0x1cc   : > { %9272 = vmatprep.subr.bf16.mxu0 %v10924_v55 }
 0x1ce   : > { %9209 = vmatmul.mubr.bf16.gmra.mrb[140].mxu0 %v13652_v2 }
 0x1cf   : > { %9212 = vmatprep.mubr.bf16.mxu0 %v11682_v20  ;;  %9273 = vmatpush3.bf16.msra.mxu0 %v10924_v55  ;;  %v11700_v55 = vpop.f32.mrb[89].mxu1 }
 0x1d0   : > { %9274 = vmatprep.subr.bf16.mxu0 %v10925_v10  ;;  %v9463_v32 = vpop.f32.mrb[90].mxu1 }
 0x1d1   : > { %v11702_v22 = vpop.f32.mrb[91].mxu1 }
 0x1d2   : > { %v9466_v18 = vpop.f32.mrb[92].mxu1 }
 0x1d3   : > { %9275 = vmatpush3.bf16.msra.mxu0 %v10925_v10  ;;  %v11709_v10 = vpop.f32.mrb[93].mxu1 }
 0x1d4   : > { %9340 = vmatprep.subr.bf16.mxu0 %v11690_v40  ;;  %v9467_v9 = vpop.f32.mrb[94].mxu1 }
 0x1d5   : > { %v11711_v7 = vpop.f32.mrb[95].mxu1 }
 0x1d6   : > { %9213 = vmatmul.mubr.bf16.gmra.mrb[144].mxu0 %v13652_v2  ;;  %v9470_v6 = vpop.f32.mrb[96].mxu1 }
 0x1d7   : > { %9216 = vmatprep.mubr.bf16.mxu0 %v11697_v26  ;;  %v11715_v32 = vpop.f32.mrb[97].mxu1 }
 0x1d8   : > { %v9471_v3 = vpop.f32.mrb[98].mxu1 }
 0x1d9   : > { %v11717_v63 = vpop.f32.mrb[99].mxu1 }
 0x1da   : > { %v9474_v18 = vpop.f32.mrb[100].mxu1 }
 0x1de   : > { %9217 = vmatmul.mubr.bf16.gmra.mrb[148].mxu0 %v13652_v2 }
 0x1df   : > { %9220 = vmatprep.mubr.bf16.mxu0 %v11706_v14  ;;  %v11721_v14 = vpop.f32.mrb[101].mxu1 }
 0x1e0   : > { %v9475_v9 = vpop.f32.mrb[102].mxu1 }
 0x1e1   : > { %v11723_v61 = vpop.f32.mrb[103].mxu1 }
 0x1e2   : > { %v9478_v6 = vpop.f32.mrb[104].mxu1 }
 0x1e6   : > { %9221 = vmatmul.mubr.bf16.gmra.mrb[152].mxu0 %v13652_v2 }
 0x1e7   : > { %9224 = vmatprep.mubr.bf16.mxu0 %v11311_v33  ;;  %v11727_v33 = vpop.f32.mrb[105].mxu1 }
 0x1e8   : > { %13686 = vst [vmem:[#allocation20_spill] sm:$0xff] %v11727_v33  ;;  %v9479_v3 = vpop.f32.mrb[106].mxu1 }
 0x1e9   : > { %v11729_v58 = vpop.f32.mrb[107].mxu1 }
 0x1ea   : > { %13687 = vst [vmem:[#allocation21_spill] sm:$0xff] %v11729_v58  ;;  %v9482_v18 = vpop.f32.mrb[108].mxu1 }
 0x1ee   : > { %9225 = vmatmul.mubr.bf16.gmra.mrb[156].mxu0 %v13652_v2 }
 0x1ef   : > { %9228 = vmatprep.mubr.bf16.mxu0 %v11318_v34  ;;  %v11733_v34 = vpop.f32.mrb[109].mxu1 }
 0x1f0   : > { %v9483_v9 = vpop.f32.mrb[110].mxu1 }
 0x1f1   : > { %v11735_v26 = vpop.f32.mrb[111].mxu1 }
 0x1f2   : > { %13688 = vst [vmem:[#allocation22_spill] sm:$0xff] %v11735_v26  ;;  %v9486_v6 = vpop.f32.mrb[112].mxu1 }
 0x1f6   : > { %9229 = vmatmul.mubr.bf16.gmra.mrb[160].mxu0 %v13652_v2 }
 0x1f7   : > { %9232 = vmatprep.mubr.bf16.mxu0 %v11325_v35  ;;  %v11739_v35 = vpop.f32.mrb[113].mxu1 }
 0x1f8   : > { %v9487_v3 = vpop.f32.mrb[114].mxu1 }
 0x1f9   : > { %v11741_v58 = vpop.f32.mrb[115].mxu1 }
 0x1fa   : > { %13689 = vst [vmem:[#allocation23_spill] sm:$0xff] %v11741_v58  ;;  %v9490_v6 = vpop.f32.mrb[116].mxu1 }
 0x1fe   : > { %9233 = vmatmul.mubr.bf16.gmra.mrb[164].mxu0 %v13652_v2 }
 0x1ff   : > { %9236 = vmatprep.mubr.bf16.mxu0 %v11332_v36 }
 0x206   : > { %9237 = vmatmul.mubr.bf16.gmra.mrb[168].mxu0 %v13652_v2 }
 0x207   : > { %9240 = vmatprep.mubr.bf16.mxu0 %v11339_v37 }
 0x209   : > { %v9038_v56 = vpop.f32.mrb[64].mxu0 }
 0x20a   : > { %v1331_v33 = vpop.f32.mrb[65].mxu0  ;;  %v11753_v56 = vpop.f32.mrb[117].mxu1 }
 0x20b   : > { %v9039_v18 = vpop.f32.mrb[66].mxu0  ;;  %v1637_v36 = vadd.f32 %v11519_v1, %v1331_v33  ;;  %v9491_v3 = vpop.f32.mrb[118].mxu1 }
 0x20c   : > { %v1334_v54 = vpop.f32.mrb[67].mxu0  ;;  %v11755_v58 = vpop.f32.mrb[119].mxu1 }
 0x20d   : > { %v11745_v9 = vadd.f32 %v11621_v30, %v1637_v36  ;;  %v1640_v26 = vadd.f32 %v11525_v5, %v1334_v54 }
 0x20e   : > { %9241 = vmatmul.mubr.bf16.gmra.mrb[172].mxu0 %v13652_v2 }
 0x20f   : > { %v11750_v37 = vadd.f32 %v11623_v43, %v1640_v26  ;;  %9244 = vmatprep.mubr.bf16.mxu0 %v11346_v38  ;;  %v9494_v26 = vpop.f32.mrb[120].mxu1 }
 0x210   : > { %v11767_v43 = vpop.f32.mrb[121].mxu1 }
 0x211   : > { %v9042_v18 = vpop.f32.mrb[68].mxu0  ;;  %v9495_v6 = vpop.f32.mrb[122].mxu1 }
 0x212   : > { %v1345_v1 = vpop.f32.mrb[69].mxu0  ;;  %v11769_v18 = vpop.f32.mrb[123].mxu1 }
 0x213   : > { %v9043_v33 = vpop.f32.mrb[70].mxu0  ;;  %v1651_v30 = vadd.f32 %v11532_v8, %v1345_v1 }
 0x214   : > { %v1348_v36 = vpop.f32.mrb[71].mxu0 }
 0x215   : > { %v11759_v5 = vadd.f32 %v11627_v47, %v1651_v30  ;;  %v1654_v54 = vadd.f32 %v11540_v11, %v1348_v36 }
 0x216   : > { %9245 = vmatmul.mubr.bf16.gmra.mrb[176].mxu0 %v13652_v2 }
 0x217   : > { %v11764_v38 = vadd.f32 %v11629_v51, %v1654_v54  ;;  %9248 = vmatprep.mubr.bf16.mxu0 %v11353_v39  ;;  %v9498_v51 = vpop.f32.mrb[124].mxu1 }
 0x218   : > { %v11781_v36 = vpop.f32.mrb[125].mxu1 }
 0x219   : > { %v9046_v3 = vpop.f32.mrb[72].mxu0  ;;  %v9499_v54 = vpop.f32.mrb[126].mxu1 }
 0x21a   : > { %v1359_v8 = vpop.f32.mrb[73].mxu0  ;;  %v11783_v6 = vpop.f32.mrb[127].mxu1 }
 0x21b   : > { %v9047_v1 = vpop.f32.mrb[74].mxu0  ;;  %v1665_v47 = vadd.f32 %v11542_v13, %v1359_v8 }
 0x21c   : > { %v1362_v33 = vpop.f32.mrb[75].mxu0 }
 0x21d   : > { %v11773_v11 = vadd.f32 %v11640_v60, %v1665_v47  ;;  %v1668_v30 = vadd.f32 %v11545_v15, %v1362_v33 }
 0x21e   : > { %9249 = vmatmul.mubr.bf16.gmra.mrb[180].mxu0 %v13652_v2 }
 0x21f   : > { %v11778_v39 = vadd.f32 %v11645_v4, %v1668_v30  ;;  %9252 = vmatprep.mubr.bf16.mxu0 %v11366_v42 }
 0x221   : > { %v9050_v26 = vpop.f32.mrb[76].mxu0 }
 0x222   : > { %v1373_v13 = vpop.f32.mrb[77].mxu0 }
 0x223   : > { %v9051_v3 = vpop.f32.mrb[78].mxu0  ;;  %v1679_v60 = vadd.f32 %v11548_v17, %v1373_v13 }
 0x224   : > { %v1376_v8 = vpop.f32.mrb[79].mxu0 }
 0x225   : > { %v11787_v15 = vadd.f32 %v11655_v16, %v1679_v60  ;;  %v1682_v1 = vadd.f32 %v11551_v19, %v1376_v8 }
 0x226   : > { %9253 = vmatmul.mubr.bf16.gmra.mrb[184].mxu0 %v13652_v2 }
 0x227   : > { %v11792_v42 = vadd.f32 %v11660_v28, %v1682_v1  ;;  %9256 = vmatprep.mubr.bf16.mxu0 %v11379_v45 }
 0x229   : > { %v9054_v4 = vpop.f32.mrb[80].mxu0 }
 0x22a   : > { %v1387_v47 = vpop.f32.mrb[81].mxu0 }
 0x22b   : > { %v9055_v33 = vpop.f32.mrb[82].mxu0  ;;  %v1693_v30 = vadd.f32 %v11553_v21, %v1387_v47  ;;  %v10927_v21 = vld [vmem:[%s13639_s1 + $0x188] sm:$0xff]  }
 0x22c   : > { %v1390_v51 = vpop.f32.mrb[83].mxu0 }
 0x22d   : > { %v11797_v17 = vadd.f32 %v11670_v53, %v1693_v30  ;;  %v1696_v16 = vadd.f32 %v11555_v23, %v1390_v51 }
 0x22e   : > { %9257 = vmatmul.mubr.bf16.gmra.mrb[188].mxu0 %v13652_v2 }
 0x22f   : > { %v11802_v19 = vadd.f32 %v11675_v0, %v1696_v16  ;;  %9276 = vmatprep.mubr.bf16.mxu0 %v13652_v2 }
 0x231   : > { %v9058_v28 = vpop.f32.mrb[84].mxu0 }
 0x232   : > { %v1401_v45 = vpop.f32.mrb[85].mxu0 }
 0x233   : > { %v9059_v54 = vpop.f32.mrb[86].mxu0  ;;  %v1707_v26 = vadd.f32 %v11558_v25, %v1401_v45  ;;  %v10928_v25 = vld [vmem:[%s13639_s1 + $0x190] sm:$0xff]  }
 0x234   : > { %v1404_v13 = vpop.f32.mrb[87].mxu0 }
 0x235   : > { %v11810_v53 = vadd.f32 %v11685_v24, %v1707_v26  ;;  %v1710_v23 = vadd.f32 %v11561_v27, %v1404_v13 }
 0x236   : > { %9277 = vmatmul.mubr.bf16.vlgmr.msra.gmra.mrb[128].mxu0 %v13652_v2 }
 0x237   : > { %v11815_v0 = vadd.f32 %v11692_v62, %v1710_v23  ;;  %9341 = vmatpush3.bf16.msra.mxu0 %v11690_v40  ;;  %9280 = vmatprep.mubr.bf16.mxu0 %v11490_v59  ;;  %v10929_v62 = vld [vmem:[%s13639_s1 + $0x198] sm:$0xff]  }
 0x238   : > { %9342 = vmatprep.subr.bf16.mxu0 %v10927_v21 }
 0x239   : > { %v9062_v3 = vpop.f32.mrb[88].mxu0 }
 0x23a   : > { %v1415_v60 = vpop.f32.mrb[89].mxu0 }
 0x23b   : > { %v9063_v24 = vpop.f32.mrb[90].mxu0  ;;  %v1721_v8 = vadd.f32 %v11563_v29, %v1415_v60  ;;  %9343 = vmatpush3.bf16.msra.mxu0 %v10927_v21  ;;  %v10930_v29 = vld [vmem:[%s13639_s1 + $0x1a0] sm:$0xff]  }
 0x23c   : > { %v1418_v27 = vpop.f32.mrb[91].mxu0  ;;  %9344 = vmatprep.subr.bf16.mxu0 %v10928_v25 }
 0x23d   : > { %v11827_v40 = vadd.f32 %v11700_v55, %v1721_v8  ;;  %v1724_v59 = vadd.f32 %v11565_v31, %v1418_v27 }
 0x23e   : > { %9281 = vmatmul.mubr.bf16.gmra.mrb[132].mxu0 %v13652_v2 }
 0x23f   : > { %v11832_v1 = vadd.f32 %v11702_v22, %v1724_v59  ;;  %9284 = vmatprep.mubr.bf16.mxu0 %v11637_v57  ;;  %9345 = vmatpush3.bf16.msra.mxu0 %v10928_v25  ;;  %v10931_v22 = vld [vmem:[%s13639_s1 + $0x1a8] sm:$0xff]  }
 0x240   : > { %9346 = vmatprep.subr.bf16.mxu0 %v10929_v62 }
 0x241   : > { %v9066_v4 = vpop.f32.mrb[92].mxu0 }
 0x242   : > { %v1429_v47 = vpop.f32.mrb[93].mxu0  ;;  %v13691_v4 = vld [vmem:[#allocation20_spill] sm:$0xff] }
 0x243   : > { %v9067_v33 = vpop.f32.mrb[94].mxu0  ;;  %v1735_v55 = vadd.f32 %v11568_v41, %v1429_v47  ;;  %9347 = vmatpush3.bf16.msra.mxu0 %v10929_v62  ;;  %v10932_v41 = vld [vmem:[%s13639_s1 + $0x1b0] sm:$0xff]  }
 0x244   : > { %v1432_v31 = vpop.f32.mrb[95].mxu0  ;;  %9348 = vmatprep.subr.bf16.mxu0 %v10930_v29 }
 0x245   : > { %v11843_v30 = vadd.f32 %v11709_v10, %v1735_v55  ;;  %v1738_v51 = vadd.f32 %v11571_v44, %v1432_v31 }
 0x246   : > { %9285 = vmatmul.mubr.bf16.gmra.mrb[136].mxu0 %v13652_v2 }
 0x247   : > { %v11848_v16 = vadd.f32 %v11711_v7, %v1738_v51  ;;  %9288 = vmatprep.mubr.bf16.mxu0 %v11652_v12  ;;  %9349 = vmatpush3.bf16.msra.mxu0 %v10930_v29  ;;  %v10933_v7 = vld [vmem:[%s13639_s1 + $0x1b8] sm:$0xff]  }
 0x248   : > { %9350 = vmatprep.subr.bf16.mxu0 %v10931_v22 }
 0x249   : > { %v9070_v28 = vpop.f32.mrb[96].mxu0 }
 0x24a   : > { %v1443_v45 = vpop.f32.mrb[97].mxu0 }
 0x24b   : > { %v9071_v54 = vpop.f32.mrb[98].mxu0  ;;  %v1749_v10 = vadd.f32 %v11573_v46, %v1443_v45  ;;  %9351 = vmatpush3.bf16.msra.mxu0 %v10931_v22  ;;  %v11870_v46 = vld [vmem:[%s13639_s1 + $0x200] sm:$0xff]  }
 0x24c   : > { %v1446_v44 = vpop.f32.mrb[99].mxu0  ;;  %9352 = vmatprep.subr.bf16.mxu0 %v10932_v41 }
 0x24d   : > { %v11859_v26 = vadd.f32 %v11715_v32, %v1749_v10  ;;  %v1752_v13 = vadd.f32 %v11575_v48, %v1446_v44  ;;  %v13696_v10 = vld [vmem:[#allocation9_spill] sm:$0xff] }
 0x24e   : > { %9289 = vmatmul.mubr.bf16.gmra.mrb[140].mxu0 %v13652_v2 }
 0x24f   : > { %v11864_v21 = vadd.f32 %v11717_v63, %v1752_v13  ;;  %9292 = vmatprep.mubr.bf16.mxu0 %v11667_v49  ;;  %9353 = vmatpush3.bf16.msra.mxu0 %v10932_v41  ;;  %v13695_v41 = vld [vmem:[#allocation8_spill] sm:$0xff] }
 0x250   : > { %9354 = vmatprep.subr.bf16.mxu0 %v10933_v7 }
 0x251   : > { %v9074_v23 = vpop.f32.mrb[100].mxu0 }
 0x252   : > { %v1457_v25 = vpop.f32.mrb[101].mxu0  ;;  %v13698_v23 = vld [vmem:[#allocation19_spill] sm:$0xff] }
 0x253   : > { %v9075_v32 = vpop.f32.mrb[102].mxu0  ;;  %v1763_v3 = vadd.f32 %v11579_v50, %v1457_v25  ;;  %9355 = vmatpush3.bf16.msra.mxu0 %v10933_v7  ;;  %v13690_v50 = vld [vmem:[#allocation6_spill] sm:$0xff] }
 0x254   : > { %v1460_v48 = vpop.f32.mrb[103].mxu0  ;;  %9500 = vmatprep.subr.bf16.mxu0 %v11870_v46  ;;  %v13697_v7 = vld [vmem:[#allocation22_spill] sm:$0xff] }
 0x255   : > { %v11875_v63 = vadd.f32 %v11721_v14, %v1763_v3  ;;  %v1766_v60 = vadd.f32 %v11581_v52, %v1460_v48  ;;  %v13692_v14 = vld [vmem:[#allocation7_spill] sm:$0xff]  ;;  %v13693_v52 = vld [vmem:[#allocation21_spill] sm:$0xff]  ;;  %v13699_v48 = vld [vmem:[#allocation10_spill] sm:$0xff] }
 0x256   : > { %9293 = vmatmul.mubr.bf16.gmra.mrb[144].mxu0 %v13652_v2 }
 0x257   : > { %v11880_v24 = vadd.f32 %v11723_v61, %v1766_v60  ;;  %9296 = vmatprep.mubr.bf16.mxu0 %v11682_v20  ;;  %v13694_v61 = vld [vmem:[#allocation18_spill] sm:$0xff] }
 0x259   : > { %v9078_v8 = vpop.f32.mrb[104].mxu0 }
 0x25a   : > { %v1471_v27 = vpop.f32.mrb[105].mxu0 }
 0x25b   : > { %v9079_v62 = vpop.f32.mrb[106].mxu0  ;;  %v1777_v59 = vadd.f32 %v13690_v50, %v1471_v27  ;;  %v13701_v50 = vld [vmem:[#allocation23_spill] sm:$0xff] }
 0x25c   : > { %v1474_v29 = vpop.f32.mrb[107].mxu0 }
 0x25d   : > { %v11885_v47 = vadd.f32 %v13691_v4, %v1777_v59  ;;  %v1780_v33 = vadd.f32 %v13692_v14, %v1474_v29  ;;  %v11913_v29 = vld [vmem:[%s11201_s23 + $0x38] sm:$0xff]  }
 0x25e   : > { %9297 = vmatmul.mubr.bf16.gmra.mrb[148].mxu0 %v13652_v2 }
 0x25f   : > { %v11890_v55 = vadd.f32 %v13693_v52, %v1780_v33  ;;  %9300 = vmatprep.mubr.bf16.mxu0 %v13694_v61  ;;  %v13702_v52 = vld [vmem:[#allocation12_spill] sm:$0xff] }
 0x261   : > { %v9082_v31 = vpop.f32.mrb[108].mxu0 }
 0x262   : > { %v1485_v22 = vpop.f32.mrb[109].mxu0 }
 0x263   : > { %v9083_v51 = vpop.f32.mrb[110].mxu0  ;;  %v1791_v28 = vadd.f32 %v13695_v41, %v1485_v22 }
 0x264   : > { %v1488_v45 = vpop.f32.mrb[111].mxu0  ;;  %v13703_v51 = vld [vmem:[#allocation13_spill] sm:$0xff] }
 0x265   : > { %v11895_v54 = vadd.f32 %v11733_v34, %v1791_v28  ;;  %v1794_v44 = vadd.f32 %v13696_v10, %v1488_v45  ;;  %v13700_v34 = vld [vmem:[#allocation11_spill] sm:$0xff]  ;;  %v11926_v45 = vld [vmem:[%s11201_s23 + $0x40] sm:$0xff]  }
 0x266   : > { %9301 = vmatmul.mubr.bf16.gmra.mrb[152].mxu0 %v13652_v2 }
 0x267   : > { %v11900_v13 = vadd.f32 %v13697_v7, %v1794_v44  ;;  %9304 = vmatprep.mubr.bf16.mxu0 %v13698_v23 }
 0x269   : > { %v9086_v25 = vpop.f32.mrb[112].mxu0 }
 0x26a   : > { %v1499_v32 = vpop.f32.mrb[113].mxu0  ;;  %v13704_v25 = vld [vmem:[#allocation14_spill] sm:$0xff] }
 0x26b   : > { %v9087_v3 = vpop.f32.mrb[114].mxu0  ;;  %v1805_v60 = vadd.f32 %v13699_v48, %v1499_v32  ;;  %v13705_v48 = vld [vmem:[#allocation15_spill] sm:$0xff] }
 0x26c   : > { %v1502_v8 = vpop.f32.mrb[115].mxu0 }
 0x26d   : > { %v11905_v27 = vadd.f32 %v11739_v35, %v1805_v60  ;;  %v1808_v62 = vadd.f32 %v13700_v34, %v1502_v8  ;;  %v11939_v8 = vld [vmem:[%s11201_s23 + $0x48] sm:$0xff]  }
 0x26e   : > { %9305 = vmatmul.mubr.bf16.gmra.mrb[156].mxu0 %v13652_v2 }
 0x26f   : > { %v11910_v59 = vadd.f32 %v13701_v50, %v1808_v62  ;;  %9308 = vmatprep.mubr.bf16.mxu0 %v11913_v29 }
 0x271   : > { %v9090_v4 = vpop.f32.mrb[116].mxu0 }
 0x272   : > { %v1513_v14 = vpop.f32.mrb[117].mxu0  ;;  %v13706_v4 = vld [vmem:[#allocation16_spill] sm:$0xff] }
 0x273   : > { %v9091_v33 = vpop.f32.mrb[118].mxu0  ;;  %v1819_v31 = vadd.f32 %v13702_v52, %v1513_v14  ;;  %v13707_v52 = vld [vmem:[#allocation17_spill] sm:$0xff] }
 0x274   : > { %v1516_v22 = vpop.f32.mrb[119].mxu0 }
 0x275   : > { %v11918_v35 = vadd.f32 %v11753_v56, %v1819_v31  ;;  %v1822_v41 = vadd.f32 %v13703_v51, %v1516_v22  ;;  %v11952_v22 = vld [vmem:[%s11201_s23 + $0x50] sm:$0xff]   ;;  %v11957_v51 = vld [vmem:[%s11201_s23 + $0x58] sm:$0xff]  }
 0x276   : > { %9309 = vmatmul.mubr.bf16.gmra.mrb[160].mxu0 %v13652_v2 }
 0x277   : > { %v11923_v28 = vadd.f32 %v11755_v58, %v1822_v41  ;;  %9312 = vmatprep.mubr.bf16.mxu0 %v11926_v45  ;;  %v11972_v41 = vld [vmem:[%s11201_s23 + $0x70] sm:$0xff]  }
 0x279   : > { %v9094_v10 = vpop.f32.mrb[120].mxu0 }
 0x27a   : > { %v1527_v44 = vpop.f32.mrb[121].mxu0  ;;  %v10935_v10 = vld [vmem:[%s13639_s1 + $0x208] sm:$0xff]  }
 0x27b   : > { %v9095_v7 = vpop.f32.mrb[122].mxu0  ;;  %v1833_v32 = vadd.f32 %v13704_v25, %v1527_v44  ;;  %v10936_v44 = vld [vmem:[%s13639_s1 + $0x210] sm:$0xff]   ;;  %v10939_v25 = vld [vmem:[%s13639_s1 + $0x228] sm:$0xff]  }
 0x27c   : > { %v1530_v3 = vpop.f32.mrb[123].mxu0  ;;  %v10937_v7 = vld [vmem:[%s13639_s1 + $0x218] sm:$0xff]  }
 0x27d   : > { %v11931_v56 = vadd.f32 %v11767_v43, %v1833_v32  ;;  %v1836_v60 = vadd.f32 %v13705_v48, %v1530_v3  ;;  %v10940_v32 = vld [vmem:[%s13639_s1 + $0x230] sm:$0xff]   ;;  %v10941_v3 = vld [vmem:[%s13639_s1 + $0x238] sm:$0xff]   ;;  %v10942_v48 = vld [vmem:[%s13642_s4 + $0xc0] sm:$0xff]  }
 0x27e   : > { %9313 = vmatmul.mubr.bf16.gmra.mrb[164].mxu0 %v13652_v2  ;;  %9580 = vmatprep.subr.bf16.mxu1 %v10942_v48 }
 0x27f   : > { %v11936_v58 = vadd.f32 %v11769_v18, %v1836_v60  ;;  %9316 = vmatprep.mubr.bf16.mxu0 %v11939_v8  ;;  %v12030_v60 = vld [vmem:[%s11201_s23 + $0x78] sm:$0xff]   ;;  %9581 = vmatpush3.bf16.msra.mxu1 %v10942_v48 }
 0x281   : > { %v9098_v34 = vpop.f32.mrb[124].mxu0 }
 0x282   : > { %v1541_v62 = vpop.f32.mrb[125].mxu0  ;;  %v10943_v34 = vld [vmem:[%s13642_s4 + $0xc8] sm:$0xff]  }
 0x283   : > { %v9099_v50 = vpop.f32.mrb[126].mxu0  ;;  %v1847_v43 = vadd.f32 %v13706_v4, %v1541_v62  ;;  %9582 = vmatprep.subr.bf16.mxu1 %v10943_v34  ;;  %v10944_v62 = vld [vmem:[%s13642_s4 + $0xd0] sm:$0xff]   ;;  %v10954_v4 = vld [vmem:[%s13642_s4 + $0x68] sm:$0xff]  }
 0x284   : > { %v1544_v14 = vpop.f32.mrb[127].mxu0  ;;  %9583 = vmatpush3.bf16.msra.mxu1 %v10943_v34  ;;  %v3725_v50 = vlaneseq }
 0x285   : > { %v11944_v33 = vadd.f32 %v11781_v36, %v1847_v43  ;;  %v1850_v31 = vadd.f32 %v13707_v52, %v1544_v14  ;;  %v11962_v36 = vld [vmem:[%s11201_s23 + $0x60] sm:$0xff]   ;;  %9584 = vmatprep.subr.bf16.mxu1 %v10944_v62  ;;  %v10956_v52 = vld [vmem:[%s13642_s4 + $0x70] sm:$0xff]  }
 0x286   : > { %9317 = vmatmul.mubr.bf16.gmra.mrb[168].mxu0 %v13652_v2  ;;  %v12095_v43 = vshrl.u32 %v3725_v50, 7 }
 0x287   : > { %v11949_v18 = vadd.f32 %v11783_v6, %v1850_v31  ;;  %9320 = vmatprep.mubr.bf16.mxu0 %v11952_v22  ;;  %v11967_v6 = vld [vmem:[%s11201_s23 + $0x68] sm:$0xff]  }
 0x288   : > { %9585 = vmatpush3.bf16.msra.mxu1 %v10944_v62  ;;  %13708 = vst [vmem:[#allocation6_spill] sm:$0xff] %v12095_v43  ;;  %vm3727_vm0 = vcmp.lt.s32.totalorder %v12095_v43, 1  ;;  %vm3840_vm1 = vcmp.lt.s32.totalorder %v12095_v43, 7 }
 0x28e   : > { %9321 = vmatmul.mubr.bf16.gmra.mrb[172].mxu0 %v13652_v2 }
 0x28f   : > { %9324 = vmatprep.mubr.bf16.mxu0 %v11957_v51 }
 0x296   : > { %9325 = vmatmul.mubr.bf16.gmra.mrb[176].mxu0 %v13652_v2 }
 0x297   : > { %9328 = vmatprep.mubr.bf16.mxu0 %v11962_v36 }
 0x29e   : > { %9329 = vmatmul.mubr.bf16.gmra.mrb[180].mxu0 %v13652_v2 }
 0x29f   : > { %9332 = vmatprep.mubr.bf16.mxu0 %v11967_v6 }
 0x2a6   : > { %9333 = vmatmul.mubr.bf16.gmra.mrb[184].mxu0 %v13652_v2 }
 0x2a7   : > { %9336 = vmatprep.mubr.bf16.mxu0 %v11972_v41 }
 0x2ae   : > { %9337 = vmatmul.mubr.bf16.gmra.mrb[188].mxu0 %v13652_v2 }
 0x2af   : > { %9356 = vmatprep.mubr.bf16.mxu0 %v11637_v57 }
 0x2b6   : > { %9357 = vmatmul.mubr.bf16.vlgmr.msra.gmra.mrb[0].mxu0 %v13652_v2 }
 0x2b7   : > { %9501 = vmatpush3.bf16.msra.mxu0 %v11870_v46  ;;  %9360 = vmatprep.mubr.bf16.mxu0 %v11652_v12  ;;  %v10938_v46 = vld [vmem:[%s13639_s1 + $0x220] sm:$0xff]  }
 0x2b8   : > { %9502 = vmatprep.subr.bf16.mxu0 %v10935_v10 }
 0x2bb   : > { %9503 = vmatpush3.bf16.msra.mxu0 %v10935_v10 }
 0x2bc   : > { %9504 = vmatprep.subr.bf16.mxu0 %v10936_v44 }
 0x2be   : > { %9361 = vmatmul.mubr.bf16.gmra.mrb[4].mxu0 %v13652_v2 }
 0x2bf   : > { %9364 = vmatprep.mubr.bf16.mxu0 %v11667_v49  ;;  %9505 = vmatpush3.bf16.msra.mxu0 %v10936_v44 }
 0x2c0   : > { %9506 = vmatprep.subr.bf16.mxu0 %v10937_v7 }
 0x2c3   : > { %9507 = vmatpush3.bf16.msra.mxu0 %v10937_v7  ;;  %v10957_v7 = vld [vmem:[%s13642_s4 + $0x78] sm:$0xff]  }
 0x2c4   : > { %9508 = vmatprep.subr.bf16.mxu0 %v10938_v46 }
 0x2c6   : > { %9365 = vmatmul.mubr.bf16.gmra.mrb[8].mxu0 %v13652_v2 }
 0x2c7   : > { %9368 = vmatprep.mubr.bf16.mxu0 %v11682_v20  ;;  %9509 = vmatpush3.bf16.msra.mxu0 %v10938_v46 }
 0x2c8   : > { %9510 = vmatprep.subr.bf16.mxu0 %v10939_v25 }
 0x2cb   : > { %9511 = vmatpush3.bf16.msra.mxu0 %v10939_v25 }
 0x2cc   : > { %9512 = vmatprep.subr.bf16.mxu0 %v10940_v32 }
 0x2ce   : > { %9369 = vmatmul.mubr.bf16.gmra.mrb[12].mxu0 %v13652_v2 }
 0x2cf   : > { %9372 = vmatprep.mubr.bf16.mxu0 %v13694_v61  ;;  %9513 = vmatpush3.bf16.msra.mxu0 %v10940_v32 }
 0x2d0   : > { %9514 = vmatprep.subr.bf16.mxu0 %v10941_v3 }
 0x2d3   : > { %9515 = vmatpush3.bf16.msra.mxu0 %v10941_v3 }
 0x2d6   : > { %9373 = vmatmul.mubr.bf16.gmra.mrb[16].mxu0 %v13652_v2 }
 0x2d7   : > { %9376 = vmatprep.mubr.bf16.mxu0 %v13698_v23 }
 0x2de   : > { %9377 = vmatmul.mubr.bf16.gmra.mrb[20].mxu0 %v13652_v2 }
 0x2df   : > { %9380 = vmatprep.mubr.bf16.mxu0 %v11913_v29 }
 0x2e6   : > { %9381 = vmatmul.mubr.bf16.gmra.mrb[24].mxu0 %v13652_v2 }
 0x2e7   : > { %9384 = vmatprep.mubr.bf16.mxu0 %v11926_v45 }
 0x2ee   : > { %9385 = vmatmul.mubr.bf16.gmra.mrb[28].mxu0 %v13652_v2 }
 0x2ef   : > { %9388 = vmatprep.mubr.bf16.mxu0 %v11939_v8 }
 0x2f6   : > { %9389 = vmatmul.mubr.bf16.gmra.mrb[32].mxu0 %v13652_v2 }
 0x2f7   : > { %9392 = vmatprep.mubr.bf16.mxu0 %v11952_v22 }
 0x2fe   : > { %9393 = vmatmul.mubr.bf16.gmra.mrb[36].mxu0 %v13652_v2 }
 0x2ff   : > { %9396 = vmatprep.mubr.bf16.mxu0 %v11957_v51 }
 0x306   : > { %9397 = vmatmul.mubr.bf16.gmra.mrb[40].mxu0 %v13652_v2 }
 0x307   : > { %9400 = vmatprep.mubr.bf16.mxu0 %v11962_v36 }
 0x30e   : > { %9401 = vmatmul.mubr.bf16.gmra.mrb[44].mxu0 %v13652_v2 }
 0x30f   : > { %9404 = vmatprep.mubr.bf16.mxu0 %v11967_v6 }
 0x316   : > { %9405 = vmatmul.mubr.bf16.gmra.mrb[48].mxu0 %v13652_v2 }
 0x317   : > { %9408 = vmatprep.mubr.bf16.mxu0 %v11972_v41 }
 0x31e   : > { %9409 = vmatmul.mubr.bf16.gmra.mrb[52].mxu0 %v13652_v2 }
 0x31f   : > { %9412 = vmatprep.mubr.bf16.mxu0 %v12030_v60 }
 0x326   : > { %9413 = vmatmul.mubr.bf16.gmra.mrb[56].mxu0 %v13652_v2 }
 0x327   : > { %9416 = vmatprep.mubr.bf16.mxu0 %v13652_v2 }
 0x32e   : > { %9417 = vmatmul.mubr.bf16.gmra.mrb[60].mxu0 %v13652_v2 }
 0x32f   : > { %9516 = vmatprep.mubr.bf16.mxu0 %v11637_v57  ;;  %v10945_v57 = vld [vmem:[%s13642_s4 + $0xd8] sm:$0xff]  }
 0x330   : > { %9586 = vmatprep.subr.bf16.mxu1 %v10945_v57 }
 0x331   : > { %9587 = vmatpush3.bf16.msra.mxu1 %v10945_v57 }
 0x336   : > { %9517 = vmatmul.mubr.bf16.vlgmr.msra.gmra.mrb[128].mxu0 %v13652_v2 }
 0x337   : > { %9520 = vmatprep.mubr.bf16.mxu0 %v11652_v12  ;;  %v10946_v12 = vld [vmem:[%s13642_s4 + $0xe0] sm:$0xff]  }
 0x338   : > { %9588 = vmatprep.subr.bf16.mxu1 %v10946_v12 }
 0x339   : > { %9589 = vmatpush3.bf16.msra.mxu1 %v10946_v12 }
 0x33e   : > { %9521 = vmatmul.mubr.bf16.gmra.mrb[132].mxu0 %v13652_v2 }
 0x33f   : > { %9524 = vmatprep.mubr.bf16.mxu0 %v11667_v49  ;;  %v10947_v49 = vld [vmem:[%s13642_s4 + $0xe8] sm:$0xff]  }
 0x340   : > { %9590 = vmatprep.subr.bf16.mxu1 %v10947_v49 }
 0x341   : > { %9591 = vmatpush3.bf16.msra.mxu1 %v10947_v49 }
 0x346   : > { %9525 = vmatmul.mubr.bf16.gmra.mrb[136].mxu0 %v13652_v2 }
 0x347   : > { %9528 = vmatprep.mubr.bf16.mxu0 %v11682_v20  ;;  %v10948_v20 = vld [vmem:[%s13642_s4 + $0x40] sm:$0xff]  }
 0x348   : > { %9820 = vmatprep.subr.bf16.mxu0 %v10948_v20 }
 0x349   : > { %9821 = vmatpush3.bf16.msra.mxu0 %v10948_v20 }
 0x34e   : > { %9529 = vmatmul.mubr.bf16.gmra.mrb[140].mxu0 %v13652_v2 }
 0x34f   : > { %9532 = vmatprep.mubr.bf16.mxu0 %v13694_v61  ;;  %v10949_v61 = vld [vmem:[%s13642_s4 + $0x48] sm:$0xff]  }
 0x350   : > { %9822 = vmatprep.subr.bf16.mxu0 %v10949_v61 }
 0x351   : > { %9823 = vmatpush3.bf16.msra.mxu0 %v10949_v61 }
 0x356   : > { %9533 = vmatmul.mubr.bf16.gmra.mrb[144].mxu0 %v13652_v2 }
 0x357   : > { %9536 = vmatprep.mubr.bf16.mxu0 %v13698_v23  ;;  %v10951_v23 = vld [vmem:[%s13642_s4 + $0x50] sm:$0xff]  }
 0x358   : > { %9824 = vmatprep.subr.bf16.mxu0 %v10951_v23 }
 0x359   : > { %9825 = vmatpush3.bf16.msra.mxu0 %v10951_v23 }
 0x35e   : > { %9537 = vmatmul.mubr.bf16.gmra.mrb[148].mxu0 %v13652_v2 }
 0x35f   : > { %9540 = vmatprep.mubr.bf16.mxu0 %v11913_v29  ;;  %v10952_v29 = vld [vmem:[%s13642_s4 + $0x58] sm:$0xff]  }
 0x360   : > { %9826 = vmatprep.subr.bf16.mxu0 %v10952_v29 }
 0x361   : > { %9827 = vmatpush3.bf16.msra.mxu0 %v10952_v29 }
 0x366   : > { %9541 = vmatmul.mubr.bf16.gmra.mrb[152].mxu0 %v13652_v2 }
 0x367   : > { %9544 = vmatprep.mubr.bf16.mxu0 %v11926_v45  ;;  %v10950_v45 = vld [vmem:[%s13642_s4 + $0xf0] sm:$0xff]  }
 0x368   : > { %9592 = vmatprep.subr.bf16.mxu1 %v10950_v45 }
 0x369   : > { %9593 = vmatpush3.bf16.msra.mxu1 %v10950_v45 }
 0x36e   : > { %9545 = vmatmul.mubr.bf16.gmra.mrb[156].mxu0 %v13652_v2 }
 0x36f   : > { %9548 = vmatprep.mubr.bf16.mxu0 %v11939_v8  ;;  %v10953_v8 = vld [vmem:[%s13642_s4 + $0x60] sm:$0xff]  }
 0x370   : > { %9828 = vmatprep.subr.bf16.mxu0 %v10953_v8 }
 0x371   : > { %9829 = vmatpush3.bf16.msra.mxu0 %v10953_v8 }
 0x372   : > { %9830 = vmatprep.subr.bf16.mxu0 %v10954_v4 }
 0x375   : > { %9831 = vmatpush3.bf16.msra.mxu0 %v10954_v4 }
 0x376   : > { %9549 = vmatmul.mubr.bf16.gmra.mrb[160].mxu0 %v13652_v2  ;;  %9832 = vmatprep.subr.bf16.mxu0 %v10956_v52 }
 0x377   : > { %9552 = vmatprep.mubr.bf16.mxu0 %v11952_v22 }
 0x379   : > { %9833 = vmatpush3.bf16.msra.mxu0 %v10956_v52  ;;  %v12146_v52 = vld [vmem:[%s13642_s4] sm:$0xff]  }
 0x37a   : > { %9834 = vmatprep.subr.bf16.mxu0 %v10957_v7 }
 0x37d   : > { %9835 = vmatpush3.bf16.msra.mxu0 %v10957_v7 }
 0x37e   : > { %9553 = vmatmul.mubr.bf16.gmra.mrb[164].mxu0 %v13652_v2 }
 0x37f   : > { %9556 = vmatprep.mubr.bf16.mxu0 %v11957_v51  ;;  %v10955_v51 = vld [vmem:[%s13642_s4 + $0xf8] sm:$0xff]  }
 0x380   : > { %9594 = vmatprep.subr.bf16.mxu1 %v10955_v51 }
 0x381   : > { %9595 = vmatpush3.bf16.msra.mxu1 %v10955_v51 }
 0x382   : > { %9660 = vmatprep.subr.bf16.mxu1 %v12146_v52 }
 0x386   : > { %9557 = vmatmul.mubr.bf16.gmra.mrb[168].mxu0 %v13652_v2 }
 0x387   : > { %9560 = vmatprep.mubr.bf16.mxu0 %v11962_v36 }
 0x389   : > { %v9358_v14 = vpop.f32.mrb[0].mxu0 }
 0x38a   : > { %v12100_v31 = vpop.f32.mrb[1].mxu0 }
 0x38b   : > { %v9359_v22 = vpop.f32.mrb[2].mxu0  ;;  %v3677_v36 = vrot.slane %v12100_v31, 7 }
 0x38c   : > { %v2653_v10 = vpop.f32.mrb[3].mxu0  ;;  %v3679_v48 = vrot.slane %v9359_v22, 7 }
 0x38d   : > { %v3678_v44 = vrot.slane %v2653_v10, 7 }
 0x38e   : > { %9561 = vmatmul.mubr.bf16.gmra.mrb[172].mxu0 %v13652_v2 }
 0x38f   : > { %v3758_v46 = vsel %vm3727_vm0, %v3677_v36, %v3678_v44  ;;  %9564 = vmatprep.mubr.bf16.mxu0 %v11967_v6 }
 0x390   : > { %v12117_v25 = vadd.f32 %v3758_v46, %v11750_v37 }
 0x391   : > { %v9362_v32 = vpop.f32.mrb[4].mxu0 }
 0x392   : > { %v2665_v3 = vpop.f32.mrb[5].mxu0 }
 0x393   : > { %v3680_v34 = vrot.slane %v2665_v3, 7  ;;  %v9363_v62 = vpop.f32.mrb[6].mxu0 }
 0x394   : > { %v2668_v57 = vpop.f32.mrb[7].mxu0  ;;  %v3682_v29 = vrot.slane %v9363_v62, 7 }
 0x395   : > { %v3757_v12 = vsel %vm3727_vm0, %v3679_v48, %v3680_v34  ;;  %v3681_v49 = vrot.slane %v2668_v57, 7 }
 0x396   : > { %v12122_v20 = vadd.f32 %v3757_v12, %v11759_v5  ;;  %9565 = vmatmul.mubr.bf16.gmra.mrb[176].mxu0 %v13652_v2 }
 0x397   : > { %v3756_v37 = vsel %vm3727_vm0, %v3680_v34, %v3681_v49  ;;  %9568 = vmatprep.mubr.bf16.mxu0 %v11972_v41 }
 0x398   : > { %v12129_v6 = vadd.f32 %v3756_v37, %v11764_v38 }
 0x399   : > { %v9366_v61 = vpop.f32.mrb[8].mxu0 }
 0x39a   : > { %v2680_v23 = vpop.f32.mrb[9].mxu0 }
 0x39b   : > { %v3683_v45 = vrot.slane %v2680_v23, 7  ;;  %v9367_v8 = vpop.f32.mrb[10].mxu0 }
 0x39c   : > { %v2683_v50 = vpop.f32.mrb[11].mxu0 }
 0x39d   : > { %v3755_v5 = vsel %vm3727_vm0, %v3682_v29, %v3683_v45  ;;  %v3684_v4 = vrot.slane %v2683_v50, 7 }
 0x39e   : > { %v12134_v14 = vadd.f32 %v3755_v5, %v11773_v11  ;;  %9569 = vmatmul.mubr.bf16.gmra.mrb[180].mxu0 %v13652_v2  ;;  %v3685_v11 = vrot.slane %v9367_v8, 7 }
 0x39f   : > { %v3754_v41 = vsel %vm3727_vm0, %v3683_v45, %v3684_v4  ;;  %9572 = vmatprep.mubr.bf16.mxu0 %v12030_v60 }
 0x3a0   : > { %v12141_v38 = vadd.f32 %v3754_v41, %v11778_v39 }
 0x3a1   : > { %v9370_v22 = vpop.f32.mrb[12].mxu0 }
 0x3a2   : > { %v2695_v51 = vpop.f32.mrb[13].mxu0 }
 0x3a3   : > { %v3686_v10 = vrot.slane %v2695_v51, 7  ;;  %v9371_v44 = vpop.f32.mrb[14].mxu0 }
 0x3a4   : > { %v2698_v7 = vpop.f32.mrb[15].mxu0  ;;  %v3688_v62 = vrot.slane %v9371_v44, 7 }
 0x3a5   : > { %v3753_v46 = vsel %vm3727_vm0, %v3685_v11, %v3686_v10  ;;  %v3687_v60 = vrot.slane %v2698_v7, 7 }
 0x3a6   : > { %v12152_v39 = vadd.f32 %v3753_v46, %v11787_v15  ;;  %9573 = vmatmul.mubr.bf16.gmra.mrb[184].mxu0 %v13652_v2 }
 0x3a7   : > { %v3752_v32 = vsel %vm3727_vm0, %v3686_v10, %v3687_v60  ;;  %9576 = vmatprep.mubr.bf16.mxu0 %v13652_v2 }
 0x3a8   : > { %v12159_v3 = vadd.f32 %v3752_v32, %v11792_v42 }
 0x3a9   : > { %v9374_v48 = vpop.f32.mrb[16].mxu0 }
 0x3aa   : > { %v2710_v34 = vpop.f32.mrb[17].mxu0 }
 0x3ab   : > { %v3689_v57 = vrot.slane %v2710_v34, 7  ;;  %v9375_v12 = vpop.f32.mrb[18].mxu0 }
 0x3ac   : > { %v2713_v49 = vpop.f32.mrb[19].mxu0  ;;  %v3691_v8 = vrot.slane %v9375_v12, 7 }
 0x3ad   : > { %v3751_v15 = vsel %vm3727_vm0, %v3688_v62, %v3689_v57  ;;  %v3690_v37 = vrot.slane %v2713_v49, 7 }
 0x3ae   : > { %v12164_v61 = vadd.f32 %v3751_v15, %v11797_v17  ;;  %9577 = vmatmul.mubr.bf16.gmra.mrb[188].mxu0 %v13652_v2 }
 0x3af   : > { %v3750_v23 = vsel %vm3727_vm0, %v3689_v57, %v3690_v37  ;;  %9836 = vmatprep.mubr.bf16.mxu0 %v13652_v2 }
 0x3b0   : > { %v12171_v42 = vadd.f32 %v3750_v23, %v11802_v19 }
 0x3b1   : > { %v9378_v29 = vpop.f32.mrb[20].mxu0 }
 0x3b2   : > { %v2725_v45 = vpop.f32.mrb[21].mxu0 }
 0x3b3   : > { %v3692_v50 = vrot.slane %v2725_v45, 7  ;;  %v9379_v5 = vpop.f32.mrb[22].mxu0 }
 0x3b4   : > { %v2728_v4 = vpop.f32.mrb[23].mxu0  ;;  %v3694_v44 = vrot.slane %v9379_v5, 7 }
 0x3b5   : > { %v3749_v17 = vsel %vm3727_vm0, %v3691_v8, %v3692_v50  ;;  %v3693_v41 = vrot.slane %v2728_v4, 7 }
 0x3b6   : > { %v12176_v22 = vadd.f32 %v3749_v17, %v11810_v53  ;;  %9837 = vmatmul.mubr.bf16.vlgmr.msra.gmra.mrb[192].mxu0 %v13652_v2 }
 0x3b7   : > { %v3748_v51 = vsel %vm3727_vm0, %v3692_v50, %v3693_v41 }
 0x3b8   : > { %v12182_v19 = vadd.f32 %v3748_v51, %v11815_v0 }
 0x3b9   : > { %v9382_v11 = vpop.f32.mrb[24].mxu0 }
 0x3ba   : > { %v2740_v10 = vpop.f32.mrb[25].mxu0 }
 0x3bb   : > { %v3695_v7 = vrot.slane %v2740_v10, 7  ;;  %v9383_v46 = vpop.f32.mrb[26].mxu0 }
 0x3bc   : > { %v2743_v60 = vpop.f32.mrb[27].mxu0  ;;  %v3697_v12 = vrot.slane %v9383_v46, 7 }
 0x3bd   : > { %v3747_v32 = vsel %vm3727_vm0, %v3694_v44, %v3695_v7  ;;  %v3696_v48 = vrot.slane %v2743_v60, 7 }
 0x3be   : > { %v12187_v53 = vadd.f32 %v3747_v32, %v11827_v40 }
 0x3bf   : > { %v3746_v34 = vsel %vm3727_vm0, %v3695_v7, %v3696_v48 }
 0x3c0   : > { %v12192_v62 = vadd.f32 %v3746_v34, %v11832_v1 }
 0x3c1   : > { %v9386_v0 = vpop.f32.mrb[28].mxu0 }
 0x3c2   : > { %v2755_v57 = vpop.f32.mrb[29].mxu0 }
 0x3c3   : > { %v3698_v49 = vrot.slane %v2755_v57, 7  ;;  %v9387_v15 = vpop.f32.mrb[30].mxu0 }
 0x3c4   : > { %v2758_v37 = vpop.f32.mrb[31].mxu0  ;;  %v3700_v5 = vrot.slane %v9387_v15, 7 }
 0x3c5   : > { %v3745_v23 = vsel %vm3727_vm0, %v3697_v12, %v3698_v49  ;;  %v3699_v29 = vrot.slane %v2758_v37, 7 }
 0x3c6   : > { %v12197_v45 = vadd.f32 %v3745_v23, %v11843_v30 }
 0x3c7   : > { %v3744_v40 = vsel %vm3727_vm0, %v3698_v49, %v3699_v29 }
 0x3c8   : > { %v12202_v8 = vadd.f32 %v3744_v40, %v11848_v16 }
 0x3c9   : > { %v9390_v1 = vpop.f32.mrb[32].mxu0 }
 0x3ca   : > { %v2770_v50 = vpop.f32.mrb[33].mxu0 }
 0x3cb   : > { %v3701_v4 = vrot.slane %v2770_v50, 7  ;;  %v9391_v17 = vpop.f32.mrb[34].mxu0 }
 0x3cc   : > { %v2773_v41 = vpop.f32.mrb[35].mxu0  ;;  %v3703_v46 = vrot.slane %v9391_v17, 7 }
 0x3cd   : > { %v3743_v51 = vsel %vm3727_vm0, %v3700_v5, %v3701_v4  ;;  %v3702_v11 = vrot.slane %v2773_v41, 7 }
 0x3ce   : > { %v12207_v10 = vadd.f32 %v3743_v51, %v11859_v26 }
 0x3cf   : > { %v3742_v30 = vsel %vm3727_vm0, %v3701_v4, %v3702_v11 }
 0x3d0   : > { %v12212_v44 = vadd.f32 %v3742_v30, %v11864_v21 }
 0x3d1   : > { %v9394_v16 = vpop.f32.mrb[36].mxu0 }
 0x3d2   : > { %v2785_v7 = vpop.f32.mrb[37].mxu0 }
 0x3d3   : > { %v3704_v60 = vrot.slane %v2785_v7, 7  ;;  %v9395_v32 = vpop.f32.mrb[38].mxu0 }
 0x3d4   : > { %v2788_v48 = vpop.f32.mrb[39].mxu0  ;;  %v3706_v15 = vrot.slane %v9395_v32, 7 }
 0x3d5   : > { %v3741_v34 = vsel %vm3727_vm0, %v3703_v46, %v3704_v60  ;;  %v3705_v0 = vrot.slane %v2788_v48, 7 }
 0x3d6   : > { %v12217_v57 = vadd.f32 %v3741_v34, %v11875_v63 }
 0x3d7   : > { %v3740_v26 = vsel %vm3727_vm0, %v3704_v60, %v3705_v0 }
 0x3d8   : > { %v12222_v12 = vadd.f32 %v3740_v26, %v11880_v24 }
 0x3d9   : > { %v9398_v21 = vpop.f32.mrb[40].mxu0 }
 0x3da   : > { %v2800_v49 = vpop.f32.mrb[41].mxu0 }
 0x3db   : > { %v3707_v37 = vrot.slane %v2800_v49, 7  ;;  %v9399_v23 = vpop.f32.mrb[42].mxu0 }
 0x3dc   : > { %v2803_v29 = vpop.f32.mrb[43].mxu0  ;;  %v3709_v17 = vrot.slane %v9399_v23, 7 }
 0x3dd   : > { %v3739_v40 = vsel %vm3727_vm0, %v3706_v15, %v3707_v37  ;;  %v3708_v1 = vrot.slane %v2803_v29, 7 }
 0x3de   : > { %v12227_v50 = vadd.f32 %v3739_v40, %v11885_v47 }
 0x3df   : > { %v3738_v63 = vsel %vm3727_vm0, %v3707_v37, %v3708_v1  ;;  %v10964_v37 = vld [vmem:[%s13642_s4 + $0x1c0] sm:$0xff]  }
 0x3e0   : > { %v12232_v5 = vadd.f32 %v3738_v63, %v11890_v55  ;;  %10140 = vmatprep.subr.bf16.mxu0 %v10964_v37 }
 0x3e1   : > { %v9402_v24 = vpop.f32.mrb[44].mxu0  ;;  %10141 = vmatpush3.bf16.msra.mxu0 %v10964_v37 }
 0x3e2   : > { %v2815_v4 = vpop.f32.mrb[45].mxu0 }
 0x3e3   : > { %v3710_v41 = vrot.slane %v2815_v4, 7  ;;  %v9403_v51 = vpop.f32.mrb[46].mxu0 }
 0x3e4   : > { %v2818_v11 = vpop.f32.mrb[47].mxu0  ;;  %v3712_v32 = vrot.slane %v9403_v51, 7 }
 0x3e5   : > { %v3737_v30 = vsel %vm3727_vm0, %v3709_v17, %v3710_v41  ;;  %v3711_v16 = vrot.slane %v2818_v11, 7  ;;  %v10967_v11 = vld [vmem:[%s13642_s4 + $0x1d0] sm:$0xff]  }
 0x3e6   : > { %v12237_v7 = vadd.f32 %v3737_v30, %v11895_v54 }
 0x3e7   : > { %v3736_v47 = vsel %vm3727_vm0, %v3710_v41, %v3711_v16 }
 0x3e8   : > { %v12242_v46 = vadd.f32 %v3736_v47, %v11900_v13 }
 0x3e9   : > { %v9406_v55 = vpop.f32.mrb[48].mxu0 }
 0x3ea   : > { %v2830_v60 = vpop.f32.mrb[49].mxu0 }
 0x3eb   : > { %v3713_v48 = vrot.slane %v2830_v60, 7  ;;  %v9407_v34 = vpop.f32.mrb[50].mxu0 }
 0x3ec   : > { %v2833_v0 = vpop.f32.mrb[51].mxu0  ;;  %v3715_v29 = vrot.slane %v9407_v34, 7 }
 0x3ed   : > { %v3735_v26 = vsel %vm3727_vm0, %v3712_v32, %v3713_v48  ;;  %v3714_v21 = vrot.slane %v2833_v0, 7 }
 0x3ee   : > { %v12247_v49 = vadd.f32 %v3735_v26, %v11905_v27 }
 0x3ef   : > { %v3734_v54 = vsel %vm3727_vm0, %v3713_v48, %v3714_v21  ;;  %v10969_v21 = vld [vmem:[%s13642_s4 + $0x1e0] sm:$0xff]  }
 0x3f0   : > { %v12252_v15 = vadd.f32 %v3734_v54, %v11910_v59  ;;  %v10965_v59 = vld [vmem:[%s13642_s4 + $0x1c8] sm:$0xff]  }
 0x3f1   : > { %v9410_v13 = vpop.f32.mrb[52].mxu0  ;;  %10142 = vmatprep.subr.bf16.mxu0 %v10965_v59 }
 0x3f2   : > { %v2845_v23 = vpop.f32.mrb[53].mxu0  ;;  %10143 = vmatpush3.bf16.msra.mxu0 %v10965_v59 }
 0x3f3   : > { %v3716_v40 = vrot.slane %v2845_v23, 7  ;;  %v9411_v1 = vpop.f32.mrb[54].mxu0  ;;  %10144 = vmatprep.subr.bf16.mxu0 %v10967_v11 }
 0x3f4   : > { %v2848_v63 = vpop.f32.mrb[55].mxu0  ;;  %v3718_v16 = vrot.slane %v9411_v1, 7 }
 0x3f5   : > { %v3733_v27 = vsel %vm3727_vm0, %v3715_v29, %v3716_v40  ;;  %v3717_v24 = vrot.slane %v2848_v63, 7 }
 0x3f6   : > { %v12263_v4 = vadd.f32 %v3733_v27, %v11918_v35  ;;  %10145 = vmatpush3.bf16.msra.mxu0 %v10967_v11 }
 0x3f7   : > { %v3732_v17 = vsel %vm3727_vm0, %v3716_v40, %v3717_v24 }
 0x3f8   : > { %v12268_v41 = vadd.f32 %v3732_v17, %v11923_v28  ;;  %v10968_v28 = vld [vmem:[%s13642_s4 + $0x1d8] sm:$0xff]  }
 0x3f9   : > { %v9414_v51 = vpop.f32.mrb[56].mxu0  ;;  %10146 = vmatprep.subr.bf16.mxu0 %v10968_v28 }
 0x3fa   : > { %v2860_v30 = vpop.f32.mrb[57].mxu0  ;;  %10147 = vmatpush3.bf16.msra.mxu0 %v10968_v28  ;;  %v12327_v28 = vld [vmem:[%s13641_s3] ss:$0 sm:$0xff] }
 0x3fb   : > { %v3719_v47 = vrot.slane %v2860_v30, 7  ;;  %v9415_v55 = vpop.f32.mrb[58].mxu0  ;;  %10148 = vmatprep.subr.bf16.mxu0 %v10969_v21 }
 0x3fc   : > { %v2863_v35 = vpop.f32.mrb[59].mxu0  ;;  %v3721_v13 = vrot.slane %v9415_v55, 7 }
 0x3fd   : > { %v3731_v60 = vsel %vm3727_vm0, %v3718_v16, %v3719_v47  ;;  %v3720_v32 = vrot.slane %v2863_v35, 7  ;;  %v12321_v35 = vld [vmem:[%s13640_s2] ss:$0 sm:$0xff] }
 0x3fe   : > { %v12279_v48 = vadd.f32 %v3731_v60, %v11931_v56  ;;  %10149 = vmatpush3.bf16.msra.mxu0 %v10969_v21 }
 0x3ff   : > { %v3730_v34 = vsel %vm3727_vm0, %v3719_v47, %v3720_v32 }
 0x400   : > { %v12284_v0 = vadd.f32 %v3730_v34, %v11936_v58  ;;  %v10970_v58 = vld [vmem:[%s13642_s4 + $0x1e8] sm:$0xff]  }
 0x401   : > { %v9418_v26 = vpop.f32.mrb[60].mxu0  ;;  %10150 = vmatprep.subr.bf16.mxu0 %v10970_v58 }
 0x402   : > { %v2875_v54 = vpop.f32.mrb[61].mxu0  ;;  %10151 = vmatpush3.bf16.msra.mxu0 %v10970_v58 }
 0x403   : > { %v3722_v37 = vrot.slane %v2875_v54, 7  ;;  %v9419_v23 = vpop.f32.mrb[62].mxu0 }
 0x404   : > { %v3724_v56 = vrot.slane %v9419_v23, 7  ;;  %v2878_v29 = vpop.f32.mrb[63].mxu0 }
 0x405   : > { %v3729_v40 = vsel %vm3727_vm0, %v3721_v13, %v3722_v37  ;;  %v3723_v1 = vrot.slane %v2878_v29, 7 }
 0x406   : > { %v12295_v63 = vadd.f32 %v3729_v40, %v11944_v33  ;;  %v3759_v27 = vsel %vm3727_vm0, %v3724_v56, %v3677_v36  ;;  %v10972_v33 = vld [vmem:[%s13642_s4 + $0x1f0] sm:$0xff]  }
 0x407   : > { %v3760_v24 = vadd.f32 %v3759_v27, %v11745_v9  ;;  %v3728_v59 = vsel %vm3727_vm0, %v3722_v37, %v3723_v1  ;;  %10152 = vmatprep.subr.bf16.mxu0 %v10972_v33 }
 0x408   : > { %v12305_v17 = vadd.f32 %v3728_v59, %v11949_v18  ;;  %10153 = vmatpush3.bf16.msra.mxu0 %v10972_v33  ;;  %v10973_v18 = vld [vmem:[%s13642_s4 + $0x1f8] sm:$0xff]  }
 0x409   : > { %v9518_v51 = vpop.f32.mrb[128].mxu0  ;;  %10154 = vmatprep.subr.bf16.mxu0 %v10973_v18 }
 0x40a   : > { %v3390_v11 = vpop.f32.mrb[129].mxu0  ;;  %v3794_v9 = vrot.slane %v9518_v51, 1 }
 0x40b   : > { %v9519_v31 = vpop.f32.mrb[130].mxu0  ;;  %v3792_v36 = vrot.slane %v3390_v11, 1 }
 0x40c   : > { %v3393_v30 = vpop.f32.mrb[131].mxu0  ;;  %10155 = vmatpush3.bf16.msra.mxu0 %v10973_v18  ;;  %v10959_v31 = vld [vmem:[%s13642_s4 + $0x8] sm:$0xff]  }
 0x40d   : > { %v3793_v16 = vrot.slane %v3393_v30, 1 }
 0x40f   : > { %v3871_v47 = vsel %vm3840_vm1, %v3793_v16, %v3794_v9  ;;  %v3872_v55 = vsel %vm3840_vm1, %v3792_v36, %v3793_v16 }
 0x410   : > { %v3873_v60 = vadd.f32 %v3872_v55, %v3760_v24  ;;  %v3874_v32 = vadd.f32 %v3871_v47, %v12117_v25 }
 0x411   : > { %v9522_v34 = vpop.f32.mrb[132].mxu0 }
 0x412   : > { %v3912_v26 = vmul.f32 %v12321_v35, %v3873_v60  ;;  %v3913_v21 = vmul.f32 %v12321_v35, %v3874_v32  ;;  %v3405_v54 = vpop.f32.mrb[133].mxu0  ;;  %v3797_v29 = vrot.slane %v9522_v34, 1  ;;  %v10960_v32 = vld [vmem:[%s13642_s4 + $0x10] sm:$0xff]  }
 0x413   : > { %v9523_v13 = vpop.f32.mrb[134].mxu0  ;;  %v3795_v25 = vrot.slane %v3405_v54, 1 }
 0x414   : > { %v3951_v37 = vadd.f32 %v12327_v28, %v3912_v26  ;;  %v3952_v23 = vadd.f32 %v12327_v28, %v3913_v21  ;;  %v3408_v56 = vpop.f32.mrb[135].mxu0 }
 0x415   : > { %v3796_v40 = vrot.slane %v3408_v56, 1  ;;  %v10961_v56 = vld [vmem:[%s13642_s4 + $0x18] sm:$0xff]  }
 0x416   : > { %v3983_v1 = vmax.f32 %v3951_v37, 0.0  ;;  %v3984_v58 = vmax.f32 %v3952_v23, 0.0 }
 0x417   : > { %v3869_v27 = vsel %vm3840_vm1, %v3796_v40, %v3797_v29  ;;  %v3870_v24 = vsel %vm3840_vm1, %v3795_v25, %v3796_v40 }
 0x418   : > { %v12337_v59 = vpack.c.bf16 %v3984_v58, %v3983_v1  ;;  %v3875_v51 = vadd.f32 %v3870_v24, %v12122_v20  ;;  %v3876_v33 = vadd.f32 %v3869_v27, %v12129_v6 }
 0x419   : > { %v9526_v11 = vpop.f32.mrb[136].mxu0 }
 0x41a   : > { %v3914_v30 = vmul.f32 %v12321_v35, %v3875_v51  ;;  %v3915_v9 = vmul.f32 %v12321_v35, %v3876_v33  ;;  %v3420_v36 = vpop.f32.mrb[137].mxu0  ;;  %9596 = vmatprep.mubr.bf16.mxu1 %v12337_v59  ;;  %9840 = vmatprep.mubr.bf16.mxu0 %v12337_v59  ;;  %v3800_v47 = vrot.slane %v9526_v11, 1  ;;  %v10962_v33 = vld [vmem:[%s13642_s4 + $0x20] sm:$0xff]  }
 0x41b   : > { %v9527_v16 = vpop.f32.mrb[138].mxu0  ;;  %9597 = vmatmul.mubr.bf16.vlgmr.msra.gmra.mrb[128].mxu1 %v13652_v2  ;;  %9841 = vmatmul.mubr.bf16.gmra.mrb[196].mxu0 %v13652_v2  ;;  %v3798_v55 = vrot.slane %v3420_v36, 1 }
 0x41c   : > { %v3953_v20 = vadd.f32 %v12327_v28, %v3914_v30  ;;  %v3954_v6 = vadd.f32 %v12327_v28, %v3915_v9  ;;  %v3423_v18 = vpop.f32.mrb[139].mxu0  ;;  %9661 = vmatpush3.bf16.msra.mxu1 %v12146_v52 }
 0x41d   : > { %v3799_v60 = vrot.slane %v3423_v18, 1  ;;  %9662 = vmatprep.subr.bf16.mxu1 %v10959_v31  ;;  %v10963_v18 = vld [vmem:[%s13642_s4 + $0x28] sm:$0xff]  }
 0x41e   : > { %v3985_v34 = vmax.f32 %v3953_v20, 0.0  ;;  %v3986_v26 = vmax.f32 %v3954_v6, 0.0 }
 0x41f   : > { %v3867_v21 = vsel %vm3840_vm1, %v3799_v60, %v3800_v47  ;;  %v3868_v54 = vsel %vm3840_vm1, %v3798_v55, %v3799_v60 }
 0x420   : > { %v12360_v13 = vpack.c.bf16 %v3986_v26, %v3985_v34  ;;  %v3877_v52 = vadd.f32 %v3868_v54, %v12134_v14  ;;  %v3878_v37 = vadd.f32 %v3867_v21, %v12141_v38  ;;  %9663 = vmatpush3.bf16.msra.mxu1 %v10959_v31 }
 0x421   : > { %v9530_v23 = vpop.f32.mrb[140].mxu0  ;;  %9664 = vmatprep.subr.bf16.mxu1 %v10960_v32 }
 0x422   : > { %v3916_v29 = vmul.f32 %v12321_v35, %v3877_v52  ;;  %v3917_v25 = vmul.f32 %v12321_v35, %v3878_v37  ;;  %v3435_v40 = vpop.f32.mrb[141].mxu0  ;;  %9600 = vmatprep.mubr.bf16.mxu1 %v12360_v13  ;;  %9844 = vmatprep.mubr.bf16.mxu0 %v12360_v13  ;;  %v3803_v27 = vrot.slane %v9530_v23, 1  ;;  %v10966_v52 = vld [vmem:[%s13642_s4 + $0x30] sm:$0xff]  }
 0x423   : > { %v9531_v1 = vpop.f32.mrb[142].mxu0  ;;  %9601 = vmatmul.mubr.bf16.gmra.mrb[132].mxu1 %v13652_v2  ;;  %9845 = vmatmul.mubr.bf16.gmra.mrb[200].mxu0 %v13652_v2  ;;  %v3801_v24 = vrot.slane %v3435_v40, 1 }
 0x424   : > { %v3955_v14 = vadd.f32 %v12327_v28, %v3916_v29  ;;  %v3956_v38 = vadd.f32 %v12327_v28, %v3917_v25  ;;  %v3438_v58 = vpop.f32.mrb[143].mxu0  ;;  %9665 = vmatpush3.bf16.msra.mxu1 %v10960_v32 }
 0x425   : > { %v3802_v51 = vrot.slane %v3438_v58, 1  ;;  %9666 = vmatprep.subr.bf16.mxu1 %v10961_v56 }
 0x426   : > { %v3987_v11 = vmax.f32 %v3955_v14, 0.0  ;;  %v3988_v31 = vmax.f32 %v3956_v38, 0.0  ;;  %v10971_v38 = vld [vmem:[%s13642_s4 + $0x38] sm:$0xff]  }
 0x427   : > { %v3865_v30 = vsel %vm3840_vm1, %v3802_v51, %v3803_v27  ;;  %v3866_v9 = vsel %vm3840_vm1, %v3801_v24, %v3802_v51 }
 0x428   : > { %v12382_v36 = vpack.c.bf16 %v3988_v31, %v3987_v11  ;;  %v3879_v16 = vadd.f32 %v3866_v9, %v12152_v39  ;;  %v3880_v20 = vadd.f32 %v3865_v30, %v12159_v3  ;;  %9667 = vmatpush3.bf16.msra.mxu1 %v10961_v56  ;;  %v12422_v9 = vld [vmem:[%s13642_s4 + $0x100] sm:$0xff]  }
 0x429   : > { %v9534_v6 = vpop.f32.mrb[144].mxu0  ;;  %9668 = vmatprep.subr.bf16.mxu1 %v10962_v33 }
 0x42a   : > { %v3918_v47 = vmul.f32 %v12321_v35, %v3879_v16  ;;  %v3919_v55 = vmul.f32 %v12321_v35, %v3880_v20  ;;  %v3450_v60 = vpop.f32.mrb[145].mxu0  ;;  %9604 = vmatprep.mubr.bf16.mxu1 %v12382_v36  ;;  %9848 = vmatprep.mubr.bf16.mxu0 %v12382_v36  ;;  %v3806_v26 = vrot.slane %v9534_v6, 1 }
 0x42b   : > { %v9535_v32 = vpop.f32.mrb[146].mxu0  ;;  %9605 = vmatmul.mubr.bf16.gmra.mrb[136].mxu1 %v13652_v2  ;;  %9849 = vmatmul.mubr.bf16.gmra.mrb[204].mxu0 %v13652_v2  ;;  %v3804_v21 = vrot.slane %v3450_v60, 1 }
 0x42c   : > { %v3957_v39 = vadd.f32 %v12327_v28, %v3918_v47  ;;  %v3958_v3 = vadd.f32 %v12327_v28, %v3919_v55  ;;  %v3453_v34 = vpop.f32.mrb[147].mxu0  ;;  %9669 = vmatpush3.bf16.msra.mxu1 %v10962_v33 }
 0x42d   : > { %v3805_v54 = vrot.slane %v3453_v34, 1  ;;  %9670 = vmatprep.subr.bf16.mxu1 %v10963_v18 }
 0x42e   : > { %v3989_v37 = vmax.f32 %v3957_v39, 0.0  ;;  %v3990_v23 = vmax.f32 %v3958_v3, 0.0 }
 0x42f   : > { %v3863_v56 = vsel %vm3840_vm1, %v3805_v54, %v3806_v26  ;;  %v3864_v29 = vsel %vm3840_vm1, %v3804_v21, %v3805_v54 }
 0x430   : > { %v12404_v25 = vpack.c.bf16 %v3990_v23, %v3989_v37  ;;  %v3881_v40 = vadd.f32 %v3864_v29, %v12164_v61  ;;  %v3882_v1 = vadd.f32 %v3863_v56, %v12171_v42  ;;  %9671 = vmatpush3.bf16.msra.mxu1 %v10963_v18 }
 0x431   : > { %v9538_v14 = vpop.f32.mrb[148].mxu0  ;;  %9672 = vmatprep.subr.bf16.mxu1 %v10966_v52 }
 0x432   : > { %v3920_v58 = vmul.f32 %v12321_v35, %v3881_v40  ;;  %v3921_v27 = vmul.f32 %v12321_v35, %v3882_v1  ;;  %v3465_v24 = vpop.f32.mrb[149].mxu0  ;;  %9608 = vmatprep.mubr.bf16.mxu1 %v12404_v25  ;;  %9852 = vmatprep.mubr.bf16.mxu0 %v12404_v25  ;;  %v3809_v11 = vrot.slane %v9538_v14, 1 }
 0x433   : > { %v9539_v51 = vpop.f32.mrb[150].mxu0  ;;  %9609 = vmatmul.mubr.bf16.gmra.mrb[140].mxu1 %v13652_v2  ;;  %9853 = vmatmul.mubr.bf16.gmra.mrb[208].mxu0 %v13652_v2  ;;  %v3807_v31 = vrot.slane %v3465_v24, 1 }
 0x434   : > { %v3959_v61 = vadd.f32 %v12327_v28, %v3920_v58  ;;  %v3960_v42 = vadd.f32 %v12327_v28, %v3921_v27  ;;  %v3468_v33 = vpop.f32.mrb[151].mxu0  ;;  %9673 = vmatpush3.bf16.msra.mxu1 %v10966_v52 }
 0x435   : > { %v3808_v30 = vrot.slane %v3468_v33, 1  ;;  %9674 = vmatprep.subr.bf16.mxu1 %v10971_v38 }
 0x436   : > { %v3991_v16 = vmax.f32 %v3959_v61, 0.0  ;;  %v3992_v20 = vmax.f32 %v3960_v42, 0.0 }
 0x437   : > { %v3861_v6 = vsel %vm3840_vm1, %v3808_v30, %v3809_v11  ;;  %v3862_v18 = vsel %vm3840_vm1, %v3807_v31, %v3808_v30 }
 0x438   : > { %v12428_v47 = vpack.c.bf16 %v3992_v20, %v3991_v16  ;;  %v3883_v55 = vadd.f32 %v3862_v18, %v12176_v22  ;;  %v3884_v60 = vadd.f32 %v3861_v6, %v12182_v19  ;;  %9675 = vmatpush3.bf16.msra.mxu1 %v10971_v38 }
 0x439   : > { %v9542_v32 = vpop.f32.mrb[152].mxu0  ;;  %9740 = vmatprep.subr.bf16.mxu1 %v12422_v9 }
 0x43a   : > { %13709 = vst [vmem:[#allocation20_spill] sm:$0xff] %v12428_v47  ;;  %v3922_v39 = vmul.f32 %v12321_v35, %v3883_v55  ;;  %v3923_v3 = vmul.f32 %v12321_v35, %v3884_v60  ;;  %v3480_v34 = vpop.f32.mrb[153].mxu0  ;;  %9612 = vmatprep.mubr.bf16.mxu1 %v12428_v47  ;;  %9856 = vmatprep.mubr.bf16.mxu0 %v12428_v47  ;;  %v3812_v54 = vrot.slane %v9542_v32, 1 }
 0x43b   : > { %v9543_v26 = vpop.f32.mrb[154].mxu0  ;;  %9613 = vmatmul.mubr.bf16.gmra.mrb[144].mxu1 %v13652_v2  ;;  %9857 = vmatmul.mubr.bf16.gmra.mrb[212].mxu0 %v13652_v2  ;;  %v3810_v52 = vrot.slane %v3480_v34, 1 }
 0x43c   : > { %v3961_v22 = vadd.f32 %v12327_v28, %v3922_v39  ;;  %v3962_v19 = vadd.f32 %v12327_v28, %v3923_v3  ;;  %v3483_v21 = vpop.f32.mrb[155].mxu0 }
 0x43d   : > { %v3811_v37 = vrot.slane %v3483_v21, 1 }
 0x43e   : > { %v3993_v23 = vmax.f32 %v3961_v22, 0.0  ;;  %v3994_v56 = vmax.f32 %v3962_v19, 0.0 }
 0x43f   : > { %v3859_v29 = vsel %vm3840_vm1, %v3811_v37, %v3812_v54  ;;  %v3860_v40 = vsel %vm3840_vm1, %v3810_v52, %v3811_v37 }
 0x440   : > { %v12445_v1 = vpack.c.bf16 %v3994_v56, %v3993_v23  ;;  %v3885_v14 = vadd.f32 %v3860_v40, %v12187_v53  ;;  %v3886_v38 = vadd.f32 %v3859_v29, %v12192_v62 }
 0x441   : > { %v9546_v58 = vpop.f32.mrb[156].mxu0 }
 0x442   : > { %13710 = vst [vmem:[#allocation7_spill] sm:$0xff] %v12445_v1  ;;  %v3924_v27 = vmul.f32 %v12321_v35, %v3885_v14  ;;  %v3925_v24 = vmul.f32 %v12321_v35, %v3886_v38  ;;  %v3495_v51 = vpop.f32.mrb[157].mxu0  ;;  %9616 = vmatprep.mubr.bf16.mxu1 %v12445_v1  ;;  %9860 = vmatprep.mubr.bf16.mxu0 %v12445_v1  ;;  %v3815_v33 = vrot.slane %v9546_v58, 1 }
 0x443   : > { %v9547_v61 = vpop.f32.mrb[158].mxu0  ;;  %9617 = vmatmul.mubr.bf16.gmra.mrb[148].mxu1 %v13652_v2  ;;  %9861 = vmatmul.mubr.bf16.gmra.mrb[216].mxu0 %v13652_v2  ;;  %v3813_v11 = vrot.slane %v3495_v51, 1 }
 0x444   : > { %v3963_v42 = vadd.f32 %v12327_v28, %v3924_v27  ;;  %v3964_v53 = vadd.f32 %v12327_v28, %v3925_v24  ;;  %v3498_v62 = vpop.f32.mrb[159].mxu0 }
 0x445   : > { %v3814_v31 = vrot.slane %v3498_v62, 1 }
 0x446   : > { %v3995_v30 = vmax.f32 %v3963_v42, 0.0  ;;  %v3996_v16 = vmax.f32 %v3964_v53, 0.0 }
 0x447   : > { %v3857_v20 = vsel %vm3840_vm1, %v3814_v31, %v3815_v33  ;;  %v3858_v6 = vsel %vm3840_vm1, %v3813_v11, %v3814_v31 }
 0x448   : > { %v12461_v18 = vpack.c.bf16 %v3996_v16, %v3995_v30  ;;  %v3887_v55 = vadd.f32 %v3858_v6, %v12197_v45  ;;  %v3888_v60 = vadd.f32 %v3857_v20, %v12202_v8 }
 0x449   : > { %v9550_v32 = vpop.f32.mrb[160].mxu0 }
 0x44a   : > { %13711 = vst [vmem:[#allocation21_spill] sm:$0xff] %v12461_v18  ;;  %v3926_v39 = vmul.f32 %v12321_v35, %v3887_v55  ;;  %v3927_v3 = vmul.f32 %v12321_v35, %v3888_v60  ;;  %v3510_v34 = vpop.f32.mrb[161].mxu0  ;;  %9620 = vmatprep.mubr.bf16.mxu1 %v12461_v18  ;;  %9864 = vmatprep.mubr.bf16.mxu0 %v12461_v18  ;;  %v3818_v19 = vrot.slane %v9550_v32, 1 }
 0x44b   : > { %v9551_v26 = vpop.f32.mrb[162].mxu0  ;;  %9621 = vmatmul.mubr.bf16.gmra.mrb[152].mxu1 %v13652_v2  ;;  %9865 = vmatmul.mubr.bf16.gmra.mrb[220].mxu0 %v13652_v2  ;;  %v3816_v21 = vrot.slane %v3510_v34, 1 }
 0x44c   : > { %v3965_v22 = vadd.f32 %v12327_v28, %v3926_v39  ;;  %v3966_v45 = vadd.f32 %v12327_v28, %v3927_v3  ;;  %v3513_v8 = vpop.f32.mrb[163].mxu0 }
 0x44d   : > { %v3817_v54 = vrot.slane %v3513_v8, 1 }
 0x44e   : > { %v3997_v52 = vmax.f32 %v3965_v22, 0.0  ;;  %v3998_v37 = vmax.f32 %v3966_v45, 0.0 }
 0x44f   : > { %v3855_v23 = vsel %vm3840_vm1, %v3817_v54, %v3818_v19  ;;  %v3856_v56 = vsel %vm3840_vm1, %v3816_v21, %v3817_v54 }
 0x450   : > { %v12477_v29 = vpack.c.bf16 %v3998_v37, %v3997_v52  ;;  %v3889_v40 = vadd.f32 %v3856_v56, %v12207_v10  ;;  %v3890_v14 = vadd.f32 %v3855_v23, %v12212_v44 }
 0x451   : > { %v9554_v38 = vpop.f32.mrb[164].mxu0 }
 0x452   : > { %13712 = vst [vmem:[#allocation18_spill] sm:$0xff] %v12477_v29  ;;  %v3928_v58 = vmul.f32 %v12321_v35, %v3889_v40  ;;  %v3929_v27 = vmul.f32 %v12321_v35, %v3890_v14  ;;  %v3525_v24 = vpop.f32.mrb[165].mxu0  ;;  %9624 = vmatprep.mubr.bf16.mxu1 %v12477_v29  ;;  %9868 = vmatprep.mubr.bf16.mxu0 %v12477_v29  ;;  %v3821_v42 = vrot.slane %v9554_v38, 1 }
 0x453   : > { %v9555_v51 = vpop.f32.mrb[166].mxu0  ;;  %9625 = vmatmul.mubr.bf16.gmra.mrb[156].mxu1 %v13652_v2  ;;  %9869 = vmatmul.mubr.bf16.gmra.mrb[224].mxu0 %v13652_v2  ;;  %v3819_v53 = vrot.slane %v3525_v24, 1 }
 0x454   : > { %v3967_v61 = vadd.f32 %v12327_v28, %v3928_v58  ;;  %v3968_v10 = vadd.f32 %v12327_v28, %v3929_v27  ;;  %v3528_v44 = vpop.f32.mrb[167].mxu0 }
 0x455   : > { %v3820_v62 = vrot.slane %v3528_v44, 1 }
 0x456   : > { %v3999_v33 = vmax.f32 %v3967_v61, 0.0  ;;  %v4000_v11 = vmax.f32 %v3968_v10, 0.0 }
 0x457   : > { %v3853_v31 = vsel %vm3840_vm1, %v3820_v62, %v3821_v42  ;;  %v3854_v30 = vsel %vm3840_vm1, %v3819_v53, %v3820_v62 }
 0x458   : > { %v12493_v16 = vpack.c.bf16 %v4000_v11, %v3999_v33  ;;  %v3891_v20 = vadd.f32 %v3854_v30, %v12217_v57  ;;  %v3892_v6 = vadd.f32 %v3853_v31, %v12222_v12 }
 0x459   : > { %v9558_v55 = vpop.f32.mrb[168].mxu0 }
 0x45a   : > { %13713 = vst [vmem:[#allocation8_spill] sm:$0xff] %v12493_v16  ;;  %v3930_v60 = vmul.f32 %v12321_v35, %v3891_v20  ;;  %v3931_v32 = vmul.f32 %v12321_v35, %v3892_v6  ;;  %v3540_v39 = vpop.f32.mrb[169].mxu0  ;;  %9628 = vmatprep.mubr.bf16.mxu1 %v12493_v16  ;;  %9872 = vmatprep.mubr.bf16.mxu0 %v12493_v16  ;;  %v3824_v26 = vrot.slane %v9558_v55, 1 }
 0x45b   : > { %v9559_v3 = vpop.f32.mrb[170].mxu0  ;;  %9629 = vmatmul.mubr.bf16.gmra.mrb[160].mxu1 %v13652_v2  ;;  %9873 = vmatmul.mubr.bf16.gmra.mrb[228].mxu0 %v13652_v2  ;;  %v3822_v22 = vrot.slane %v3540_v39, 1 }
 0x45c   : > { %v3969_v34 = vadd.f32 %v12327_v28, %v3930_v60  ;;  %v3970_v57 = vadd.f32 %v12327_v28, %v3931_v32  ;;  %v3543_v12 = vpop.f32.mrb[171].mxu0 }
 0x45d   : > { %v3823_v45 = vrot.slane %v3543_v12, 1 }
 0x45e   : > { %v4001_v8 = vmax.f32 %v3969_v34, 0.0  ;;  %v4002_v19 = vmax.f32 %v3970_v57, 0.0 }
 0x45f   : > { %v3851_v21 = vsel %vm3840_vm1, %v3823_v45, %v3824_v26  ;;  %v3852_v54 = vsel %vm3840_vm1, %v3822_v22, %v3823_v45 }
 0x460   : > { %v12509_v52 = vpack.c.bf16 %v4002_v19, %v4001_v8  ;;  %v3893_v37 = vadd.f32 %v3852_v54, %v12227_v50  ;;  %v3894_v23 = vadd.f32 %v3851_v21, %v12232_v5 }
 0x461   : > { %v9562_v56 = vpop.f32.mrb[172].mxu0 }
 0x462   : > { %13714 = vst [vmem:[#allocation9_spill] sm:$0xff] %v12509_v52  ;;  %v3932_v40 = vmul.f32 %v12321_v35, %v3893_v37  ;;  %v3933_v14 = vmul.f32 %v12321_v35, %v3894_v23  ;;  %v3555_v38 = vpop.f32.mrb[173].mxu0  ;;  %9632 = vmatprep.mubr.bf16.mxu1 %v12509_v52  ;;  %9876 = vmatprep.mubr.bf16.mxu0 %v12509_v52  ;;  %v3827_v24 = vrot.slane %v9562_v56, 1 }
 0x463   : > { %v9563_v58 = vpop.f32.mrb[174].mxu0  ;;  %9633 = vmatmul.mubr.bf16.gmra.mrb[164].mxu1 %v13652_v2  ;;  %9877 = vmatmul.mubr.bf16.gmra.mrb[232].mxu0 %v13652_v2  ;;  %v3825_v51 = vrot.slane %v3555_v38, 1 }
 0x464   : > { %v3971_v27 = vadd.f32 %v12327_v28, %v3932_v40  ;;  %v3972_v50 = vadd.f32 %v12327_v28, %v3933_v14  ;;  %v3558_v5 = vpop.f32.mrb[175].mxu0 }
 0x465   : > { %v3826_v61 = vrot.slane %v3558_v5, 1 }
 0x466   : > { %v4003_v10 = vmax.f32 %v3971_v27, 0.0  ;;  %v4004_v44 = vmax.f32 %v3972_v50, 0.0 }
 0x467   : > { %v3849_v42 = vsel %vm3840_vm1, %v3826_v61, %v3827_v24  ;;  %v3850_v53 = vsel %vm3840_vm1, %v3825_v51, %v3826_v61 }
 0x468   : > { %v12525_v62 = vpack.c.bf16 %v4004_v44, %v4003_v10  ;;  %v3895_v33 = vadd.f32 %v3850_v53, %v12237_v7  ;;  %v3896_v11 = vadd.f32 %v3849_v42, %v12242_v46 }
 0x469   : > { %v9566_v31 = vpop.f32.mrb[176].mxu0 }
 0x46a   : > { %13715 = vst [vmem:[#allocation22_spill] sm:$0xff] %v12525_v62  ;;  %v3934_v30 = vmul.f32 %v12321_v35, %v3895_v33  ;;  %v3935_v20 = vmul.f32 %v12321_v35, %v3896_v11  ;;  %v3570_v6 = vpop.f32.mrb[177].mxu0  ;;  %9636 = vmatprep.mubr.bf16.mxu1 %v12525_v62  ;;  %9880 = vmatprep.mubr.bf16.mxu0 %v12525_v62  ;;  %v3830_v32 = vrot.slane %v9566_v31, 1 }
 0x46b   : > { %v9567_v55 = vpop.f32.mrb[178].mxu0  ;;  %9637 = vmatmul.mubr.bf16.gmra.mrb[168].mxu1 %v13652_v2  ;;  %9881 = vmatmul.mubr.bf16.gmra.mrb[236].mxu0 %v13652_v2  ;;  %v3828_v39 = vrot.slane %v3570_v6, 1 }
 0x46c   : > { %v3973_v60 = vadd.f32 %v12327_v28, %v3934_v30  ;;  %v3974_v7 = vadd.f32 %v12327_v28, %v3935_v20  ;;  %v3573_v46 = vpop.f32.mrb[179].mxu0 }
 0x46d   : > { %v3829_v3 = vrot.slane %v3573_v46, 1 }
 0x46e   : > { %v4005_v34 = vmax.f32 %v3973_v60, 0.0  ;;  %v4006_v57 = vmax.f32 %v3974_v7, 0.0 }
 0x46f   : > { %v3847_v12 = vsel %vm3840_vm1, %v3829_v3, %v3830_v32  ;;  %v3848_v26 = vsel %vm3840_vm1, %v3828_v39, %v3829_v3 }
 0x470   : > { %v12541_v22 = vpack.c.bf16 %v4006_v57, %v4005_v34  ;;  %v3897_v45 = vadd.f32 %v3848_v26, %v12247_v49  ;;  %v3898_v8 = vadd.f32 %v3847_v12, %v12252_v15 }
 0x471   : > { %v9570_v19 = vpop.f32.mrb[180].mxu0 }
 0x472   : > { %13716 = vst [vmem:[#allocation19_spill] sm:$0xff] %v12541_v22  ;;  %v3936_v21 = vmul.f32 %v12321_v35, %v3897_v45  ;;  %v3937_v54 = vmul.f32 %v12321_v35, %v3898_v8  ;;  %v3585_v37 = vpop.f32.mrb[181].mxu0  ;;  %9640 = vmatprep.mubr.bf16.mxu1 %v12541_v22  ;;  %9884 = vmatprep.mubr.bf16.mxu0 %v12541_v22  ;;  %v3833_v40 = vrot.slane %v9570_v19, 1 }
 0x473   : > { %v9571_v23 = vpop.f32.mrb[182].mxu0  ;;  %9641 = vmatmul.mubr.bf16.gmra.mrb[172].mxu1 %v13652_v2  ;;  %9885 = vmatmul.mubr.bf16.gmra.mrb[240].mxu0 %v13652_v2  ;;  %v3831_v14 = vrot.slane %v3585_v37, 1 }
 0x474   : > { %v3975_v56 = vadd.f32 %v12327_v28, %v3936_v21  ;;  %v3976_v49 = vadd.f32 %v12327_v28, %v3937_v54  ;;  %v3588_v15 = vpop.f32.mrb[183].mxu0 }
 0x475   : > { %v3832_v38 = vrot.slane %v3588_v15, 1 }
 0x476   : > { %v4007_v58 = vmax.f32 %v3975_v56, 0.0  ;;  %v4008_v27 = vmax.f32 %v3976_v49, 0.0 }
 0x477   : > { %v3845_v50 = vsel %vm3840_vm1, %v3832_v38, %v3833_v40  ;;  %v3846_v5 = vsel %vm3840_vm1, %v3831_v14, %v3832_v38 }
 0x478   : > { %v12557_v24 = vpack.c.bf16 %v4008_v27, %v4007_v58  ;;  %v3899_v51 = vadd.f32 %v3846_v5, %v12263_v4  ;;  %v3900_v61 = vadd.f32 %v3845_v50, %v12268_v41 }
 0x479   : > { %v9574_v10 = vpop.f32.mrb[184].mxu0 }
 0x47a   : > { %v3938_v44 = vmul.f32 %v12321_v35, %v3899_v51  ;;  %v3939_v42 = vmul.f32 %v12321_v35, %v3900_v61  ;;  %v3600_v53 = vpop.f32.mrb[185].mxu0  ;;  %9644 = vmatprep.mubr.bf16.mxu1 %v12557_v24  ;;  %9888 = vmatprep.mubr.bf16.mxu0 %v12557_v24  ;;  %v3836_v31 = vrot.slane %v9574_v10, 1  ;;  %v10977_v51 = vld [vmem:[%s13642_s4 + $0x118] sm:$0xff]   ;;  %v10979_v61 = vld [vmem:[%s13642_s4 + $0x128] sm:$0xff]   ;;  %v10980_v10 = vld [vmem:[%s13642_s4 + $0x130] sm:$0xff]  }
 0x47b   : > { %v9575_v33 = vpop.f32.mrb[186].mxu0  ;;  %9645 = vmatmul.mubr.bf16.gmra.mrb[176].mxu1 %v13652_v2  ;;  %9889 = vmatmul.mubr.bf16.gmra.mrb[244].mxu0 %v13652_v2  ;;  %v3834_v30 = vrot.slane %v3600_v53, 1  ;;  %v10983_v53 = vld [vmem:[%s13642_s4 + $0x148] sm:$0xff]  }
 0x47c   : > { %v3977_v11 = vadd.f32 %v12327_v28, %v3938_v44  ;;  %v3978_v4 = vadd.f32 %v12327_v28, %v3939_v42  ;;  %v3603_v41 = vpop.f32.mrb[187].mxu0  ;;  %v10981_v44 = vld [vmem:[%s13642_s4 + $0x138] sm:$0xff]   ;;  %v10982_v42 = vld [vmem:[%s13642_s4 + $0x140] sm:$0xff]   ;;  %v10984_v33 = vld [vmem:[%s13642_s4 + $0x150] sm:$0xff]  }
 0x47d   : > { %v3835_v20 = vrot.slane %v3603_v41, 1  ;;  %v10987_v41 = vld [vmem:[%s13642_s4 + $0x168] sm:$0xff]  }
 0x47e   : > { %v4009_v6 = vmax.f32 %v3977_v11, 0.0  ;;  %v4010_v55 = vmax.f32 %v3978_v4, 0.0  ;;  %v10985_v11 = vld [vmem:[%s13642_s4 + $0x158] sm:$0xff]   ;;  %v10986_v4 = vld [vmem:[%s13642_s4 + $0x160] sm:$0xff]  }
 0x47f   : > { %v3843_v60 = vsel %vm3840_vm1, %v3835_v20, %v3836_v31  ;;  %v3844_v7 = vsel %vm3840_vm1, %v3834_v30, %v3835_v20  ;;  %v10988_v30 = vld [vmem:[%s13642_s4 + $0x170] sm:$0xff]  }
 0x480   : > { %v12573_v46 = vpack.c.bf16 %v4010_v55, %v4009_v6  ;;  %v3901_v32 = vadd.f32 %v3844_v7, %v12279_v48  ;;  %v3902_v39 = vadd.f32 %v3843_v60, %v12284_v0  ;;  %v10989_v60 = vld [vmem:[%s13642_s4 + $0x178] sm:$0xff]  }
 0x481   : > { %v9578_v3 = vpop.f32.mrb[188].mxu0 }
 0x482   : > { %v3940_v34 = vmul.f32 %v12321_v35, %v3901_v32  ;;  %v3941_v57 = vmul.f32 %v12321_v35, %v3902_v39  ;;  %v3615_v12 = vpop.f32.mrb[189].mxu0  ;;  %9648 = vmatprep.mubr.bf16.mxu1 %v12573_v46  ;;  %9892 = vmatprep.mubr.bf16.mxu0 %v12573_v46  ;;  %v3839_v8 = vrot.slane %v9578_v3, 1  ;;  %v12733_v32 = vld [vmem:[%s13642_s4 + $0x80] sm:$0xff]  }
 0x483   : > { %v9579_v26 = vpop.f32.mrb[190].mxu0  ;;  %9649 = vmatmul.mubr.bf16.gmra.mrb[180].mxu1 %v13652_v2  ;;  %9893 = vmatmul.mubr.bf16.gmra.mrb[248].mxu0 %v13652_v2  ;;  %v3837_v19 = vrot.slane %v3615_v12, 1 }
 0x484   : > { %v3979_v45 = vadd.f32 %v12327_v28, %v3940_v34  ;;  %v3980_v48 = vadd.f32 %v12327_v28, %v3941_v57  ;;  %v3618_v0 = vpop.f32.mrb[191].mxu0 }
 0x485   : > { %v3838_v21 = vrot.slane %v3618_v0, 1 }
 0x486   : > { %v4011_v54 = vmax.f32 %v3979_v45, 0.0  ;;  %v4012_v37 = vmax.f32 %v3980_v48, 0.0 }
 0x487   : > { %v3841_v23 = vsel %vm3840_vm1, %v3838_v21, %v3839_v8  ;;  %v3842_v56 = vsel %vm3840_vm1, %v3837_v19, %v3838_v21 }
 0x488   : > { %v12589_v49 = vpack.c.bf16 %v4012_v37, %v4011_v54  ;;  %v3903_v15 = vadd.f32 %v3842_v56, %v12295_v63  ;;  %v3904_v40 = vadd.f32 %v3841_v23, %v12305_v17 }
 0x489   : > { %v9838_v14 = vpop.f32.mrb[192].mxu0 }
 0x48a   : > { %v3942_v38 = vmul.f32 %v12321_v35, %v3903_v15  ;;  %v3943_v58 = vmul.f32 %v12321_v35, %v3904_v40  ;;  %9652 = vmatprep.mubr.bf16.mxu1 %v12589_v49  ;;  %9896 = vmatprep.mubr.bf16.mxu0 %v12589_v49  ;;  %v10975_v35 = vld [vmem:[%s13642_s4 + $0x108] sm:$0xff]   ;;  %v12716_v31 = vpop.f32.mrb[193].mxu0 }
 0x48b   : > { %9653 = vmatmul.mubr.bf16.gmra.mrb[184].mxu1 %v13652_v2  ;;  %9897 = vmatmul.mubr.bf16.gmra.mrb[252].mxu0 %v13652_v2  ;;  %v9839_v20 = vpop.f32.mrb[194].mxu0 }
 0x48c   : > { %v3981_v27 = vadd.f32 %v12327_v28, %v3942_v38  ;;  %v3982_v50 = vadd.f32 %v12327_v28, %v3943_v58  ;;  %10156 = vmatprep.mubr.bf16.mxu0 %v12360_v13  ;;  %v10976_v28 = vld [vmem:[%s13642_s4 + $0x110] sm:$0xff]   ;;  %v12721_v6 = vpop.f32.mrb[195].mxu0 }
 0x48e   : > { %v4013_v63 = vmax.f32 %v3981_v27, 0.0  ;;  %v4014_v17 = vmax.f32 %v3982_v50, 0.0 }
 0x490   : > { %v12602_v5 = vpack.c.bf16 %v4014_v17, %v4013_v63 }
 0x492   : > { %9656 = vmatprep.mubr.bf16.mxu1 %v12602_v5 }
 0x493   : > { %9657 = vmatmul.mubr.bf16.gmra.mrb[188].mxu1 %v13652_v2  ;;  %10157 = vmatmul.mubr.bf16.vlgmr.msra.gmra.mrb[64].mxu0 %v13652_v2 }
 0x494   : > { %10160 = vmatprep.mubr.bf16.mxu0 %v12382_v36  ;;  %9676 = vmatprep.mubr.bf16.mxu1 %v13652_v2 }
 0x49b   : > { %9677 = vmatmul.mubr.bf16.vlgmr.msra.gmra.mrb[128].mxu1 %v13652_v2  ;;  %10161 = vmatmul.mubr.bf16.gmra.mrb[68].mxu0 %v13652_v2 }
 0x49c   : > { %9680 = vmatprep.mubr.bf16.mxu1 %v12337_v59  ;;  %9741 = vmatpush3.bf16.msra.mxu1 %v12422_v9  ;;  %v10978_v9 = vld [vmem:[%s13642_s4 + $0x120] sm:$0xff]  }
 0x49d   : > { %10164 = vmatprep.mubr.bf16.mxu0 %v12404_v25  ;;  %9742 = vmatprep.subr.bf16.mxu1 %v10975_v35 }
 0x4a0   : > { %9743 = vmatpush3.bf16.msra.mxu1 %v10975_v35 }
 0x4a1   : > { %9744 = vmatprep.subr.bf16.mxu1 %v10976_v28 }
 0x4a3   : > { %9681 = vmatmul.mubr.bf16.gmra.mrb[132].mxu1 %v13652_v2  ;;  %10165 = vmatmul.mubr.bf16.gmra.mrb[72].mxu0 %v13652_v2 }
 0x4a4   : > { %9684 = vmatprep.mubr.bf16.mxu1 %v12360_v13  ;;  %10168 = vmatprep.mubr.bf16.mxu0 %v12428_v47 }
 0x4a5   : > { %9745 = vmatpush3.bf16.msra.mxu1 %v10976_v28 }
 0x4a6   : > { %9746 = vmatprep.subr.bf16.mxu1 %v10977_v51 }
 0x4a9   : > { %9747 = vmatpush3.bf16.msra.mxu1 %v10977_v51 }
 0x4aa   : > { %9748 = vmatprep.subr.bf16.mxu1 %v10978_v9 }
 0x4ab   : > { %9685 = vmatmul.mubr.bf16.gmra.mrb[136].mxu1 %v13652_v2  ;;  %10169 = vmatmul.mubr.bf16.gmra.mrb[76].mxu0 %v13652_v2 }
 0x4ac   : > { %9688 = vmatprep.mubr.bf16.mxu1 %v12382_v36  ;;  %10172 = vmatprep.mubr.bf16.mxu0 %v12445_v1 }
 0x4ad   : > { %9749 = vmatpush3.bf16.msra.mxu1 %v10978_v9 }
 0x4ae   : > { %9750 = vmatprep.subr.bf16.mxu1 %v10979_v61 }
 0x4b1   : > { %9751 = vmatpush3.bf16.msra.mxu1 %v10979_v61 }
 0x4b2   : > { %9752 = vmatprep.subr.bf16.mxu1 %v10980_v10 }
 0x4b3   : > { %9689 = vmatmul.mubr.bf16.gmra.mrb[140].mxu1 %v13652_v2  ;;  %10173 = vmatmul.mubr.bf16.gmra.mrb[80].mxu0 %v13652_v2 }
 0x4b4   : > { %9692 = vmatprep.mubr.bf16.mxu1 %v12404_v25  ;;  %10176 = vmatprep.mubr.bf16.mxu0 %v12461_v18 }
 0x4b5   : > { %9753 = vmatpush3.bf16.msra.mxu1 %v10980_v10 }
 0x4b6   : > { %9754 = vmatprep.subr.bf16.mxu1 %v10981_v44 }
 0x4b9   : > { %9755 = vmatpush3.bf16.msra.mxu1 %v10981_v44 }
 0x4ba   : > { %9900 = vmatprep.subr.bf16.mxu1 %v10982_v42 }
 0x4bb   : > { %9693 = vmatmul.mubr.bf16.gmra.mrb[144].mxu1 %v13652_v2  ;;  %10177 = vmatmul.mubr.bf16.gmra.mrb[84].mxu0 %v13652_v2 }
 0x4bc   : > { %9696 = vmatprep.mubr.bf16.mxu1 %v12428_v47  ;;  %10180 = vmatprep.mubr.bf16.mxu0 %v12477_v29 }
 0x4c3   : > { %9697 = vmatmul.mubr.bf16.gmra.mrb[148].mxu1 %v13652_v2  ;;  %10181 = vmatmul.mubr.bf16.gmra.mrb[88].mxu0 %v13652_v2 }
 0x4c4   : > { %9700 = vmatprep.mubr.bf16.mxu1 %v12445_v1  ;;  %10184 = vmatprep.mubr.bf16.mxu0 %v12493_v16 }
 0x4cb   : > { %9701 = vmatmul.mubr.bf16.gmra.mrb[152].mxu1 %v13652_v2  ;;  %10185 = vmatmul.mubr.bf16.gmra.mrb[92].mxu0 %v13652_v2 }
 0x4cc   : > { %9704 = vmatprep.mubr.bf16.mxu1 %v12461_v18  ;;  %10188 = vmatprep.mubr.bf16.mxu0 %v12509_v52 }
 0x4d3   : > { %9705 = vmatmul.mubr.bf16.gmra.mrb[156].mxu1 %v13652_v2  ;;  %10189 = vmatmul.mubr.bf16.gmra.mrb[96].mxu0 %v13652_v2 }
 0x4d4   : > { %9708 = vmatprep.mubr.bf16.mxu1 %v12477_v29  ;;  %10192 = vmatprep.mubr.bf16.mxu0 %v12525_v62 }
 0x4db   : > { %9709 = vmatmul.mubr.bf16.gmra.mrb[160].mxu1 %v13652_v2  ;;  %10193 = vmatmul.mubr.bf16.gmra.mrb[100].mxu0 %v13652_v2 }
 0x4dc   : > { %9712 = vmatprep.mubr.bf16.mxu1 %v12493_v16  ;;  %10196 = vmatprep.mubr.bf16.mxu0 %v12541_v22 }
 0x4e3   : > { %9713 = vmatmul.mubr.bf16.gmra.mrb[164].mxu1 %v13652_v2  ;;  %10197 = vmatmul.mubr.bf16.gmra.mrb[104].mxu0 %v13652_v2 }
 0x4e4   : > { %9716 = vmatprep.mubr.bf16.mxu1 %v12509_v52  ;;  %10200 = vmatprep.mubr.bf16.mxu0 %v12557_v24 }
 0x4eb   : > { %9717 = vmatmul.mubr.bf16.gmra.mrb[168].mxu1 %v13652_v2  ;;  %10201 = vmatmul.mubr.bf16.gmra.mrb[108].mxu0 %v13652_v2 }
 0x4ec   : > { %9720 = vmatprep.mubr.bf16.mxu1 %v12525_v62  ;;  %10204 = vmatprep.mubr.bf16.mxu0 %v12573_v46 }
 0x4ee   : > { %v9842_v55 = vpop.f32.mrb[196].mxu0 }
 0x4ef   : > { %v12728_v7 = vpop.f32.mrb[197].mxu0 }
 0x4f0   : > { %v9843_v39 = vpop.f32.mrb[198].mxu0 }
 0x4f1   : > { %v12735_v3 = vpop.f32.mrb[199].mxu0 }
 0x4f3   : > { %9721 = vmatmul.mubr.bf16.gmra.mrb[172].mxu1 %v13652_v2  ;;  %10205 = vmatmul.mubr.bf16.gmra.mrb[112].mxu0 %v13652_v2 }
 0x4f4   : > { %9724 = vmatprep.mubr.bf16.mxu1 %v12541_v22  ;;  %10208 = vmatprep.mubr.bf16.mxu0 %v12589_v49 }
 0x4f6   : > { %v9846_v34 = vpop.f32.mrb[200].mxu0 }
 0x4f7   : > { %v12737_v57 = vpop.f32.mrb[201].mxu0 }
 0x4f8   : > { %v9847_v12 = vpop.f32.mrb[202].mxu0 }
 0x4f9   : > { %v12740_v26 = vpop.f32.mrb[203].mxu0 }
 0x4fb   : > { %9725 = vmatmul.mubr.bf16.gmra.mrb[176].mxu1 %v13652_v2  ;;  %10209 = vmatmul.mubr.bf16.gmra.mrb[116].mxu0 %v13652_v2 }
 0x4fc   : > { %9728 = vmatprep.mubr.bf16.mxu1 %v12557_v24  ;;  %10212 = vmatprep.mubr.bf16.mxu0 %v12602_v5 }
 0x4fe   : > { %v9850_v45 = vpop.f32.mrb[204].mxu0 }
 0x4ff   : > { %v12744_v48 = vpop.f32.mrb[205].mxu0 }
 0x500   : > { %v9851_v0 = vpop.f32.mrb[206].mxu0 }
 0x501   : > { %v12746_v8 = vpop.f32.mrb[207].mxu0 }
 0x503   : > { %9729 = vmatmul.mubr.bf16.gmra.mrb[180].mxu1 %v13652_v2  ;;  %10213 = vmatmul.mubr.bf16.gmra.mrb[120].mxu0 %v13652_v2 }
 0x504   : > { %9732 = vmatprep.mubr.bf16.mxu1 %v12573_v46  ;;  %10216 = vmatprep.mubr.bf16.mxu0 %v13652_v2 }
 0x506   : > { %v9854_v19 = vpop.f32.mrb[208].mxu0 }
 0x507   : > { %v12748_v21 = vpop.f32.mrb[209].mxu0 }
 0x508   : > { %v9855_v54 = vpop.f32.mrb[210].mxu0 }
 0x509   : > { %v12750_v37 = vpop.f32.mrb[211].mxu0 }
 0x50b   : > { %9733 = vmatmul.mubr.bf16.gmra.mrb[184].mxu1 %v13652_v2  ;;  %10217 = vmatmul.mubr.bf16.gmra.mrb[124].mxu0 %v13652_v2 }
 0x50c   : > { %9736 = vmatprep.mubr.bf16.mxu1 %v12589_v49 }
 0x50e   : > { %v9858_v23 = vpop.f32.mrb[212].mxu0 }
 0x50f   : > { %v12754_v56 = vpop.f32.mrb[213].mxu0 }
 0x510   : > { %v9859_v15 = vpop.f32.mrb[214].mxu0 }
 0x511   : > { %v12756_v40 = vpop.f32.mrb[215].mxu0 }
 0x513   : > { %9737 = vmatmul.mubr.bf16.gmra.mrb[188].mxu1 %v13652_v2 }
 0x514   : > { %9756 = vmatprep.mubr.bf16.mxu1 %v12337_v59 }
 0x516   : > { %v9862_v14 = vpop.f32.mrb[216].mxu0 }
 0x517   : > { %v12758_v38 = vpop.f32.mrb[217].mxu0 }
 0x518   : > { %v9863_v58 = vpop.f32.mrb[218].mxu0 }
 0x519   : > { %v12760_v27 = vpop.f32.mrb[219].mxu0 }
 0x51b   : > { %9757 = vmatmul.mubr.bf16.vlgmr.msra.gmra.mrb[192].mxu1 %v13652_v2 }
 0x51c   : > { %9760 = vmatprep.mubr.bf16.mxu1 %v12360_v13  ;;  %9901 = vmatpush3.bf16.msra.mxu1 %v10982_v42 }
 0x51d   : > { %9902 = vmatprep.subr.bf16.mxu1 %v10983_v53 }
 0x51e   : > { %v9866_v50 = vpop.f32.mrb[220].mxu0 }
 0x51f   : > { %v12764_v63 = vpop.f32.mrb[221].mxu0 }
 0x520   : > { %9903 = vmatpush3.bf16.msra.mxu1 %v10983_v53  ;;  %v9867_v17 = vpop.f32.mrb[222].mxu0 }
 0x521   : > { %9904 = vmatprep.subr.bf16.mxu1 %v10984_v33  ;;  %v12766_v35 = vpop.f32.mrb[223].mxu0 }
 0x523   : > { %9761 = vmatmul.mubr.bf16.gmra.mrb[196].mxu1 %v13652_v2 }
 0x524   : > { %9764 = vmatprep.mubr.bf16.mxu1 %v12382_v36  ;;  %9905 = vmatpush3.bf16.msra.mxu1 %v10984_v33 }
 0x525   : > { %9906 = vmatprep.subr.bf16.mxu1 %v10985_v11 }
 0x526   : > { %v9870_v28 = vpop.f32.mrb[224].mxu0 }
 0x527   : > { %v12768_v51 = vpop.f32.mrb[225].mxu0 }
 0x528   : > { %9907 = vmatpush3.bf16.msra.mxu1 %v10985_v11  ;;  %v9871_v9 = vpop.f32.mrb[226].mxu0 }
 0x529   : > { %9908 = vmatprep.subr.bf16.mxu1 %v10986_v4  ;;  %v12770_v61 = vpop.f32.mrb[227].mxu0 }
 0x52b   : > { %9765 = vmatmul.mubr.bf16.gmra.mrb[200].mxu1 %v13652_v2 }
 0x52c   : > { %9768 = vmatprep.mubr.bf16.mxu1 %v12404_v25  ;;  %9909 = vmatpush3.bf16.msra.mxu1 %v10986_v4 }
 0x52d   : > { %9910 = vmatprep.subr.bf16.mxu1 %v10987_v41 }
 0x52e   : > { %v9874_v10 = vpop.f32.mrb[228].mxu0 }
 0x52f   : > { %v12774_v44 = vpop.f32.mrb[229].mxu0 }
 0x530   : > { %9911 = vmatpush3.bf16.msra.mxu1 %v10987_v41  ;;  %v9875_v42 = vpop.f32.mrb[230].mxu0 }
 0x531   : > { %9912 = vmatprep.subr.bf16.mxu1 %v10988_v30  ;;  %v12776_v53 = vpop.f32.mrb[231].mxu0 }
 0x533   : > { %9769 = vmatmul.mubr.bf16.gmra.mrb[204].mxu1 %v13652_v2 }
 0x534   : > { %9772 = vmatprep.mubr.bf16.mxu1 %v12428_v47  ;;  %9913 = vmatpush3.bf16.msra.mxu1 %v10988_v30 }
 0x535   : > { %9914 = vmatprep.subr.bf16.mxu1 %v10989_v60 }
 0x536   : > { %v9878_v33 = vpop.f32.mrb[232].mxu0 }
 0x537   : > { %v12778_v11 = vpop.f32.mrb[233].mxu0 }
 0x538   : > { %9915 = vmatpush3.bf16.msra.mxu1 %v10989_v60  ;;  %13717 = vst [vmem:[#allocation10_spill] sm:$0xff] %v12778_v11  ;;  %v9879_v4 = vpop.f32.mrb[234].mxu0 }
 0x539   : > { %9980 = vmatprep.subr.bf16.mxu1 %v12733_v32  ;;  %v12780_v41 = vpop.f32.mrb[235].mxu0 }
 0x53a   : > { %13718 = vst [vmem:[#allocation11_spill] sm:$0xff] %v12780_v41 }
 0x53b   : > { %9773 = vmatmul.mubr.bf16.gmra.mrb[208].mxu1 %v13652_v2 }
 0x53c   : > { %9776 = vmatprep.mubr.bf16.mxu1 %v12445_v1 }
 0x53e   : > { %v9882_v30 = vpop.f32.mrb[236].mxu0 }
 0x53f   : > { %v12784_v20 = vpop.f32.mrb[237].mxu0 }
 0x540   : > { %13719 = vst [vmem:[#allocation23_spill] sm:$0xff] %v12784_v20  ;;  %v9883_v55 = vpop.f32.mrb[238].mxu0 }
 0x541   : > { %v12786_v60 = vpop.f32.mrb[239].mxu0 }
 0x542   : > { %13720 = vst [vmem:[#allocation12_spill] sm:$0xff] %v12786_v60 }
 0x543   : > { %9777 = vmatmul.mubr.bf16.gmra.mrb[212].mxu1 %v13652_v2 }
 0x544   : > { %9780 = vmatprep.mubr.bf16.mxu1 %v12461_v18 }
 0x546   : > { %v9886_v39 = vpop.f32.mrb[240].mxu0 }
 0x547   : > { %v12788_v34 = vpop.f32.mrb[241].mxu0 }
 0x548   : > { %13721 = vst [vmem:[#allocation13_spill] sm:$0xff] %v12788_v34  ;;  %v9887_v12 = vpop.f32.mrb[242].mxu0 }
 0x549   : > { %v12790_v45 = vpop.f32.mrb[243].mxu0 }
 0x54a   : > { %13722 = vst [vmem:[#allocation14_spill] sm:$0xff] %v12790_v45  ;;  %v10997_v45 = vld [vmem:[%s13642_s4 + $0xb8] sm:$0xff]  }
 0x54b   : > { %9781 = vmatmul.mubr.bf16.gmra.mrb[216].mxu1 %v13652_v2 }
 0x54c   : > { %9784 = vmatprep.mubr.bf16.mxu1 %v12477_v29 }
 0x54e   : > { %v9890_v0 = vpop.f32.mrb[244].mxu0 }
 0x54f   : > { %v12794_v19 = vpop.f32.mrb[245].mxu0 }
 0x550   : > { %13723 = vst [vmem:[#allocation15_spill] sm:$0xff] %v12794_v19  ;;  %v9891_v54 = vpop.f32.mrb[246].mxu0 }
 0x551   : > { %v12796_v23 = vpop.f32.mrb[247].mxu0 }
 0x552   : > { %13724 = vst [vmem:[#allocation16_spill] sm:$0xff] %v12796_v23  ;;  %v10995_v23 = vld [vmem:[%s13642_s4 + $0xa8] sm:$0xff]  }
 0x553   : > { %9785 = vmatmul.mubr.bf16.gmra.mrb[220].mxu1 %v13652_v2 }
 0x554   : > { %9788 = vmatprep.mubr.bf16.mxu1 %v12493_v16 }
 0x556   : > { %v9894_v15 = vpop.f32.mrb[248].mxu0 }
 0x557   : > { %v12798_v14 = vpop.f32.mrb[249].mxu0 }
 0x558   : > { %13725 = vst [vmem:[#allocation17_spill] sm:$0xff] %v12798_v14  ;;  %v9895_v58 = vpop.f32.mrb[250].mxu0 }
 0x559   : > { %v12800_v50 = vpop.f32.mrb[251].mxu0 }
 0x55a   : > { %13726 = vst [vmem:[#allocation24_spill] sm:$0xff] %v12800_v50  ;;  %v10993_v50 = vld [vmem:[%s13642_s4 + $0x98] sm:$0xff]  }
 0x55b   : > { %9789 = vmatmul.mubr.bf16.gmra.mrb[224].mxu1 %v13652_v2 }
 0x55c   : > { %9792 = vmatprep.mubr.bf16.mxu1 %v12509_v52 }
 0x55e   : > { %v9898_v17 = vpop.f32.mrb[252].mxu0 }
 0x55f   : > { %v12804_v28 = vpop.f32.mrb[253].mxu0 }
 0x560   : > { %13727 = vst [vmem:[#allocation25_spill] sm:$0xff] %v12804_v28  ;;  %v9899_v9 = vpop.f32.mrb[254].mxu0 }
 0x561   : > { %v12806_v10 = vpop.f32.mrb[255].mxu0 }
 0x562   : > { %13728 = vst [vmem:[#allocation26_spill] sm:$0xff] %v12806_v10  ;;  %v10991_v10 = vld [vmem:[%s13642_s4 + $0x88] sm:$0xff]  }
 0x563   : > { %9793 = vmatmul.mubr.bf16.gmra.mrb[228].mxu1 %v13652_v2 }
 0x564   : > { %9796 = vmatprep.mubr.bf16.mxu1 %v12525_v62 }
 0x566   : > { %v10158_v42 = vpop.f32.mrb[64].mxu0 }
 0x567   : > { %v12808_v33 = vpop.f32.mrb[65].mxu0 }
 0x568   : > { %v10159_v4 = vpop.f32.mrb[66].mxu0 }
 0x569   : > { %v12812_v30 = vpop.f32.mrb[67].mxu0 }
 0x56b   : > { %9797 = vmatmul.mubr.bf16.gmra.mrb[232].mxu1 %v13652_v2 }
 0x56c   : > { %9800 = vmatprep.mubr.bf16.mxu1 %v12541_v22 }
 0x56e   : > { %v10162_v55 = vpop.f32.mrb[68].mxu0 }
 0x56f   : > { %v12814_v39 = vpop.f32.mrb[69].mxu0 }
 0x570   : > { %v10163_v12 = vpop.f32.mrb[70].mxu0 }
 0x571   : > { %v12818_v0 = vpop.f32.mrb[71].mxu0 }
 0x573   : > { %9801 = vmatmul.mubr.bf16.gmra.mrb[236].mxu1 %v13652_v2 }
 0x574   : > { %9804 = vmatprep.mubr.bf16.mxu1 %v12557_v24 }
 0x576   : > { %v10166_v54 = vpop.f32.mrb[72].mxu0 }
 0x577   : > { %v12820_v15 = vpop.f32.mrb[73].mxu0 }
 0x578   : > { %v10167_v58 = vpop.f32.mrb[74].mxu0 }
 0x579   : > { %v12824_v17 = vpop.f32.mrb[75].mxu0 }
 0x57b   : > { %9805 = vmatmul.mubr.bf16.gmra.mrb[240].mxu1 %v13652_v2 }
 0x57c   : > { %9808 = vmatprep.mubr.bf16.mxu1 %v12573_v46 }
 0x57e   : > { %v10170_v9 = vpop.f32.mrb[76].mxu0 }
 0x57f   : > { %v12826_v42 = vpop.f32.mrb[77].mxu0 }
 0x580   : > { %v10171_v4 = vpop.f32.mrb[78].mxu0 }
 0x581   : > { %v12830_v55 = vpop.f32.mrb[79].mxu0 }
 0x583   : > { %9809 = vmatmul.mubr.bf16.gmra.mrb[244].mxu1 %v13652_v2 }
 0x584   : > { %9812 = vmatprep.mubr.bf16.mxu1 %v12589_v49 }
 0x586   : > { %v10174_v12 = vpop.f32.mrb[80].mxu0 }
 0x587   : > { %v12832_v54 = vpop.f32.mrb[81].mxu0 }
 0x588   : > { %v10175_v58 = vpop.f32.mrb[82].mxu0 }
 0x589   : > { %v12836_v43 = vpop.f32.mrb[83].mxu0  ;;  %v10992_v58 = vld [vmem:[%s13642_s4 + $0x90] sm:$0xff]  }
 0x58b   : > { %9813 = vmatmul.mubr.bf16.gmra.mrb[248].mxu1 %v13652_v2 }
 0x58c   : > { %9816 = vmatprep.mubr.bf16.mxu1 %v12602_v5 }
 0x58e   : > { %v10178_v9 = vpop.f32.mrb[84].mxu0 }
 0x58f   : > { %v12841_v4 = vpop.f32.mrb[85].mxu0 }
 0x590   : > { %v10179_v28 = vpop.f32.mrb[86].mxu0 }
 0x591   : > { %v12846_v12 = vpop.f32.mrb[87].mxu0  ;;  %v13729_v28 = vmov 0  }
 0x593   : > { %9817 = vmatmul.mubr.bf16.gmra.mrb[252].mxu1 %v13652_v2 }
 0x594   : > { %9916 = vmatprep.mubr.bf16.mxu1 %v12337_v59 }
 0x596   : > { %v10182_v9 = vpop.f32.mrb[88].mxu0 }
 0x59b   : > { %9917 = vmatmul.mubr.bf16.vlgmr.msra.gmra.mrb[0].mxu1 %v13652_v2  ;;  %v12854_v2 = vpop.f32.mrb[89].mxu0 }
 0x59c   : > { %9920 = vmatprep.mubr.bf16.mxu1 %v12360_v13  ;;  %9981 = vmatpush3.bf16.msra.mxu1 %v12733_v32  ;;  %v10183_v14 = vpop.f32.mrb[90].mxu0 }
 0x59d   : > { %9982 = vmatprep.subr.bf16.mxu1 %v10991_v10  ;;  %v12858_v32 = vpop.f32.mrb[91].mxu0 }
 0x59e   : > { %v10186_v9 = vpop.f32.mrb[92].mxu0 }
 0x59f   : > { %v12866_v19 = vpop.f32.mrb[93].mxu0 }
 0x5a0   : > { %9983 = vmatpush3.bf16.msra.mxu1 %v10991_v10  ;;  %v10994_v10 = vld [vmem:[%s13642_s4 + $0xa0] sm:$0xff]   ;;  %v10187_v14 = vpop.f32.mrb[94].mxu0 }
 0x5a1   : > { %9984 = vmatprep.subr.bf16.mxu1 %v10992_v58 }
 0x5a3   : > { %9921 = vmatmul.mubr.bf16.gmra.mrb[4].mxu1 %v13729_v28 }
 0x5a4   : > { %9924 = vmatprep.mubr.bf16.mxu1 %v12382_v36  ;;  %9985 = vmatpush3.bf16.msra.mxu1 %v10992_v58  ;;  %v12870_v58 = vpop.f32.mrb[95].mxu0 }
 0x5a5   : > { %9986 = vmatprep.subr.bf16.mxu1 %v10993_v50 }
 0x5a6   : > { %v10190_v9 = vpop.f32.mrb[96].mxu0 }
 0x5a7   : > { %v12878_v34 = vpop.f32.mrb[97].mxu0 }
 0x5a8   : > { %9987 = vmatpush3.bf16.msra.mxu1 %v10993_v50  ;;  %v10996_v50 = vld [vmem:[%s13642_s4 + $0xb0] sm:$0xff]   ;;  %v10191_v14 = vpop.f32.mrb[98].mxu0 }
 0x5a9   : > { %9988 = vmatprep.subr.bf16.mxu1 %v10994_v10 }
 0x5ab   : > { %9925 = vmatmul.mubr.bf16.gmra.mrb[8].mxu1 %v13729_v28 }
 0x5ac   : > { %9928 = vmatprep.mubr.bf16.mxu1 %v12404_v25  ;;  %9989 = vmatpush3.bf16.msra.mxu1 %v10994_v10  ;;  %v12882_v10 = vpop.f32.mrb[99].mxu0 }
 0x5ad   : > { %9990 = vmatprep.subr.bf16.mxu1 %v10995_v23 }
 0x5ae   : > { %v10194_v9 = vpop.f32.mrb[100].mxu0 }
 0x5af   : > { %v12890_v60 = vpop.f32.mrb[101].mxu0 }
 0x5b0   : > { %9991 = vmatpush3.bf16.msra.mxu1 %v10995_v23  ;;  %v12887_v23 = vld [vmem:[%s13642_s4 + $0x180] sm:$0xff]   ;;  %v10195_v14 = vpop.f32.mrb[102].mxu0 }
 0x5b1   : > { %9992 = vmatprep.subr.bf16.mxu1 %v10996_v50 }
 0x5b3   : > { %9929 = vmatmul.mubr.bf16.gmra.mrb[12].mxu1 %v13729_v28 }
 0x5b4   : > { %9932 = vmatprep.mubr.bf16.mxu1 %v12428_v47  ;;  %9993 = vmatpush3.bf16.msra.mxu1 %v10996_v50  ;;  %v12894_v50 = vpop.f32.mrb[103].mxu0 }
 0x5b5   : > { %9994 = vmatprep.subr.bf16.mxu1 %v10997_v45  ;;  %13730 = vst [vmem:[#allocation27_spill] sm:$0xff] %v12894_v50 }
 0x5b6   : > { %v10198_v20 = vpop.f32.mrb[104].mxu0 }
 0x5b7   : > { %v12896_v41 = vpop.f32.mrb[105].mxu0 }
 0x5b8   : > { %9995 = vmatpush3.bf16.msra.mxu1 %v10997_v45  ;;  %v10199_v11 = vpop.f32.mrb[106].mxu0 }
 0x5b9   : > { %10060 = vmatprep.subr.bf16.mxu1 %v12887_v23  ;;  %v12900_v45 = vpop.f32.mrb[107].mxu0 }
 0x5ba   : > { %13731 = vst [vmem:[#allocation28_spill] sm:$0xff] %v12900_v45 }
 0x5bb   : > { %9933 = vmatmul.mubr.bf16.gmra.mrb[16].mxu1 %v13729_v28 }
 0x5bc   : > { %9936 = vmatprep.mubr.bf16.mxu1 %v12445_v1 }
 0x5be   : > { %v10202_v9 = vpop.f32.mrb[108].mxu0 }
 0x5bf   : > { %v12902_v47 = vpop.f32.mrb[109].mxu0 }
 0x5c0   : > { %v10203_v14 = vpop.f32.mrb[110].mxu0 }
 0x5c1   : > { %v12906_v1 = vpop.f32.mrb[111].mxu0 }
 0x5c2   : > { %13732 = vst [vmem:[#allocation29_spill] sm:$0xff] %v12906_v1 }
 0x5c3   : > { %9937 = vmatmul.mubr.bf16.gmra.mrb[20].mxu1 %v13729_v28 }
 0x5c4   : > { %9940 = vmatprep.mubr.bf16.mxu1 %v12461_v18 }
 0x5c6   : > { %v10206_v20 = vpop.f32.mrb[112].mxu0 }
 0x5c7   : > { %v12908_v50 = vpop.f32.mrb[113].mxu0 }
 0x5c8   : > { %v10207_v11 = vpop.f32.mrb[114].mxu0 }
 0x5c9   : > { %v12912_v18 = vpop.f32.mrb[115].mxu0 }
 0x5ca   : > { %13733 = vst [vmem:[#allocation30_spill] sm:$0xff] %v12912_v18 }
 0x5cb   : > { %9941 = vmatmul.mubr.bf16.gmra.mrb[24].mxu1 %v13729_v28 }
 0x5cc   : > { %9944 = vmatprep.mubr.bf16.mxu1 %v12477_v29 }
 0x5ce   : > { %v10210_v9 = vpop.f32.mrb[116].mxu0 }
 0x5cf   : > { %v12914_v45 = vpop.f32.mrb[117].mxu0 }
 0x5d0   : > { %13734 = vst [vmem:[#allocation31_spill] sm:$0xff] %v12914_v45  ;;  %v10211_v14 = vpop.f32.mrb[118].mxu0 }
 0x5d1   : > { %v12918_v29 = vpop.f32.mrb[119].mxu0 }
 0x5d2   : > { %13735 = vst [vmem:[#allocation32_spill] sm:$0xff] %v12918_v29 }
 0x5d3   : > { %9945 = vmatmul.mubr.bf16.gmra.mrb[28].mxu1 %v13729_v28 }
 0x5d4   : > { %9948 = vmatprep.mubr.bf16.mxu1 %v12493_v16 }
 0x5d6   : > { %v10214_v20 = vpop.f32.mrb[120].mxu0 }
 0x5d7   : > { %v12920_v1 = vpop.f32.mrb[121].mxu0 }
 0x5d8   : > { %13736 = vst [vmem:[#allocation33_spill] sm:$0xff] %v12920_v1  ;;  %v10215_v11 = vpop.f32.mrb[122].mxu0 }
 0x5d9   : > { %v12924_v16 = vpop.f32.mrb[123].mxu0 }
 0x5da   : > { %13737 = vst [vmem:[#allocation34_spill] sm:$0xff] %v12924_v16 }
 0x5db   : > { %9949 = vmatmul.mubr.bf16.gmra.mrb[32].mxu1 %v13729_v28 }
 0x5dc   : > { %9952 = vmatprep.mubr.bf16.mxu1 %v12509_v52 }
 0x5de   : > { %v10218_v9 = vpop.f32.mrb[124].mxu0 }
 0x5df   : > { %v12926_v18 = vpop.f32.mrb[125].mxu0 }
 0x5e0   : > { %v10219_v14 = vpop.f32.mrb[126].mxu0 }
 0x5e1   : > { %v12930_v52 = vpop.f32.mrb[127].mxu0 }
 0x5e2   : > { %13738 = vst [vmem:[#allocation35_spill] sm:$0xff] %v12930_v52 }
 0x5e3   : > { %9953 = vmatmul.mubr.bf16.gmra.mrb[36].mxu1 %v13729_v28 }
 0x5e4   : > { %9956 = vmatprep.mubr.bf16.mxu1 %v12525_v62 }
 0x5eb   : > { %9957 = vmatmul.mubr.bf16.gmra.mrb[40].mxu1 %v13729_v28 }
 0x5ec   : > { %9960 = vmatprep.mubr.bf16.mxu1 %v12541_v22 }
 0x5ee   : > { %v9758_v20 = vpop.f32.mrb[192].mxu1 }
 0x5ef   : > { %v4919_v29 = vpop.f32.mrb[193].mxu1 }
 0x5f0   : > { %v5225_v1 = vadd.f32 %v12716_v31, %v4919_v29  ;;  %v9759_v45 = vpop.f32.mrb[194].mxu1 }
 0x5f1   : > { %v4922_v11 = vpop.f32.mrb[195].mxu1 }
 0x5f2   : > { %v5228_v62 = vadd.f32 %v12721_v6, %v4922_v11  ;;  %v12935_v16 = vadd.f32 %v12808_v33, %v5225_v1 }
 0x5f3   : > { %9961 = vmatmul.mubr.bf16.gmra.mrb[44].mxu1 %v13729_v28 }
 0x5f4   : > { %v12939_v9 = vadd.f32 %v12812_v30, %v5228_v62  ;;  %9964 = vmatprep.mubr.bf16.mxu1 %v12557_v24 }
 0x5f6   : > { %v9762_v14 = vpop.f32.mrb[196].mxu1 }
 0x5f7   : > { %v4933_v22 = vpop.f32.mrb[197].mxu1 }
 0x5f8   : > { %v5239_v20 = vadd.f32 %v12728_v7, %v4933_v22  ;;  %v9763_v52 = vpop.f32.mrb[198].mxu1 }
 0x5f9   : > { %v4936_v29 = vpop.f32.mrb[199].mxu1 }
 0x5fa   : > { %v5242_v31 = vadd.f32 %v12735_v3, %v4936_v29  ;;  %v12945_v6 = vadd.f32 %v12814_v39, %v5239_v20 }
 0x5fb   : > { %9965 = vmatmul.mubr.bf16.gmra.mrb[48].mxu1 %v13729_v28 }
 0x5fc   : > { %v12949_v1 = vadd.f32 %v12818_v0, %v5242_v31  ;;  %9968 = vmatprep.mubr.bf16.mxu1 %v12573_v46 }
 0x5fe   : > { %v9766_v62 = vpop.f32.mrb[200].mxu1 }
 0x5ff   : > { %v4947_v33 = vpop.f32.mrb[201].mxu1 }
 0x600   : > { %v5253_v30 = vadd.f32 %v12737_v57, %v4947_v33  ;;  %v9767_v45 = vpop.f32.mrb[202].mxu1 }
 0x601   : > { %v4950_v22 = vpop.f32.mrb[203].mxu1 }
 0x602   : > { %v5256_v52 = vadd.f32 %v12740_v26, %v4950_v22  ;;  %v12955_v7 = vadd.f32 %v12820_v15, %v5253_v30 }
 0x603   : > { %9969 = vmatmul.mubr.bf16.gmra.mrb[52].mxu1 %v13729_v28 }
 0x604   : > { %v12959_v3 = vadd.f32 %v12824_v17, %v5256_v52  ;;  %9972 = vmatprep.mubr.bf16.mxu1 %v12589_v49 }
 0x606   : > { %v9770_v39 = vpop.f32.mrb[204].mxu1 }
 0x607   : > { %v4961_v0 = vpop.f32.mrb[205].mxu1 }
 0x608   : > { %v5267_v11 = vadd.f32 %v12744_v48, %v4961_v0  ;;  %v9771_v14 = vpop.f32.mrb[206].mxu1 }
 0x609   : > { %v4964_v57 = vpop.f32.mrb[207].mxu1 }
 0x60a   : > { %v5270_v20 = vadd.f32 %v12746_v8, %v4964_v57  ;;  %v12965_v26 = vadd.f32 %v12826_v42, %v5267_v11 }
 0x60b   : > { %9973 = vmatmul.mubr.bf16.gmra.mrb[56].mxu1 %v13729_v28 }
 0x60c   : > { %v12969_v15 = vadd.f32 %v12830_v55, %v5270_v20  ;;  %9976 = vmatprep.mubr.bf16.mxu1 %v12602_v5 }
 0x60e   : > { %v9774_v17 = vpop.f32.mrb[208].mxu1 }
 0x60f   : > { %v4975_v29 = vpop.f32.mrb[209].mxu1 }
 0x610   : > { %v5281_v31 = vadd.f32 %v12748_v21, %v4975_v29  ;;  %v9775_v62 = vpop.f32.mrb[210].mxu1 }
 0x611   : > { %v4978_v48 = vpop.f32.mrb[211].mxu1 }
 0x612   : > { %v5284_v33 = vadd.f32 %v12750_v37, %v4978_v48  ;;  %v12975_v8 = vadd.f32 %v12832_v54, %v5281_v31  ;;  %v10999_v37 = vld [vmem:[%s13642_s4 + $0x188] sm:$0xff]  }
 0x613   : > { %9977 = vmatmul.mubr.bf16.gmra.mrb[60].mxu1 %v13729_v28 }
 0x614   : > { %v12979_v42 = vadd.f32 %v12836_v43, %v5284_v33  ;;  %9996 = vmatprep.mubr.bf16.mxu1 %v13729_v28 }
 0x616   : > { %v9778_v55 = vpop.f32.mrb[212].mxu1 }
 0x617   : > { %v4989_v30 = vpop.f32.mrb[213].mxu1 }
 0x618   : > { %v5295_v45 = vadd.f32 %v12754_v56, %v4989_v30  ;;  %v9779_v22 = vpop.f32.mrb[214].mxu1  ;;  %v11000_v56 = vld [vmem:[%s13642_s4 + $0x190] sm:$0xff]  }
 0x619   : > { %v4992_v21 = vpop.f32.mrb[215].mxu1 }
 0x61a   : > { %v5298_v54 = vadd.f32 %v12756_v40, %v4992_v21  ;;  %v12988_v52 = vadd.f32 %v12841_v4, %v5295_v45 }
 0x61b   : > { %9997 = vmatmul.mubr.bf16.vlgmr.msra.gmra.mrb[0].mxu1 %v13729_v28 }
 0x61c   : > { %v12992_v43 = vadd.f32 %v12846_v12, %v5298_v54  ;;  %10000 = vmatprep.mubr.bf16.mxu1 %v12337_v59  ;;  %10061 = vmatpush3.bf16.msra.mxu1 %v12887_v23  ;;  %v11001_v12 = vld [vmem:[%s13642_s4 + $0x198] sm:$0xff]  }
 0x61d   : > { %10062 = vmatprep.subr.bf16.mxu1 %v10999_v37 }
 0x61e   : > { %v9782_v39 = vpop.f32.mrb[216].mxu1 }
 0x61f   : > { %v5003_v0 = vpop.f32.mrb[217].mxu1  ;;  %v13739_v39 = vld [vmem:[#allocation27_spill] sm:$0xff] }
 0x620   : > { %v5309_v40 = vadd.f32 %v12758_v38, %v5003_v0  ;;  %v9783_v4 = vpop.f32.mrb[218].mxu1  ;;  %10063 = vmatpush3.bf16.msra.mxu1 %v10999_v37  ;;  %v11002_v38 = vld [vmem:[%s13642_s4 + $0x1a0] sm:$0xff]  }
 0x621   : > { %v5006_v11 = vpop.f32.mrb[219].mxu1  ;;  %10064 = vmatprep.subr.bf16.mxu1 %v11000_v56 }
 0x622   : > { %v5312_v59 = vadd.f32 %v12760_v27, %v5006_v11  ;;  %v13005_v23 = vadd.f32 %v12854_v2, %v5309_v40  ;;  %v13740_v40 = vld [vmem:[#allocation20_spill] sm:$0xff] }
 0x623   : > { %10001 = vmatmul.mubr.bf16.gmra.mrb[4].mxu1 %v13729_v28 }
 0x624   : > { %v13009_v14 = vadd.f32 %v12858_v32, %v5312_v59  ;;  %10004 = vmatprep.mubr.bf16.mxu1 %v12360_v13  ;;  %10065 = vmatpush3.bf16.msra.mxu1 %v11000_v56  ;;  %v11003_v32 = vld [vmem:[%s13642_s4 + $0x1a8] sm:$0xff]  }
 0x625   : > { %10066 = vmatprep.subr.bf16.mxu1 %v11001_v12 }
 0x626   : > { %v9786_v57 = vpop.f32.mrb[220].mxu1 }
 0x627   : > { %v5017_v20 = vpop.f32.mrb[221].mxu1  ;;  %v13742_v57 = vld [vmem:[#allocation11_spill] sm:$0xff] }
 0x628   : > { %v5323_v27 = vadd.f32 %v12764_v63, %v5017_v20  ;;  %v9787_v17 = vpop.f32.mrb[222].mxu1  ;;  %10067 = vmatpush3.bf16.msra.mxu1 %v11001_v12  ;;  %v11004_v63 = vld [vmem:[%s13642_s4 + $0x1b0] sm:$0xff]  }
 0x629   : > { %v5020_v2 = vpop.f32.mrb[223].mxu1  ;;  %10068 = vmatprep.subr.bf16.mxu1 %v11002_v38  ;;  %v13744_v17 = vld [vmem:[#allocation7_spill] sm:$0xff] }
 0x62a   : > { %v5326_v29 = vadd.f32 %v12766_v35, %v5020_v2  ;;  %v13021_v31 = vadd.f32 %v12866_v19, %v5323_v27 }
 0x62b   : > { %10005 = vmatmul.mubr.bf16.gmra.mrb[8].mxu1 %v13729_v28 }
 0x62c   : > { %v13025_v62 = vadd.f32 %v12870_v58, %v5326_v29  ;;  %10008 = vmatprep.mubr.bf16.mxu1 %v12382_v36  ;;  %10069 = vmatpush3.bf16.msra.mxu1 %v11002_v38  ;;  %v11005_v58 = vld [vmem:[%s13642_s4 + $0x1b8] sm:$0xff]   ;;  %v13745_v29 = vld [vmem:[#allocation23_spill] sm:$0xff] }
 0x62d   : > { %10070 = vmatprep.subr.bf16.mxu1 %v11003_v32 }
 0x62e   : > { %v9790_v48 = vpop.f32.mrb[224].mxu1 }
 0x62f   : > { %v5031_v33 = vpop.f32.mrb[225].mxu1 }
 0x630   : > { %v5337_v35 = vadd.f32 %v12768_v51, %v5031_v33  ;;  %v9791_v55 = vpop.f32.mrb[226].mxu1  ;;  %10071 = vmatpush3.bf16.msra.mxu1 %v11003_v32  ;;  %v13047_v51 = vld [vmem:[%s13642_s4 + $0x200] sm:$0xff]  }
 0x631   : > { %v5034_v19 = vpop.f32.mrb[227].mxu1  ;;  %10072 = vmatprep.subr.bf16.mxu1 %v11004_v63 }
 0x632   : > { %v5340_v30 = vadd.f32 %v12770_v61, %v5034_v19  ;;  %v13037_v45 = vadd.f32 %v12878_v34, %v5337_v35  ;;  %v13746_v35 = vld [vmem:[#allocation12_spill] sm:$0xff] }
 0x633   : > { %10009 = vmatmul.mubr.bf16.gmra.mrb[12].mxu1 %v13729_v28 }
 0x634   : > { %v13041_v22 = vadd.f32 %v12882_v10, %v5340_v30  ;;  %10012 = vmatprep.mubr.bf16.mxu1 %v12404_v25  ;;  %10073 = vmatpush3.bf16.msra.mxu1 %v11004_v63  ;;  %v13748_v30 = vld [vmem:[#allocation21_spill] sm:$0xff] }
 0x635   : > { %10074 = vmatprep.subr.bf16.mxu1 %v11005_v58 }
 0x636   : > { %v9794_v21 = vpop.f32.mrb[228].mxu1 }
 0x637   : > { %v5045_v37 = vpop.f32.mrb[229].mxu1 }
 0x638   : > { %v5351_v61 = vadd.f32 %v12774_v44, %v5045_v37  ;;  %v9795_v34 = vpop.f32.mrb[230].mxu1  ;;  %10075 = vmatpush3.bf16.msra.mxu1 %v11005_v58  ;;  %v13741_v44 = vld [vmem:[#allocation10_spill] sm:$0xff] }
 0x639   : > { %v5048_v54 = vpop.f32.mrb[231].mxu1  ;;  %10220 = vmatprep.subr.bf16.mxu1 %v13047_v51 }
 0x63a   : > { %v5354_v10 = vadd.f32 %v12776_v53, %v5048_v54  ;;  %v13053_v56 = vadd.f32 %v12890_v60, %v5351_v61  ;;  %v13743_v60 = vld [vmem:[#allocation28_spill] sm:$0xff]  ;;  %v13749_v61 = vld [vmem:[#allocation13_spill] sm:$0xff] }
 0x63b   : > { %10013 = vmatmul.mubr.bf16.gmra.mrb[16].mxu1 %v13729_v28 }
 0x63c   : > { %v13057_v0 = vadd.f32 %v13739_v39, %v5354_v10  ;;  %10016 = vmatprep.mubr.bf16.mxu1 %v13740_v40  ;;  %v13750_v39 = vld [vmem:[#allocation14_spill] sm:$0xff] }
 0x63e   : > { %v9798_v4 = vpop.f32.mrb[232].mxu1 }
 0x63f   : > { %v5059_v11 = vpop.f32.mrb[233].mxu1 }
 0x640   : > { %v5365_v12 = vadd.f32 %v13741_v44, %v5059_v11  ;;  %v9799_v59 = vpop.f32.mrb[234].mxu1 }
 0x641   : > { %v5062_v38 = vpop.f32.mrb[235].mxu1 }
 0x642   : > { %v5368_v20 = vadd.f32 %v13742_v57, %v5062_v38  ;;  %v13063_v53 = vadd.f32 %v12896_v41, %v5365_v12  ;;  %v13747_v41 = vld [vmem:[#allocation29_spill] sm:$0xff]  ;;  %v13752_v12 = vld [vmem:[#allocation18_spill] sm:$0xff]  ;;  %v13753_v57 = vld [vmem:[#allocation15_spill] sm:$0xff] }
 0x643   : > { %10017 = vmatmul.mubr.bf16.gmra.mrb[20].mxu1 %v13729_v28 }
 0x644   : > { %v13067_v27 = vadd.f32 %v13743_v60, %v5368_v20  ;;  %10020 = vmatprep.mubr.bf16.mxu1 %v13744_v17 }
 0x646   : > { %v9802_v2 = vpop.f32.mrb[236].mxu1 }
 0x647   : > { %v5073_v32 = vpop.f32.mrb[237].mxu1 }
 0x648   : > { %v5379_v63 = vadd.f32 %v13745_v29, %v5073_v32  ;;  %v9803_v48 = vpop.f32.mrb[238].mxu1  ;;  %v13754_v32 = vld [vmem:[#allocation16_spill] sm:$0xff] }
 0x649   : > { %v5076_v33 = vpop.f32.mrb[239].mxu1 }
 0x64a   : > { %v5382_v55 = vadd.f32 %v13746_v35, %v5076_v33  ;;  %v13073_v19 = vadd.f32 %v12902_v47, %v5379_v63  ;;  %v13751_v47 = vld [vmem:[#allocation30_spill] sm:$0xff]  ;;  %v13755_v63 = vld [vmem:[#allocation31_spill] sm:$0xff]  ;;  %v13757_v35 = vld [vmem:[#allocation8_spill] sm:$0xff] }
 0x64b   : > { %10021 = vmatmul.mubr.bf16.gmra.mrb[24].mxu1 %v13729_v28 }
 0x64c   : > { %v13077_v58 = vadd.f32 %v13747_v41, %v5382_v55  ;;  %10024 = vmatprep.mubr.bf16.mxu1 %v13748_v30 }
 0x64e   : > { %v9806_v21 = vpop.f32.mrb[240].mxu1 }
 0x64f   : > { %v5087_v37 = vpop.f32.mrb[241].mxu1  ;;  %v13758_v21 = vld [vmem:[#allocation17_spill] sm:$0xff] }
 0x650   : > { %v5393_v34 = vadd.f32 %v13749_v61, %v5087_v37  ;;  %v9807_v54 = vpop.f32.mrb[242].mxu1 }
 0x651   : > { %v5090_v10 = vpop.f32.mrb[243].mxu1  ;;  %v13759_v54 = vld [vmem:[#allocation24_spill] sm:$0xff] }
 0x652   : > { %v5396_v4 = vadd.f32 %v13750_v39, %v5090_v10  ;;  %v13083_v11 = vadd.f32 %v12908_v50, %v5393_v34  ;;  %v13756_v50 = vld [vmem:[#allocation32_spill] sm:$0xff]  ;;  %v13760_v39 = vld [vmem:[#allocation33_spill] sm:$0xff] }
 0x653   : > { %10025 = vmatmul.mubr.bf16.gmra.mrb[28].mxu1 %v13729_v28 }
 0x654   : > { %v13087_v44 = vadd.f32 %v13751_v47, %v5396_v4  ;;  %10028 = vmatprep.mubr.bf16.mxu1 %v13752_v12  ;;  %v13761_v47 = vld [vmem:[#allocation34_spill] sm:$0xff] }
 0x656   : > { %v9810_v59 = vpop.f32.mrb[244].mxu1 }
 0x657   : > { %v5101_v38 = vpop.f32.mrb[245].mxu1 }
 0x658   : > { %v5407_v20 = vadd.f32 %v13753_v57, %v5101_v38  ;;  %v9811_v60 = vpop.f32.mrb[246].mxu1  ;;  %v13762_v38 = vld [vmem:[#allocation9_spill] sm:$0xff] }
 0x659   : > { %v5104_v2 = vpop.f32.mrb[247].mxu1  ;;  %v13763_v60 = vld [vmem:[#allocation25_spill] sm:$0xff] }
 0x65a   : > { %v5410_v29 = vadd.f32 %v13754_v32, %v5104_v2  ;;  %v13093_v48 = vadd.f32 %v13755_v63, %v5407_v20  ;;  %v13764_v63 = vld [vmem:[#allocation26_spill] sm:$0xff] }
 0x65b   : > { %10029 = vmatmul.mubr.bf16.gmra.mrb[32].mxu1 %v13729_v28 }
 0x65c   : > { %v13097_v33 = vadd.f32 %v13756_v50, %v5410_v29  ;;  %10032 = vmatprep.mubr.bf16.mxu1 %v13757_v35 }
 0x65e   : > { %v9814_v55 = vpop.f32.mrb[248].mxu1 }
 0x65f   : > { %v5115_v41 = vpop.f32.mrb[249].mxu1 }
 0x660   : > { %v5421_v37 = vadd.f32 %v13758_v21, %v5115_v41  ;;  %v9815_v61 = vpop.f32.mrb[250].mxu1  ;;  %v13765_v41 = vld [vmem:[#allocation35_spill] sm:$0xff] }
 0x661   : > { %v5118_v34 = vpop.f32.mrb[251].mxu1  ;;  %v13767_v61 = vld [vmem:[#allocation19_spill] sm:$0xff] }
 0x662   : > { %v5424_v10 = vadd.f32 %v13759_v54, %v5118_v34  ;;  %v13103_v4 = vadd.f32 %v13760_v39, %v5421_v37  ;;  %v13766_v37 = vld [vmem:[#allocation22_spill] sm:$0xff]  ;;  %v11008_v34 = vld [vmem:[%s13642_s4 + $0x210] sm:$0xff]   ;;  %v11009_v54 = vld [vmem:[%s13642_s4 + $0x218] sm:$0xff]  }
 0x663   : > { %10033 = vmatmul.mubr.bf16.gmra.mrb[36].mxu1 %v13729_v28  ;;  %v11012_v39 = vld [vmem:[%s13642_s4 + $0x230] sm:$0xff]  }
 0x664   : > { %v13107_v59 = vadd.f32 %v13761_v47, %v5424_v10  ;;  %10036 = vmatprep.mubr.bf16.mxu1 %v13762_v38  ;;  %v11011_v10 = vld [vmem:[%s13642_s4 + $0x228] sm:$0xff]   ;;  %v11013_v47 = vld [vmem:[%s13642_s4 + $0x238] sm:$0xff]  }
 0x666   : > { %v9818_v57 = vpop.f32.mrb[252].mxu1 }
 0x667   : > { %v5129_v20 = vpop.f32.mrb[253].mxu1 }
 0x668   : > { %v5435_v2 = vadd.f32 %v13763_v60, %v5129_v20  ;;  %v9819_v32 = vpop.f32.mrb[254].mxu1 }
 0x669   : > { %v5132_v29 = vpop.f32.mrb[255].mxu1 }
 0x66a   : > { %v5438_v50 = vadd.f32 %v13764_v63, %v5132_v29  ;;  %v13113_v55 = vadd.f32 %v12926_v18, %v5435_v2  ;;  %v11007_v18 = vld [vmem:[%s13642_s4 + $0x208] sm:$0xff]  }
 0x66b   : > { %10037 = vmatmul.mubr.bf16.gmra.mrb[40].mxu1 %v13729_v28 }
 0x66c   : > { %v13117_v21 = vadd.f32 %v13765_v41, %v5438_v50  ;;  %10040 = vmatprep.mubr.bf16.mxu1 %v13766_v37 }
 0x673   : > { %10041 = vmatmul.mubr.bf16.gmra.mrb[44].mxu1 %v13729_v28 }
 0x674   : > { %10044 = vmatprep.mubr.bf16.mxu1 %v13767_v61 }
 0x67b   : > { %10045 = vmatmul.mubr.bf16.gmra.mrb[48].mxu1 %v13729_v28 }
 0x67c   : > { %10048 = vmatprep.mubr.bf16.mxu1 %v12557_v24 }
 0x683   : > { %10049 = vmatmul.mubr.bf16.gmra.mrb[52].mxu1 %v13729_v28 }
 0x684   : > { %10052 = vmatprep.mubr.bf16.mxu1 %v12573_v46 }
 0x68b   : > { %10053 = vmatmul.mubr.bf16.gmra.mrb[56].mxu1 %v13729_v28 }
 0x68c   : > { %10056 = vmatprep.mubr.bf16.mxu1 %v12589_v49 }
 0x693   : > { %10057 = vmatmul.mubr.bf16.gmra.mrb[60].mxu1 %v13729_v28 }
 0x694   : > { %10076 = vmatprep.mubr.bf16.mxu1 %v12360_v13 }
 0x69b   : > { %10077 = vmatmul.mubr.bf16.vlgmr.msra.gmra.mrb[128].mxu1 %v13729_v28 }
 0x69c   : > { %10080 = vmatprep.mubr.bf16.mxu1 %v12382_v36  ;;  %10221 = vmatpush3.bf16.msra.mxu1 %v13047_v51  ;;  %v11010_v51 = vld [vmem:[%s13642_s4 + $0x220] sm:$0xff]  }
 0x69d   : > { %10222 = vmatprep.subr.bf16.mxu1 %v11007_v18 }
 0x6a0   : > { %10223 = vmatpush3.bf16.msra.mxu1 %v11007_v18 }
 0x6a1   : > { %10224 = vmatprep.subr.bf16.mxu1 %v11008_v34 }
 0x6a3   : > { %10081 = vmatmul.mubr.bf16.gmra.mrb[132].mxu1 %v13729_v28 }
 0x6a4   : > { %10084 = vmatprep.mubr.bf16.mxu1 %v12404_v25  ;;  %10225 = vmatpush3.bf16.msra.mxu1 %v11008_v34 }
 0x6a5   : > { %10226 = vmatprep.subr.bf16.mxu1 %v11009_v54 }
 0x6a8   : > { %10227 = vmatpush3.bf16.msra.mxu1 %v11009_v54 }
 0x6a9   : > { %10228 = vmatprep.subr.bf16.mxu1 %v11010_v51 }
 0x6ab   : > { %10085 = vmatmul.mubr.bf16.gmra.mrb[136].mxu1 %v13729_v28 }
 0x6ac   : > { %10088 = vmatprep.mubr.bf16.mxu1 %v13740_v40  ;;  %10229 = vmatpush3.bf16.msra.mxu1 %v11010_v51 }
 0x6ad   : > { %10230 = vmatprep.subr.bf16.mxu1 %v11011_v10 }
 0x6b0   : > { %10231 = vmatpush3.bf16.msra.mxu1 %v11011_v10 }
 0x6b1   : > { %10232 = vmatprep.subr.bf16.mxu1 %v11012_v39 }
 0x6b3   : > { %10089 = vmatmul.mubr.bf16.gmra.mrb[140].mxu1 %v13729_v28 }
 0x6b4   : > { %10092 = vmatprep.mubr.bf16.mxu1 %v13744_v17  ;;  %10233 = vmatpush3.bf16.msra.mxu1 %v11012_v39 }
 0x6b5   : > { %10234 = vmatprep.subr.bf16.mxu1 %v11013_v47 }
 0x6b8   : > { %10235 = vmatpush3.bf16.msra.mxu1 %v11013_v47 }
 0x6bb   : > { %10093 = vmatmul.mubr.bf16.gmra.mrb[144].mxu1 %v13729_v28 }
 0x6bc   : > { %10096 = vmatprep.mubr.bf16.mxu1 %v13748_v30 }
 0x6c3   : > { %10097 = vmatmul.mubr.bf16.gmra.mrb[148].mxu1 %v13729_v28 }
 0x6c4   : > { %10100 = vmatprep.mubr.bf16.mxu1 %v13752_v12 }
 0x6cb   : > { %10101 = vmatmul.mubr.bf16.gmra.mrb[152].mxu1 %v13729_v28 }
 0x6cc   : > { %10104 = vmatprep.mubr.bf16.mxu1 %v13757_v35 }
 0x6d3   : > { %10105 = vmatmul.mubr.bf16.gmra.mrb[156].mxu1 %v13729_v28 }
 0x6d4   : > { %10108 = vmatprep.mubr.bf16.mxu1 %v13762_v38 }
 0x6db   : > { %10109 = vmatmul.mubr.bf16.gmra.mrb[160].mxu1 %v13729_v28 }
 0x6dc   : > { %10112 = vmatprep.mubr.bf16.mxu1 %v13766_v37 }
 0x6e3   : > { %10113 = vmatmul.mubr.bf16.gmra.mrb[164].mxu1 %v13729_v28 }
 0x6e4   : > { %10116 = vmatprep.mubr.bf16.mxu1 %v13767_v61 }
 0x6eb   : > { %10117 = vmatmul.mubr.bf16.gmra.mrb[168].mxu1 %v13729_v28 }
 0x6ec   : > { %10120 = vmatprep.mubr.bf16.mxu1 %v12557_v24 }
 0x6f3   : > { %10121 = vmatmul.mubr.bf16.gmra.mrb[172].mxu1 %v13729_v28 }
 0x6f4   : > { %10124 = vmatprep.mubr.bf16.mxu1 %v12573_v46 }
 0x6fb   : > { %10125 = vmatmul.mubr.bf16.gmra.mrb[176].mxu1 %v13729_v28 }
 0x6fc   : > { %10128 = vmatprep.mubr.bf16.mxu1 %v12589_v49 }
 0x703   : > { %10129 = vmatmul.mubr.bf16.gmra.mrb[180].mxu1 %v13729_v28 }
 0x704   : > { %10132 = vmatprep.mubr.bf16.mxu1 %v12602_v5 }
 0x70b   : > { %10133 = vmatmul.mubr.bf16.gmra.mrb[184].mxu1 %v13729_v28 }
 0x70c   : > { %10136 = vmatprep.mubr.bf16.mxu1 %v13729_v28 }
 0x713   : > { %10137 = vmatmul.mubr.bf16.gmra.mrb[188].mxu1 %v13729_v28 }
 0x714   : > { %10236 = vmatprep.mubr.bf16.mxu1 %v12360_v13 }
 0x71b   : > { %10237 = vmatmul.mubr.bf16.vlgmr.msra.gmra.mrb[0].mxu1 %v13729_v28 }
 0x71c   : > { %10240 = vmatprep.mubr.bf16.mxu1 %v12382_v36 }
 0x723   : > { %10241 = vmatmul.mubr.bf16.gmra.mrb[4].mxu1 %v13729_v28 }
 0x724   : > { %10244 = vmatprep.mubr.bf16.mxu1 %v12404_v25 }
 0x72b   : > { %10245 = vmatmul.mubr.bf16.gmra.mrb[8].mxu1 %v13729_v28 }
 0x72c   : > { %10248 = vmatprep.mubr.bf16.mxu1 %v13740_v40 }
 0x733   : > { %10249 = vmatmul.mubr.bf16.gmra.mrb[12].mxu1 %v13729_v28 }
 0x734   : > { %10252 = vmatprep.mubr.bf16.mxu1 %v13744_v17 }
 0x73b   : > { %10253 = vmatmul.mubr.bf16.gmra.mrb[16].mxu1 %v13729_v28 }
 0x73c   : > { %10256 = vmatprep.mubr.bf16.mxu1 %v13748_v30 }
 0x743   : > { %10257 = vmatmul.mubr.bf16.gmra.mrb[20].mxu1 %v13729_v28 }
 0x744   : > { %10260 = vmatprep.mubr.bf16.mxu1 %v13752_v12 }
 0x74b   : > { %10261 = vmatmul.mubr.bf16.gmra.mrb[24].mxu1 %v13729_v28 }
 0x74c   : > { %10264 = vmatprep.mubr.bf16.mxu1 %v13757_v35 }
 0x753   : > { %10265 = vmatmul.mubr.bf16.gmra.mrb[28].mxu1 %v13729_v28 }
 0x754   : > { %10268 = vmatprep.mubr.bf16.mxu1 %v13762_v38 }
 0x75b   : > { %10269 = vmatmul.mubr.bf16.gmra.mrb[32].mxu1 %v13729_v28 }
 0x75c   : > { %10272 = vmatprep.mubr.bf16.mxu1 %v13766_v37 }
 0x763   : > { %10273 = vmatmul.mubr.bf16.gmra.mrb[36].mxu1 %v13729_v28 }
 0x764   : > { %10276 = vmatprep.mubr.bf16.mxu1 %v13767_v61 }
 0x76b   : > { %10277 = vmatmul.mubr.bf16.gmra.mrb[40].mxu1 %v13729_v28 }
 0x76c   : > { %10280 = vmatprep.mubr.bf16.mxu1 %v12557_v24 }
 0x76e   : > { %v10078_v13 = vpop.f32.mrb[128].mxu1 }
 0x76f   : > { %v13206_v36 = vpop.f32.mrb[129].mxu1 }
 0x770   : > { %v10079_v25 = vpop.f32.mrb[130].mxu1  ;;  %v7264_v17 = vrot.slane %v13206_v36, 7 }
 0x771   : > { %v6240_v40 = vpop.f32.mrb[131].mxu1  ;;  %v7266_v20 = vrot.slane %v10079_v25, 7 }
 0x772   : > { %v7265_v30 = vrot.slane %v6240_v40, 7 }
 0x773   : > { %10281 = vmatmul.mubr.bf16.gmra.mrb[44].mxu1 %v13729_v28 }
 0x774   : > { %v7342_v35 = vsel %vm3727_vm0, %v7264_v17, %v7265_v30  ;;  %10284 = vmatprep.mubr.bf16.mxu1 %v12573_v46 }
 0x775   : > { %v13216_v38 = vadd.f32 %v7342_v35, %v12939_v9 }
 0x776   : > { %v10082_v24 = vpop.f32.mrb[132].mxu1 }
 0x777   : > { %v6252_v57 = vpop.f32.mrb[133].mxu1 }
 0x778   : > { %v7267_v60 = vrot.slane %v6252_v57, 7  ;;  %v10083_v2 = vpop.f32.mrb[134].mxu1 }
 0x779   : > { %v6255_v32 = vpop.f32.mrb[135].mxu1  ;;  %v7269_v61 = vrot.slane %v10083_v2, 7 }
 0x77a   : > { %v7341_v29 = vsel %vm3727_vm0, %v7266_v20, %v7267_v60  ;;  %v7268_v63 = vrot.slane %v6255_v32, 7 }
 0x77b   : > { %v13221_v50 = vadd.f32 %v7341_v29, %v12945_v6  ;;  %10285 = vmatmul.mubr.bf16.gmra.mrb[48].mxu1 %v13729_v28 }
 0x77c   : > { %v7340_v46 = vsel %vm3727_vm0, %v7267_v60, %v7268_v63  ;;  %10288 = vmatprep.mubr.bf16.mxu1 %v12589_v49 }
 0x77d   : > { %v13228_v9 = vadd.f32 %v7340_v46, %v12949_v1 }
 0x77e   : > { %v10086_v41 = vpop.f32.mrb[136].mxu1 }
 0x77f   : > { %v6267_v37 = vpop.f32.mrb[137].mxu1 }
 0x780   : > { %v7270_v18 = vrot.slane %v6267_v37, 7  ;;  %v10087_v34 = vpop.f32.mrb[138].mxu1 }
 0x781   : > { %v6270_v54 = vpop.f32.mrb[139].mxu1  ;;  %v7272_v13 = vrot.slane %v10087_v34, 7 }
 0x782   : > { %v7339_v6 = vsel %vm3727_vm0, %v7269_v61, %v7270_v18  ;;  %v7271_v51 = vrot.slane %v6270_v54, 7 }
 0x783   : > { %v13233_v10 = vadd.f32 %v7339_v6, %v12955_v7  ;;  %10289 = vmatmul.mubr.bf16.gmra.mrb[52].mxu1 %v13729_v28 }
 0x784   : > { %v7338_v49 = vsel %vm3727_vm0, %v7270_v18, %v7271_v51  ;;  %10292 = vmatprep.mubr.bf16.mxu1 %v12602_v5 }
 0x785   : > { %v13240_v1 = vadd.f32 %v7338_v49, %v12959_v3 }
 0x786   : > { %v10090_v39 = vpop.f32.mrb[140].mxu1 }
 0x787   : > { %v6282_v47 = vpop.f32.mrb[141].mxu1 }
 0x788   : > { %v7273_v25 = vrot.slane %v6282_v47, 7  ;;  %v10091_v40 = vpop.f32.mrb[142].mxu1 }
 0x789   : > { %v6285_v30 = vpop.f32.mrb[143].mxu1  ;;  %v7275_v60 = vrot.slane %v10091_v40, 7 }
 0x78a   : > { %v7337_v7 = vsel %vm3727_vm0, %v7272_v13, %v7273_v25  ;;  %v7274_v35 = vrot.slane %v6285_v30, 7 }
 0x78b   : > { %v13245_v24 = vadd.f32 %v7337_v7, %v12965_v26  ;;  %10293 = vmatmul.mubr.bf16.gmra.mrb[56].mxu1 %v13729_v28 }
 0x78c   : > { %v7336_v5 = vsel %vm3727_vm0, %v7273_v25, %v7274_v35  ;;  %10296 = vmatprep.mubr.bf16.mxu1 %v13729_v28 }
 0x78d   : > { %v13252_v3 = vadd.f32 %v7336_v5, %v12969_v15 }
 0x78e   : > { %v10094_v57 = vpop.f32.mrb[144].mxu1 }
 0x78f   : > { %v6297_v20 = vpop.f32.mrb[145].mxu1 }
 0x790   : > { %v7276_v2 = vrot.slane %v6297_v20, 7  ;;  %v10095_v32 = vpop.f32.mrb[146].mxu1 }
 0x791   : > { %v6300_v29 = vpop.f32.mrb[147].mxu1  ;;  %v7278_v18 = vrot.slane %v10095_v32, 7 }
 0x792   : > { %v7335_v26 = vsel %vm3727_vm0, %v7275_v60, %v7276_v2  ;;  %v7277_v63 = vrot.slane %v6300_v29, 7 }
 0x793   : > { %v13257_v46 = vadd.f32 %v7335_v26, %v12975_v8  ;;  %10297 = vmatmul.mubr.bf16.gmra.mrb[60].mxu1 %v13729_v28 }
 0x794   : > { %v7334_v41 = vsel %vm3727_vm0, %v7276_v2, %v7277_v63 }
 0x795   : > { %v13263_v15 = vadd.f32 %v7334_v41, %v12979_v42 }
 0x796   : > { %v10098_v37 = vpop.f32.mrb[148].mxu1 }
 0x797   : > { %v6312_v61 = vpop.f32.mrb[149].mxu1 }
 0x798   : > { %v7279_v34 = vrot.slane %v6312_v61, 7  ;;  %v10099_v54 = vpop.f32.mrb[150].mxu1 }
 0x799   : > { %v6315_v6 = vpop.f32.mrb[151].mxu1  ;;  %v7281_v13 = vrot.slane %v10099_v54, 7 }
 0x79a   : > { %v7333_v51 = vsel %vm3727_vm0, %v7278_v18, %v7279_v34  ;;  %v7280_v49 = vrot.slane %v6315_v6, 7 }
 0x79b   : > { %v13268_v8 = vadd.f32 %v7333_v51, %v12988_v52 }
 0x79c   : > { %v7332_v28 = vsel %vm3727_vm0, %v7279_v34, %v7280_v49 }
 0x79d   : > { %v13273_v39 = vadd.f32 %v7332_v28, %v12992_v43 }
 0x79e   : > { %v10102_v42 = vpop.f32.mrb[152].mxu1 }
 0x79f   : > { %v6327_v47 = vpop.f32.mrb[153].mxu1 }
 0x7a0   : > { %v7282_v25 = vrot.slane %v6327_v47, 7  ;;  %v10103_v40 = vpop.f32.mrb[154].mxu1 }
 0x7a1   : > { %v6330_v30 = vpop.f32.mrb[155].mxu1  ;;  %v7284_v60 = vrot.slane %v10103_v40, 7 }
 0x7a2   : > { %v7331_v7 = vsel %vm3727_vm0, %v7281_v13, %v7282_v25  ;;  %v7283_v35 = vrot.slane %v6330_v30, 7 }
 0x7a3   : > { %v13278_v5 = vadd.f32 %v7331_v7, %v13005_v23 }
 0x7a4   : > { %v7330_v52 = vsel %vm3727_vm0, %v7282_v25, %v7283_v35 }
 0x7a5   : > { %v13283_v57 = vadd.f32 %v7330_v52, %v13009_v14 }
 0x7a6   : > { %v10106_v43 = vpop.f32.mrb[156].mxu1 }
 0x7a7   : > { %v6342_v20 = vpop.f32.mrb[157].mxu1 }
 0x7a8   : > { %v7285_v2 = vrot.slane %v6342_v20, 7  ;;  %v10107_v32 = vpop.f32.mrb[158].mxu1 }
 0x7a9   : > { %v6345_v29 = vpop.f32.mrb[159].mxu1  ;;  %v7287_v18 = vrot.slane %v10107_v32, 7 }
 0x7aa   : > { %v7329_v26 = vsel %vm3727_vm0, %v7284_v60, %v7285_v2  ;;  %v7286_v63 = vrot.slane %v6345_v29, 7 }
 0x7ab   : > { %v13288_v41 = vadd.f32 %v7329_v26, %v13021_v31 }
 0x7ac   : > { %v7328_v23 = vsel %vm3727_vm0, %v7285_v2, %v7286_v63 }
 0x7ad   : > { %v13293_v37 = vadd.f32 %v7328_v23, %v13025_v62 }
 0x7ae   : > { %v10110_v14 = vpop.f32.mrb[160].mxu1 }
 0x7af   : > { %v6357_v61 = vpop.f32.mrb[161].mxu1 }
 0x7b0   : > { %v7288_v34 = vrot.slane %v6357_v61, 7  ;;  %v10111_v54 = vpop.f32.mrb[162].mxu1 }
 0x7b1   : > { %v6360_v6 = vpop.f32.mrb[163].mxu1  ;;  %v7290_v13 = vrot.slane %v10111_v54, 7 }
 0x7b2   : > { %v7327_v51 = vsel %vm3727_vm0, %v7287_v18, %v7288_v34  ;;  %v7289_v49 = vrot.slane %v6360_v6, 7 }
 0x7b3   : > { %v13298_v28 = vadd.f32 %v7327_v51, %v13037_v45 }
 0x7b4   : > { %v7326_v31 = vsel %vm3727_vm0, %v7288_v34, %v7289_v49 }
 0x7b5   : > { %v13303_v42 = vadd.f32 %v7326_v31, %v13041_v22 }
 0x7b6   : > { %v10114_v62 = vpop.f32.mrb[164].mxu1 }
 0x7b7   : > { %v6372_v47 = vpop.f32.mrb[165].mxu1 }
 0x7b8   : > { %v7291_v25 = vrot.slane %v6372_v47, 7  ;;  %v10115_v40 = vpop.f32.mrb[166].mxu1 }
 0x7b9   : > { %v6375_v30 = vpop.f32.mrb[167].mxu1  ;;  %v7293_v60 = vrot.slane %v10115_v40, 7 }
 0x7ba   : > { %v7325_v7 = vsel %vm3727_vm0, %v7290_v13, %v7291_v25  ;;  %v7292_v35 = vrot.slane %v6375_v30, 7 }
 0x7bb   : > { %v13308_v52 = vadd.f32 %v7325_v7, %v13053_v56 }
 0x7bc   : > { %v7324_v45 = vsel %vm3727_vm0, %v7291_v25, %v7292_v35 }
 0x7bd   : > { %v13313_v43 = vadd.f32 %v7324_v45, %v13057_v0 }
 0x7be   : > { %v10118_v22 = vpop.f32.mrb[168].mxu1 }
 0x7bf   : > { %v6387_v20 = vpop.f32.mrb[169].mxu1 }
 0x7c0   : > { %v7294_v2 = vrot.slane %v6387_v20, 7  ;;  %v10119_v32 = vpop.f32.mrb[170].mxu1 }
 0x7c1   : > { %v6390_v29 = vpop.f32.mrb[171].mxu1  ;;  %v7296_v18 = vrot.slane %v10119_v32, 7 }
 0x7c2   : > { %v7323_v26 = vsel %vm3727_vm0, %v7293_v60, %v7294_v2  ;;  %v7295_v63 = vrot.slane %v6390_v29, 7 }
 0x7c3   : > { %v13318_v23 = vadd.f32 %v7323_v26, %v13063_v53 }
 0x7c4   : > { %v7322_v56 = vsel %vm3727_vm0, %v7294_v2, %v7295_v63 }
 0x7c5   : > { %v13323_v14 = vadd.f32 %v7322_v56, %v13067_v27 }
 0x7c6   : > { %v10122_v0 = vpop.f32.mrb[172].mxu1 }
 0x7c7   : > { %v6402_v61 = vpop.f32.mrb[173].mxu1 }
 0x7c8   : > { %v7297_v34 = vrot.slane %v6402_v61, 7  ;;  %v10123_v54 = vpop.f32.mrb[174].mxu1 }
 0x7c9   : > { %v6405_v6 = vpop.f32.mrb[175].mxu1  ;;  %v7299_v13 = vrot.slane %v10123_v54, 7 }
 0x7ca   : > { %v7321_v51 = vsel %vm3727_vm0, %v7296_v18, %v7297_v34  ;;  %v7298_v49 = vrot.slane %v6405_v6, 7 }
 0x7cb   : > { %v13328_v31 = vadd.f32 %v7321_v51, %v13073_v19 }
 0x7cc   : > { %v7320_v53 = vsel %vm3727_vm0, %v7297_v34, %v7298_v49 }
 0x7cd   : > { %v13333_v62 = vadd.f32 %v7320_v53, %v13077_v58 }
 0x7ce   : > { %v10126_v27 = vpop.f32.mrb[176].mxu1 }
 0x7cf   : > { %v6417_v47 = vpop.f32.mrb[177].mxu1 }
 0x7d0   : > { %v7300_v25 = vrot.slane %v6417_v47, 7  ;;  %v10127_v40 = vpop.f32.mrb[178].mxu1 }
 0x7d1   : > { %v6420_v30 = vpop.f32.mrb[179].mxu1  ;;  %v7302_v60 = vrot.slane %v10127_v40, 7 }
 0x7d2   : > { %v7319_v7 = vsel %vm3727_vm0, %v7299_v13, %v7300_v25  ;;  %v7301_v35 = vrot.slane %v6420_v30, 7 }
 0x7d3   : > { %v13338_v45 = vadd.f32 %v7319_v7, %v13083_v11 }
 0x7d4   : > { %v7318_v19 = vsel %vm3727_vm0, %v7300_v25, %v7301_v35 }
 0x7d5   : > { %v13343_v22 = vadd.f32 %v7318_v19, %v13087_v44 }
 0x7d6   : > { %v10130_v58 = vpop.f32.mrb[180].mxu1 }
 0x7d7   : > { %v6432_v20 = vpop.f32.mrb[181].mxu1 }
 0x7d8   : > { %v7303_v2 = vrot.slane %v6432_v20, 7  ;;  %v10131_v32 = vpop.f32.mrb[182].mxu1 }
 0x7d9   : > { %v6435_v29 = vpop.f32.mrb[183].mxu1  ;;  %v7305_v18 = vrot.slane %v10131_v32, 7 }
 0x7da   : > { %v7317_v26 = vsel %vm3727_vm0, %v7302_v60, %v7303_v2  ;;  %v7304_v63 = vrot.slane %v6435_v29, 7 }
 0x7db   : > { %v13348_v56 = vadd.f32 %v7317_v26, %v13093_v48 }
 0x7dc   : > { %v7316_v11 = vsel %vm3727_vm0, %v7303_v2, %v7304_v63 }
 0x7dd   : > { %v13353_v0 = vadd.f32 %v7316_v11, %v13097_v33 }
 0x7de   : > { %v10134_v44 = vpop.f32.mrb[184].mxu1 }
 0x7df   : > { %v6447_v61 = vpop.f32.mrb[185].mxu1 }
 0x7e0   : > { %v7306_v34 = vrot.slane %v6447_v61, 7  ;;  %v10135_v54 = vpop.f32.mrb[186].mxu1  ;;  %v13394_v61 = vld [vmem:[%s13644_s6] ss:$0 sm:$0xff] }
 0x7e1   : > { %v6450_v6 = vpop.f32.mrb[187].mxu1  ;;  %v7308_v13 = vrot.slane %v10135_v54, 7 }
 0x7e2   : > { %v7315_v51 = vsel %vm3727_vm0, %v7305_v18, %v7306_v34  ;;  %v7307_v49 = vrot.slane %v6450_v6, 7 }
 0x7e3   : > { %v13358_v53 = vadd.f32 %v7315_v51, %v13103_v4 }
 0x7e4   : > { %v7314_v48 = vsel %vm3727_vm0, %v7306_v34, %v7307_v49 }
 0x7e5   : > { %v13363_v27 = vadd.f32 %v7314_v48, %v13107_v59 }
 0x7e6   : > { %v10138_v33 = vpop.f32.mrb[188].mxu1 }
 0x7e7   : > { %v6462_v47 = vpop.f32.mrb[189].mxu1 }
 0x7e8   : > { %v7309_v25 = vrot.slane %v6462_v47, 7  ;;  %v10139_v40 = vpop.f32.mrb[190].mxu1 }
 0x7e9   : > { %v7311_v30 = vrot.slane %v10139_v40, 7  ;;  %v6465_v7 = vpop.f32.mrb[191].mxu1 }
 0x7ea   : > { %v7313_v35 = vsel %vm3727_vm0, %v7308_v13, %v7309_v25  ;;  %v7310_v19 = vrot.slane %v6465_v7, 7 }
 0x7eb   : > { %v13368_v4 = vadd.f32 %v7313_v35, %v13113_v55  ;;  %v7343_v59 = vsel %vm3727_vm0, %v7311_v30, %v7264_v17 }
 0x7ec   : > { %v7344_v58 = vadd.f32 %v7343_v59, %v12935_v16  ;;  %v7312_v20 = vsel %vm3727_vm0, %v7309_v25, %v7310_v19 }
 0x7ed   : > { %v13378_v60 = vadd.f32 %v7312_v20, %v13117_v21  ;;  %v13388_v21 = vld [vmem:[%s13643_s5] ss:$0 sm:$0xff] }
 0x7ee   : > { %v10238_v2 = vpop.f32.mrb[0].mxu1 }
 0x7ef   : > { %v6977_v32 = vpop.f32.mrb[1].mxu1  ;;  %v7378_v55 = vrot.slane %v10238_v2, 1 }
 0x7f0   : > { %v10239_v29 = vpop.f32.mrb[2].mxu1  ;;  %v7376_v63 = vrot.slane %v6977_v32, 1 }
 0x7f1   : > { %v6980_v26 = vpop.f32.mrb[3].mxu1 }
 0x7f2   : > { %v7377_v11 = vrot.slane %v6980_v26, 1 }
 0x7f4   : > { %v7454_v36 = vsel %vm3840_vm1, %v7377_v11, %v7378_v55  ;;  %v7455_v16 = vsel %vm3840_vm1, %v7376_v63, %v7377_v11 }
 0x7f5   : > { %v7456_v17 = vadd.f32 %v7455_v16, %v7344_v58  ;;  %v7457_v44 = vadd.f32 %v7454_v36, %v13216_v38 }
 0x7f6   : > { %v10242_v18 = vpop.f32.mrb[4].mxu1 }
 0x7f7   : > { %v7495_v34 = vmul.f32 %v13388_v21, %v7456_v17  ;;  %v7496_v54 = vmul.f32 %v13388_v21, %v7457_v44  ;;  %v6992_v6 = vpop.f32.mrb[5].mxu1  ;;  %v7381_v38 = vrot.slane %v10242_v18, 1 }
 0x7f8   : > { %v10243_v51 = vpop.f32.mrb[6].mxu1  ;;  %v7379_v47 = vrot.slane %v6992_v6, 1 }
 0x7f9   : > { %v7534_v49 = vadd.f32 %v13394_v61, %v7495_v34  ;;  %v7535_v48 = vadd.f32 %v13394_v61, %v7496_v54  ;;  %v6995_v33 = vpop.f32.mrb[7].mxu1 }
 0x7fa   : > { %v7380_v13 = vrot.slane %v6995_v33, 1 }
 0x7fb   : > { %v7566_v25 = vmax.f32 %v7534_v49, 0.0  ;;  %v7567_v40 = vmax.f32 %v7535_v48, 0.0 }
 0x7fc   : > { %v7452_v30 = vsel %vm3840_vm1, %v7380_v13, %v7381_v38  ;;  %v7453_v7 = vsel %vm3840_vm1, %v7379_v47, %v7380_v13 }
 0x7fd   : > { %7598 = vst [vmem:[%s13406_s18] sm:$0xff] %v7566_v25  ;;  %7599 = vst [vmem:[%s13406_s18 + $0x8] sm:$0xff] %v7567_v40  ;;  %v7458_v35 = vadd.f32 %v7453_v7, %v13221_v50  ;;  %v7459_v19 = vadd.f32 %v7452_v30, %v13228_v9 }
 0x7fe   : > { %v10246_v59 = vpop.f32.mrb[8].mxu1 }
 0x7ff   : > { %v7497_v58 = vmul.f32 %v13388_v21, %v7458_v35  ;;  %v7498_v20 = vmul.f32 %v13388_v21, %v7459_v19  ;;  %v7007_v2 = vpop.f32.mrb[9].mxu1  ;;  %v7384_v63 = vrot.slane %v10246_v59, 1 }
 0x800   : > { %v10247_v32 = vpop.f32.mrb[10].mxu1  ;;  %v7382_v11 = vrot.slane %v7007_v2, 1 }
 0x801   : > { %v7536_v29 = vadd.f32 %v13394_v61, %v7497_v58  ;;  %v7537_v26 = vadd.f32 %v13394_v61, %v7498_v20  ;;  %v7010_v55 = vpop.f32.mrb[11].mxu1 }
 0x802   : > { %v7383_v36 = vrot.slane %v7010_v55, 1 }
 0x803   : > { %v7568_v50 = vmax.f32 %v7536_v29, 0.0  ;;  %v7569_v16 = vmax.f32 %v7537_v26, 0.0 }
 0x804   : > { %v7450_v9 = vsel %vm3840_vm1, %v7383_v36, %v7384_v63  ;;  %v7451_v17 = vsel %vm3840_vm1, %v7382_v11, %v7383_v36 }
 0x805   : > { %7600 = vst [vmem:[%s13406_s18 + $0x10] sm:$0xff] %v7568_v50  ;;  %7601 = vst [vmem:[%s13406_s18 + $0x18] sm:$0xff] %v7569_v16  ;;  %v7460_v44 = vadd.f32 %v7451_v17, %v13233_v10  ;;  %v7461_v18 = vadd.f32 %v7450_v9, %v13240_v1 }
 0x806   : > { %v10250_v34 = vpop.f32.mrb[12].mxu1 }
 0x807   : > { %v7499_v54 = vmul.f32 %v13388_v21, %v7460_v44  ;;  %v7500_v6 = vmul.f32 %v13388_v21, %v7461_v18  ;;  %v7022_v51 = vpop.f32.mrb[13].mxu1  ;;  %v7387_v47 = vrot.slane %v10250_v34, 1 }
 0x808   : > { %v10251_v49 = vpop.f32.mrb[14].mxu1  ;;  %v7385_v13 = vrot.slane %v7022_v51, 1 }
 0x809   : > { %v7538_v48 = vadd.f32 %v13394_v61, %v7499_v54  ;;  %v7539_v33 = vadd.f32 %v13394_v61, %v7500_v6  ;;  %v7025_v38 = vpop.f32.mrb[15].mxu1 }
 0x80a   : > { %v7386_v25 = vrot.slane %v7025_v38, 1 }
 0x80b   : > { %v7570_v10 = vmax.f32 %v7538_v48, 0.0  ;;  %v7571_v40 = vmax.f32 %v7539_v33, 0.0 }
 0x80c   : > { %v7448_v1 = vsel %vm3840_vm1, %v7386_v25, %v7387_v47  ;;  %v7449_v30 = vsel %vm3840_vm1, %v7385_v13, %v7386_v25 }
 0x80d   : > { %7602 = vst [vmem:[%s13406_s18 + $0x20] sm:$0xff] %v7570_v10  ;;  %7603 = vst [vmem:[%s13406_s18 + $0x28] sm:$0xff] %v7571_v40  ;;  %v7462_v7 = vadd.f32 %v7449_v30, %v13245_v24  ;;  %v7463_v35 = vadd.f32 %v7448_v1, %v13252_v3 }
 0x80e   : > { %v10254_v19 = vpop.f32.mrb[16].mxu1 }
 0x80f   : > { %v7501_v59 = vmul.f32 %v13388_v21, %v7462_v7  ;;  %v7502_v58 = vmul.f32 %v13388_v21, %v7463_v35  ;;  %v7037_v20 = vpop.f32.mrb[17].mxu1  ;;  %v7390_v55 = vrot.slane %v10254_v19, 1 }
 0x810   : > { %v10255_v2 = vpop.f32.mrb[18].mxu1  ;;  %v7388_v63 = vrot.slane %v7037_v20, 1 }
 0x811   : > { %v7540_v32 = vadd.f32 %v13394_v61, %v7501_v59  ;;  %v7541_v29 = vadd.f32 %v13394_v61, %v7502_v58  ;;  %v7040_v26 = vpop.f32.mrb[19].mxu1 }
 0x812   : > { %v7389_v11 = vrot.slane %v7040_v26, 1 }
 0x813   : > { %v7572_v24 = vmax.f32 %v7540_v32, 0.0  ;;  %v7573_v36 = vmax.f32 %v7541_v29, 0.0 }
 0x814   : > { %v7446_v3 = vsel %vm3840_vm1, %v7389_v11, %v7390_v55  ;;  %v7447_v50 = vsel %vm3840_vm1, %v7388_v63, %v7389_v11 }
 0x815   : > { %7604 = vst [vmem:[%s13406_s18 + $0x30] sm:$0xff] %v7572_v24  ;;  %7605 = vst [vmem:[%s13406_s18 + $0x38] sm:$0xff] %v7573_v36  ;;  %v7464_v16 = vadd.f32 %v7447_v50, %v13257_v46  ;;  %v7465_v9 = vadd.f32 %v7446_v3, %v13263_v15 }
 0x816   : > { %v10258_v17 = vpop.f32.mrb[20].mxu1 }
 0x817   : > { %v7503_v44 = vmul.f32 %v13388_v21, %v7464_v16  ;;  %v7504_v18 = vmul.f32 %v13388_v21, %v7465_v9  ;;  %v7052_v34 = vpop.f32.mrb[21].mxu1  ;;  %v7393_v48 = vrot.slane %v10258_v17, 1 }
 0x818   : > { %v10259_v54 = vpop.f32.mrb[22].mxu1  ;;  %v7391_v33 = vrot.slane %v7052_v34, 1 }
 0x819   : > { %v7542_v6 = vadd.f32 %v13394_v61, %v7503_v44  ;;  %v7543_v51 = vadd.f32 %v13394_v61, %v7504_v18  ;;  %v7055_v49 = vpop.f32.mrb[23].mxu1 }
 0x81a   : > { %v7392_v38 = vrot.slane %v7055_v49, 1 }
 0x81b   : > { %v7574_v46 = vmax.f32 %v7542_v6, 0.0  ;;  %v7575_v47 = vmax.f32 %v7543_v51, 0.0 }
 0x81c   : > { %v7444_v15 = vsel %vm3840_vm1, %v7392_v38, %v7393_v48  ;;  %v7445_v13 = vsel %vm3840_vm1, %v7391_v33, %v7392_v38 }
 0x81d   : > { %7606 = vst [vmem:[%s13406_s18 + $0x40] sm:$0xff] %v7574_v46  ;;  %7607 = vst [vmem:[%s13406_s18 + $0x48] sm:$0xff] %v7575_v47  ;;  %v7466_v25 = vadd.f32 %v7445_v13, %v13268_v8  ;;  %v7467_v10 = vadd.f32 %v7444_v15, %v13273_v39 }
 0x81e   : > { %v10262_v40 = vpop.f32.mrb[24].mxu1 }
 0x81f   : > { %v7505_v1 = vmul.f32 %v13388_v21, %v7466_v25  ;;  %v7506_v30 = vmul.f32 %v13388_v21, %v7467_v10  ;;  %v7067_v7 = vpop.f32.mrb[25].mxu1  ;;  %v7396_v20 = vrot.slane %v10262_v40, 1 }
 0x820   : > { %v10263_v35 = vpop.f32.mrb[26].mxu1  ;;  %v7394_v2 = vrot.slane %v7067_v7, 1 }
 0x821   : > { %v7544_v19 = vadd.f32 %v13394_v61, %v7505_v1  ;;  %v7545_v59 = vadd.f32 %v13394_v61, %v7506_v30  ;;  %v7070_v58 = vpop.f32.mrb[27].mxu1 }
 0x822   : > { %v7395_v32 = vrot.slane %v7070_v58, 1 }
 0x823   : > { %v7576_v8 = vmax.f32 %v7544_v19, 0.0  ;;  %v7577_v29 = vmax.f32 %v7545_v59, 0.0 }
 0x824   : > { %v7442_v39 = vsel %vm3840_vm1, %v7395_v32, %v7396_v20  ;;  %v7443_v26 = vsel %vm3840_vm1, %v7394_v2, %v7395_v32 }
 0x825   : > { %7608 = vst [vmem:[%s13406_s18 + $0x50] sm:$0xff] %v7576_v8  ;;  %7609 = vst [vmem:[%s13406_s18 + $0x58] sm:$0xff] %v7577_v29  ;;  %v7468_v55 = vadd.f32 %v7443_v26, %v13278_v5  ;;  %v7469_v63 = vadd.f32 %v7442_v39, %v13283_v57 }
 0x826   : > { %v10266_v11 = vpop.f32.mrb[28].mxu1 }
 0x827   : > { %v7507_v24 = vmul.f32 %v13388_v21, %v7468_v55  ;;  %v7508_v36 = vmul.f32 %v13388_v21, %v7469_v63  ;;  %v7082_v3 = vpop.f32.mrb[29].mxu1  ;;  %v7399_v44 = vrot.slane %v10266_v11, 1 }
 0x828   : > { %v10267_v50 = vpop.f32.mrb[30].mxu1  ;;  %v7397_v18 = vrot.slane %v7082_v3, 1 }
 0x829   : > { %v7546_v16 = vadd.f32 %v13394_v61, %v7507_v24  ;;  %v7547_v9 = vadd.f32 %v13394_v61, %v7508_v36  ;;  %v7085_v17 = vpop.f32.mrb[31].mxu1 }
 0x82a   : > { %v7398_v34 = vrot.slane %v7085_v17, 1 }
 0x82b   : > { %v7578_v5 = vmax.f32 %v7546_v16, 0.0  ;;  %v7579_v54 = vmax.f32 %v7547_v9, 0.0 }
 0x82c   : > { %v7440_v57 = vsel %vm3840_vm1, %v7398_v34, %v7399_v44  ;;  %v7441_v6 = vsel %vm3840_vm1, %v7397_v18, %v7398_v34 }
 0x82d   : > { %7610 = vst [vmem:[%s13406_s18 + $0x60] sm:$0xff] %v7578_v5  ;;  %7611 = vst [vmem:[%s13406_s18 + $0x68] sm:$0xff] %v7579_v54  ;;  %v7470_v51 = vadd.f32 %v7441_v6, %v13288_v41  ;;  %v7471_v49 = vadd.f32 %v7440_v57, %v13293_v37 }
 0x82e   : > { %v10270_v48 = vpop.f32.mrb[32].mxu1 }
 0x82f   : > { %v7509_v33 = vmul.f32 %v13388_v21, %v7470_v51  ;;  %v7510_v38 = vmul.f32 %v13388_v21, %v7471_v49  ;;  %v7097_v46 = vpop.f32.mrb[33].mxu1  ;;  %v7402_v10 = vrot.slane %v10270_v48, 1 }
 0x830   : > { %v10271_v47 = vpop.f32.mrb[34].mxu1  ;;  %v7400_v40 = vrot.slane %v7097_v46, 1 }
 0x831   : > { %v7548_v15 = vadd.f32 %v13394_v61, %v7509_v33  ;;  %v7549_v13 = vadd.f32 %v13394_v61, %v7510_v38  ;;  %v7100_v25 = vpop.f32.mrb[35].mxu1 }
 0x832   : > { %v7401_v1 = vrot.slane %v7100_v25, 1 }
 0x833   : > { %v7580_v41 = vmax.f32 %v7548_v15, 0.0  ;;  %v7581_v30 = vmax.f32 %v7549_v13, 0.0 }
 0x834   : > { %v7438_v37 = vsel %vm3840_vm1, %v7401_v1, %v7402_v10  ;;  %v7439_v7 = vsel %vm3840_vm1, %v7400_v40, %v7401_v1 }
 0x835   : > { %7612 = vst [vmem:[%s13406_s18 + $0x70] sm:$0xff] %v7580_v41  ;;  %7613 = vst [vmem:[%s13406_s18 + $0x78] sm:$0xff] %v7581_v30  ;;  %v7472_v35 = vadd.f32 %v7439_v7, %v13298_v28  ;;  %v7473_v19 = vadd.f32 %v7438_v37, %v13303_v42 }
 0x836   : > { %v10274_v59 = vpop.f32.mrb[36].mxu1 }
 0x837   : > { %v7511_v58 = vmul.f32 %v13388_v21, %v7472_v35  ;;  %v7512_v20 = vmul.f32 %v13388_v21, %v7473_v19  ;;  %v7112_v2 = vpop.f32.mrb[37].mxu1  ;;  %v7405_v26 = vrot.slane %v10274_v59, 1 }
 0x838   : > { %v10275_v32 = vpop.f32.mrb[38].mxu1  ;;  %v7403_v55 = vrot.slane %v7112_v2, 1 }
 0x839   : > { %v7550_v8 = vadd.f32 %v13394_v61, %v7511_v58  ;;  %v7551_v29 = vadd.f32 %v13394_v61, %v7512_v20  ;;  %v7115_v39 = vpop.f32.mrb[39].mxu1 }
 0x83a   : > { %v7404_v63 = vrot.slane %v7115_v39, 1 }
 0x83b   : > { %v7582_v28 = vmax.f32 %v7550_v8, 0.0  ;;  %v7583_v11 = vmax.f32 %v7551_v29, 0.0 }
 0x83c   : > { %v7436_v42 = vsel %vm3840_vm1, %v7404_v63, %v7405_v26  ;;  %v7437_v24 = vsel %vm3840_vm1, %v7403_v55, %v7404_v63 }
 0x83d   : > { %7614 = vst [vmem:[%s13406_s18 + $0x80] sm:$0xff] %v7582_v28  ;;  %7615 = vst [vmem:[%s13406_s18 + $0x88] sm:$0xff] %v7583_v11  ;;  %v7474_v36 = vadd.f32 %v7437_v24, %v13308_v52  ;;  %v7475_v3 = vadd.f32 %v7436_v42, %v13313_v43 }
 0x83e   : > { %v10278_v50 = vpop.f32.mrb[40].mxu1 }
 0x83f   : > { %v7513_v16 = vmul.f32 %v13388_v21, %v7474_v36  ;;  %v7514_v9 = vmul.f32 %v13388_v21, %v7475_v3  ;;  %v7127_v17 = vpop.f32.mrb[41].mxu1  ;;  %v7408_v54 = vrot.slane %v10278_v50, 1 }
 0x840   : > { %v10279_v44 = vpop.f32.mrb[42].mxu1  ;;  %v7406_v57 = vrot.slane %v7127_v17, 1 }
 0x841   : > { %v7552_v18 = vadd.f32 %v13394_v61, %v7513_v16  ;;  %v7553_v34 = vadd.f32 %v13394_v61, %v7514_v9  ;;  %v7130_v5 = vpop.f32.mrb[43].mxu1 }
 0x842   : > { %v7407_v6 = vrot.slane %v7130_v5, 1 }
 0x843   : > { %v7584_v52 = vmax.f32 %v7552_v18, 0.0  ;;  %v7585_v51 = vmax.f32 %v7553_v34, 0.0 }
 0x844   : > { %v7434_v43 = vsel %vm3840_vm1, %v7407_v6, %v7408_v54  ;;  %v7435_v49 = vsel %vm3840_vm1, %v7406_v57, %v7407_v6 }
 0x845   : > { %7616 = vst [vmem:[%s13406_s18 + $0x90] sm:$0xff] %v7584_v52  ;;  %7617 = vst [vmem:[%s13406_s18 + $0x98] sm:$0xff] %v7585_v51  ;;  %v7476_v48 = vadd.f32 %v7435_v49, %v13318_v23  ;;  %v7477_v33 = vadd.f32 %v7434_v43, %v13323_v14 }
 0x846   : > { %v10282_v38 = vpop.f32.mrb[44].mxu1 }
 0x847   : > { %v7515_v46 = vmul.f32 %v13388_v21, %v7476_v48  ;;  %v7516_v47 = vmul.f32 %v13388_v21, %v7477_v33  ;;  %v7142_v15 = vpop.f32.mrb[45].mxu1  ;;  %v7411_v1 = vrot.slane %v10282_v38, 1 }
 0x848   : > { %v10283_v13 = vpop.f32.mrb[46].mxu1  ;;  %v7409_v41 = vrot.slane %v7142_v15, 1 }
 0x849   : > { %v7554_v25 = vadd.f32 %v13394_v61, %v7515_v46  ;;  %v7555_v10 = vadd.f32 %v13394_v61, %v7516_v47  ;;  %v7145_v40 = vpop.f32.mrb[47].mxu1 }
 0x84a   : > { %v7410_v30 = vrot.slane %v7145_v40, 1 }
 0x84b   : > { %v7586_v23 = vmax.f32 %v7554_v25, 0.0  ;;  %v7587_v37 = vmax.f32 %v7555_v10, 0.0 }
 0x84c   : > { %v7432_v14 = vsel %vm3840_vm1, %v7410_v30, %v7411_v1  ;;  %v7433_v7 = vsel %vm3840_vm1, %v7409_v41, %v7410_v30 }
 0x84d   : > { %7618 = vst [vmem:[%s13406_s18 + $0xa0] sm:$0xff] %v7586_v23  ;;  %7619 = vst [vmem:[%s13406_s18 + $0xa8] sm:$0xff] %v7587_v37  ;;  %v7478_v35 = vadd.f32 %v7433_v7, %v13328_v31  ;;  %v7479_v19 = vadd.f32 %v7432_v14, %v13333_v62 }
 0x84e   : > { %v10286_v59 = vpop.f32.mrb[48].mxu1 }
 0x84f   : > { %v7517_v58 = vmul.f32 %v13388_v21, %v7478_v35  ;;  %v7518_v20 = vmul.f32 %v13388_v21, %v7479_v19  ;;  %v7157_v2 = vpop.f32.mrb[49].mxu1  ;;  %v7414_v26 = vrot.slane %v10286_v59, 1 }
 0x850   : > { %v10287_v32 = vpop.f32.mrb[50].mxu1  ;;  %v7412_v55 = vrot.slane %v7157_v2, 1 }
 0x851   : > { %v7556_v8 = vadd.f32 %v13394_v61, %v7517_v58  ;;  %v7557_v29 = vadd.f32 %v13394_v61, %v7518_v20  ;;  %v7160_v39 = vpop.f32.mrb[51].mxu1 }
 0x852   : > { %v7413_v63 = vrot.slane %v7160_v39, 1 }
 0x853   : > { %v7588_v31 = vmax.f32 %v7556_v8, 0.0  ;;  %v7589_v28 = vmax.f32 %v7557_v29, 0.0 }
 0x854   : > { %v7430_v62 = vsel %vm3840_vm1, %v7413_v63, %v7414_v26  ;;  %v7431_v11 = vsel %vm3840_vm1, %v7412_v55, %v7413_v63 }
 0x855   : > { %7620 = vst [vmem:[%s13406_s18 + $0xb0] sm:$0xff] %v7588_v31  ;;  %7621 = vst [vmem:[%s13406_s18 + $0xb8] sm:$0xff] %v7589_v28  ;;  %v7480_v42 = vadd.f32 %v7431_v11, %v13338_v45  ;;  %v7481_v24 = vadd.f32 %v7430_v62, %v13343_v22 }
 0x856   : > { %v10290_v36 = vpop.f32.mrb[52].mxu1 }
 0x857   : > { %v7519_v3 = vmul.f32 %v13388_v21, %v7480_v42  ;;  %v7520_v50 = vmul.f32 %v13388_v21, %v7481_v24  ;;  %v7172_v16 = vpop.f32.mrb[53].mxu1  ;;  %v7417_v34 = vrot.slane %v10290_v36, 1 }
 0x858   : > { %v10291_v9 = vpop.f32.mrb[54].mxu1  ;;  %v7415_v5 = vrot.slane %v7172_v16, 1 }
 0x859   : > { %v7558_v17 = vadd.f32 %v13394_v61, %v7519_v3  ;;  %v7559_v44 = vadd.f32 %v13394_v61, %v7520_v50  ;;  %v7175_v18 = vpop.f32.mrb[55].mxu1 }
 0x85a   : > { %v7416_v54 = vrot.slane %v7175_v18, 1 }
 0x85b   : > { %v7590_v45 = vmax.f32 %v7558_v17, 0.0  ;;  %v7591_v57 = vmax.f32 %v7559_v44, 0.0 }
 0x85c   : > { %v7428_v22 = vsel %vm3840_vm1, %v7416_v54, %v7417_v34  ;;  %v7429_v6 = vsel %vm3840_vm1, %v7415_v5, %v7416_v54 }
 0x85d   : > { %7622 = vst [vmem:[%s13406_s18 + $0xc0] sm:$0xff] %v7590_v45  ;;  %7623 = vst [vmem:[%s13406_s18 + $0xc8] sm:$0xff] %v7591_v57  ;;  %v7482_v52 = vadd.f32 %v7429_v6, %v13348_v56  ;;  %v7483_v51 = vadd.f32 %v7428_v22, %v13353_v0 }
 0x85e   : > { %v10294_v43 = vpop.f32.mrb[56].mxu1 }
 0x85f   : > { %v7521_v49 = vmul.f32 %v13388_v21, %v7482_v52  ;;  %v7522_v48 = vmul.f32 %v13388_v21, %v7483_v51  ;;  %v7187_v33 = vpop.f32.mrb[57].mxu1  ;;  %v7420_v13 = vrot.slane %v10294_v43, 1 }
 0x860   : > { %v10295_v38 = vpop.f32.mrb[58].mxu1  ;;  %v7418_v25 = vrot.slane %v7187_v33, 1 }
 0x861   : > { %v7560_v46 = vadd.f32 %v13394_v61, %v7521_v49  ;;  %v7561_v47 = vadd.f32 %v13394_v61, %v7522_v48  ;;  %v7190_v15 = vpop.f32.mrb[59].mxu1 }
 0x862   : > { %v7419_v10 = vrot.slane %v7190_v15, 1 }
 0x863   : > { %v7592_v56 = vmax.f32 %v7560_v46, 0.0  ;;  %v7593_v40 = vmax.f32 %v7561_v47, 0.0 }
 0x864   : > { %v7426_v0 = vsel %vm3840_vm1, %v7419_v10, %v7420_v13  ;;  %v7427_v1 = vsel %vm3840_vm1, %v7418_v25, %v7419_v10 }
 0x865   : > { %7624 = vst [vmem:[%s13406_s18 + $0xd0] sm:$0xff] %v7592_v56  ;;  %7625 = vst [vmem:[%s13406_s18 + $0xd8] sm:$0xff] %v7593_v40  ;;  %v7484_v41 = vadd.f32 %v7427_v1, %v13358_v53  ;;  %v7485_v30 = vadd.f32 %v7426_v0, %v13363_v27 }
 0x866   : > { %v10298_v23 = vpop.f32.mrb[60].mxu1 }
 0x867   : > { %v7523_v37 = vmul.f32 %v13388_v21, %v7484_v41  ;;  %v7524_v14 = vmul.f32 %v13388_v21, %v7485_v30  ;;  %v7202_v7 = vpop.f32.mrb[61].mxu1  ;;  %v7423_v20 = vrot.slane %v10298_v23, 1 }
 0x868   : > { %v10299_v35 = vpop.f32.mrb[62].mxu1  ;;  %v7421_v53 = vrot.slane %v7202_v7, 1 }
 0x869   : > { %v7562_v19 = vadd.f32 %v13394_v61, %v7523_v37  ;;  %v7563_v59 = vadd.f32 %v13394_v61, %v7524_v14  ;;  %v7205_v58 = vpop.f32.mrb[63].mxu1 }
 0x86a   : > { %v7422_v2 = vrot.slane %v7205_v58, 1 }
 0x86b   : > { %v7594_v27 = vmax.f32 %v7562_v19, 0.0  ;;  %v7595_v32 = vmax.f32 %v7563_v59, 0.0 }
 0x86c   : > { %v7424_v8 = vsel %vm3840_vm1, %v7422_v2, %v7423_v20  ;;  %v7425_v29 = vsel %vm3840_vm1, %v7421_v53, %v7422_v2 }
 0x86d   : > { %7626 = vst [vmem:[%s13406_s18 + $0xe0] sm:$0xff] %v7594_v27  ;;  %7627 = vst [vmem:[%s13406_s18 + $0xe8] sm:$0xff] %v7595_v32  ;;  %v7486_v39 = vadd.f32 %v7425_v29, %v13368_v4  ;;  %v7487_v26 = vadd.f32 %v7424_v8, %v13378_v60 }
 0x86f   : > { %v7525_v55 = vmul.f32 %v13388_v21, %v7486_v39  ;;  %v7526_v63 = vmul.f32 %v13388_v21, %v7487_v26 }
 0x871   : > { %v7564_v31 = vadd.f32 %v13394_v61, %v7525_v55  ;;  %v7565_v12 = vadd.f32 %v13394_v61, %v7526_v63 }
 0x873   : > { %v7596_v4 = vmax.f32 %v7564_v31, 0.0  ;;  %v7597_v60 = vmax.f32 %v7565_v12, 0.0 }
 0x875   : > { %7628 = vst [vmem:[%s13406_s18 + $0xf0] sm:$0xff] %v7596_v4  ;;  %7629 = vst [vmem:[%s13406_s18 + $0xf8] sm:$0xff] %v7597_v60 }
 0x876   : > { %11043 = shalt.err (!%p11040_p3)
}
 0x877   : > { %s11044_s9 = scalar_lea.hbm %s13589_s22, 4096  ;;  %s11048_s17 = scalar_lea.hbm %s13645_s7, 8192 }
 0x878   : > { %p11045_p4 = scmp.ne.s32.totalorder %s13589_s22, %s11044_s9  ;;  %p11049_p9 = scmp.lt.u32.totalorder %s13589_s22, %s13645_s7 }
 0x879   : > { %p11050_p10 = scmp.lt.u32.totalorder %s11048_s17, %s11044_s9  ;;  %p11052_p12 = scmp.lt.u32.totalorder %s11044_s9, %s13589_s22 }
 0x87a   : > { %p11046_p7 = pnand %p11045_p4, %p11176_p5 }
 0x87b   : > { %p11051_p11 = por %p11050_p10, %p11049_p9 }
 0x87c   : > { %p11047_p8 = pneg %p11046_p7 }
 0x87d   : > { %p11053_p13 = por %p11052_p12, %p11051_p11 }
 0x87f   : > { %p11054_p0 = pnand %p11053_p13, %p11047_p8 }
 0x881   : > { %11057 = shalt.err (!%p11054_p0)
}
 0x882   : > { %s11096_s21 = smov 128   ;;  %s11097_s23 = smov 8  }
 0x883   : > { %10812 = dma.vmem_to_hbm [thread:$0]  (%p11176_p5), %s13591_s20, 4096, %s13589_s22, %s13597_s28, %s11096_s21, %s11096_s21, %s11097_s23  }
 0x884 PF: > { %p10818_p1 = scmp.ge.s32.totalorder %s11092_s27, 2  ;;  %s7659_s29 = sand.u32 1, %s11080_s24  }
 0x885   : > { %s7660_s8 = scalar_lea.sflag [#allocation4], %s7659_s29 }
 0x886   : > { %p10815_p2 = pnand %p10818_p1, %p11180_p6 }
 0x888   : > { %11075 = dma.done.wait (!%p10815_p2), %s7660_s8, 4096  }
 0x889   : > { %11077 = vsyncadd (!%p10815_p2), %s7660_s8, 4294963200  ;;  %p17_p3 = scmp.ge.s32.totalorder %s11163_s30, 4   ;;  %s13769_s24 = smov %s11084_s25 }
 0x88a   : > { %s13770_s25 = smov %s11088_s26  ;;  %s13771_s26 = smov %s11174_s10 }
 0x88b   : > { %s13772_s27 = smov %s11163_s30  ;;  %19 = sbr.rel (!%p17_p3) target bundleno = 3 (0x3), region = 101 }
 0x892   :  { %7665 = vsyncpa [#allocation4], 1 }
 0x893   :  { %7667 = vsyncpa [#allocation4 + $0x1], 1 }

</bundles_post_ra>
